<compile_context>
chip_gen: v7x
topology: tpu7x:2x2x1
jax: 0.10.0
libtpu: 0.0.40
codegen_flags: <defaults>
</compile_context>

<pallas_src>
import functools

import jax
import jax.numpy as jnp
from jax import lax
from jax.experimental import pallas as pl
from jax.experimental.pallas import tpu as pltpu


def _okonv2d_kernel(x_ref, w_ref, bconv_ref, ts_ref, tb_ref, g_ref, bln_ref,
                    o_ref, *, degree, stride, padding, k, tile_rows, out_w,
                    hp_total, eps, out_norm):
    # x_ref:  (C, TH_in, Wp)        one padded input row-tile (halo included)
    # w_ref:  (Cout, K*K*(D+1)*C)   im2col weight, col = (ky*K+kx)*DC + d*C + c
    # bconv_ref, g_ref, bln_ref: (Cout, 1) VMEM;  ts_ref, tb_ref: (C,) SMEM
    # o_ref:  (Cout, TH*Wo)         lane-dense output tile (flattened spatial)
    C, th_in, wp = x_ref.shape
    dc = (degree + 1) * C
    nt = tile_rows * out_w

    x = x_ref[...].astype(jnp.float32)

    # tanh(scale * x + bias): per-channel scalar splats from SMEM (lane-dense
    # (rows, Wp) slabs on the VPU/EUP; no wasted channel lanes).
    t = jnp.stack(
        [jnp.tanh(ts_ref[c] * x[c] + tb_ref[c]) for c in range(C)],
        axis=0)                                             # (C, TH_in, Wp)

    # Legendre polynomials P_0..P_degree (recurrence), stacked on the channel
    # axis in the order d*C + c (must match the weight permutation in glue).
    polys = [jnp.ones_like(t)]
    if degree >= 1:
        polys.append(t)
    for n in range(1, degree):
        polys.append(((2.0 * n + 1.0) * t * polys[-1] - n * polys[-2])
                     / (n + 1.0))
    feats = jnp.concatenate(polys, axis=0)                  # (DC, TH_in, Wp)

    # PyTorch zero-pads the conv *input* (the Legendre features).  We padded x
    # in glue instead, so zero the padded border of the stacked features —
    # once, and only when padding is actually used.
    if padding > 0:
        row0 = pl.program_id(1) * (tile_rows * stride)      # global padded row
        grow = lax.broadcasted_iota(jnp.int32, (1, th_in, wp), 1) + row0
        gcol = lax.broadcasted_iota(jnp.int32, (1, th_in, wp), 2)
        valid = ((grow >= padding) & (grow < hp_total - padding) &
                 (gcol >= padding) & (gcol < wp - padding))
        feats = feats * valid.astype(feats.dtype)

    # im2col: K*K shifted/strided windows stacked along the contraction axis.
    rows = []
    for ky in range(k):
        for kx in range(k):
            if stride == 1:
                win = feats[:, ky:ky + tile_rows, kx:kx + out_w]
            else:
                win = lax.slice(
                    feats, (0, ky, kx),
                    (dc, ky + (tile_rows - 1) * stride + 1,
                     kx + (out_w - 1) * stride + 1),
                    (1, stride, stride))
            rows.append(win.reshape(dc, nt))                # (DC, TH*Wo)
    patch = jnp.concatenate(rows, axis=0)                   # (K*K*DC, TH*Wo)

    # Single deep-contraction MXU matmul; result is lane-dense (Cout, TH*Wo).
    acc = jnp.dot(w_ref[...], patch, preferred_element_type=jnp.float32)
    acc = acc + bconv_ref[...]                              # (Cout, 1) bcast

    if out_norm:
        # LayerNorm over channels per output spatial position (biased var).
        mu = jnp.mean(acc, axis=0, keepdims=True)
        var = jnp.mean(jnp.square(acc - mu), axis=0, keepdims=True)
        acc = (acc - mu) * lax.rsqrt(var + eps)
        acc = acc * g_ref[...] + bln_ref[...]

    o_ref[...] = acc.astype(o_ref.dtype)


def _choose_row_tile(out_h, out_w, target_lanes=1024):
    """Largest-enough row tile TH with TH | Ho and (TH*Wo) % 128 == 0."""
    cands = [th for th in range(1, out_h)
             if out_h % th == 0 and (th * out_w) % 128 == 0]
    for th in cands:
        if th * out_w >= target_lanes:
            return th
    return cands[-1] if cands else out_h


def okonv2d_forward(x_nchw, params, *, degree=4, padding=0, stride=1,
                    out_norm=True, eps=1e-5):
    w = params["conv_w"]          # (Cout, C*(degree+1), K, K), PyTorch OIHW
    bconv = params["conv_b"]      # (Cout,)
    ts = params["tanh_scale"]     # (C,)
    tb = params["tanh_bias"]      # (C,)
    gamma = params["ln_gamma"]    # (Cout,)
    beta = params["ln_beta"]      # (Cout,)

    B, C, H, W = x_nchw.shape
    Cout, cin_tot, K, _ = w.shape
    assert cin_tot == C * (degree + 1)
    Hp, Wp = H + 2 * padding, W + 2 * padding
    Ho = (Hp - K) // stride + 1
    Wo = (Wp - K) // stride + 1
    DC = (degree + 1) * C
    L = K * K * DC

    # Row tiling: grid = (B, Ho/TH).  Halo rows are duplicated host-side so
    # all in-kernel indexing stays static; TH*Wo is the lane-dense store width.
    TH = _choose_row_tile(Ho, Wo)
    n_th = Ho // TH
    TH_in = (TH - 1) * stride + K
    NT = TH * Wo

    # Glue: spatial zero-pad (NCHW kept -> channel-major inside the kernel),
    # then gather overlapping row tiles: (B, n_th, C, TH_in, Wp).
    x_pad = jnp.pad(x_nchw, ((0, 0), (0, 0), (padding, padding),
                             (padding, padding)))
    x_tiles = jnp.stack(
        [lax.slice_in_dim(x_pad, t * TH * stride, t * TH * stride + TH_in,
                          axis=2) for t in range(n_th)],
        axis=1)

    # Weight -> final im2col matmul layout (Cout, K*K*(D+1)*C).  Torch
    # in-channel index is c*(degree+1)+d; target column index is
    # (ky*K + kx)*(D+1)*C + d*C + c.
    w_mat = jnp.transpose(w.reshape(Cout, C, degree + 1, K, K),
                          (0, 3, 4, 2, 1)).reshape(Cout, L)

    kernel = functools.partial(
        _okonv2d_kernel, degree=degree, stride=stride, padding=padding, k=K,
        tile_rows=TH, out_w=Wo, hp_total=Hp, eps=eps, out_norm=out_norm)

    # VMEM budget from the actual f32 tile footprint (2x headroom), capped.
    tile_f32 = (2 * C * TH_in * Wp                 # double-buffered input tile
                + Cout * L                         # resident weight
                + (degree + 3) * C * TH_in * Wp    # t + polys + stacked feats
                + 2 * L * NT                       # windows + patch matrix
                + 6 * Cout * NT)                   # acc / LN temps / out bufs
    vmem_limit = int(min(48 * 2 ** 20, max(8 * 2 ** 20, 8 * tile_f32)))

    out_flat = pl.pallas_call(
        kernel,
        out_shape=jax.ShapeDtypeStruct((B, Cout, Ho * Wo), x_nchw.dtype),
        grid_spec=pltpu.PrefetchScalarGridSpec(
            num_scalar_prefetch=0,
            grid=(B, n_th),
            in_specs=[
                pl.BlockSpec((None, None, C, TH_in, Wp),
                             lambda b, t: (b, t, 0, 0, 0)),
                pl.BlockSpec((Cout, L), lambda b, t: (0, 0)),
                pl.BlockSpec((Cout, 1), lambda b, t: (0, 0)),
                pl.BlockSpec(memory_space=pltpu.MemorySpace.SMEM),
                pl.BlockSpec(memory_space=pltpu.MemorySpace.SMEM),
                pl.BlockSpec((Cout, 1), lambda b, t: (0, 0)),
                pl.BlockSpec((Cout, 1), lambda b, t: (0, 0)),
            ],
            out_specs=pl.BlockSpec((None, Cout, NT), lambda b, t: (b, 0, t)),
        ),
        compiler_params=pltpu.CompilerParams(
            dimension_semantics=("parallel", "parallel"),
            vmem_limit_bytes=vmem_limit),
    )(x_tiles, w_mat, bconv.reshape(Cout, 1), ts, tb,
      gamma.reshape(Cout, 1), beta.reshape(Cout, 1))

    # Output is already NCHW (channel-major); the reshape is metadata-only.
    return out_flat.reshape(B, Cout, Ho, Wo)


def okonv2d_reference(x, params, *, degree, padding, stride, out_norm,
                      eps=1e-5):
    """Pure-JAX reference mirroring the PyTorch forward (NCHW)."""
    w, b = params["conv_w"], params["conv_b"]
    ts, tb = params["tanh_scale"], params["tanh_bias"]
    g, beta = params["ln_gamma"], params["ln_beta"]
    B, C, H, W = x.shape
    t = jnp.tanh(ts.reshape(1, C, 1, 1) * x + tb.reshape(1, C, 1, 1))
    polys = [jnp.ones_like(t)]
    if degree >= 1:
        polys.append(t)
    for n in range(1, degree):
        polys.append(((2.0 * n + 1.0) * t * polys[-1] - n * polys[-2])
                     / (n + 1.0))
    feat = jnp.stack(polys, axis=2).reshape(B, C * (degree + 1), H, W)
    y = lax.conv_general_dilated(
        feat, w, (stride, stride),
        [(padding, padding), (padding, padding)],
        dimension_numbers=("NCHW", "OIHW", "NCHW"))
    y = y + b.reshape(1, -1, 1, 1)
    if out_norm:
        mu = jnp.mean(y, axis=1, keepdims=True)
        var = jnp.mean(jnp.square(y - mu), axis=1, keepdims=True)
        y = (y - mu) / jnp.sqrt(var + eps)
        y = y * g.reshape(1, -1, 1, 1) + beta.reshape(1, -1, 1, 1)
    return y


if __name__ == "__main__":
    B, C, H, W = 2, 4, 16, 16
    Cout, K, degree, padding, stride = 8, 3, 4, 1, 1

    key = jax.random.PRNGKey(0)
    k1, k2, k3, k4, k5, k6, k7 = jax.random.split(key, 7)
    params = dict(
        conv_w=0.1 * jax.random.normal(
            k1, (Cout, C * (degree + 1), K, K), jnp.float32),
        conv_b=0.1 * jax.random.normal(k2, (Cout,), jnp.float32),
        tanh_scale=1.0 + 0.1 * jax.random.normal(k3, (C,), jnp.float32),
        tanh_bias=0.1 * jax.random.normal(k4, (C,), jnp.float32),
        ln_gamma=1.0 + 0.1 * jax.random.normal(k5, (Cout,), jnp.float32),
        ln_beta=0.1 * jax.random.normal(k6, (Cout,), jnp.float32),
    )
    x = jax.random.normal(k7, (B, C, H, W), jnp.float32)

    out = okonv2d_forward(x, params, degree=degree, padding=padding,
                          stride=stride, out_norm=True)
    out = jax.block_until_ready(out)

    ref = okonv2d_reference(x, params, degree=degree, padding=padding,
                            stride=stride, out_norm=True)

    assert out.shape == ref.shape == (B, Cout, H, W), (out.shape, ref.shape)
    assert jnp.allclose(out, ref, atol=1e-4, rtol=1e-4), (
        "max abs err = %g" % float(jnp.max(jnp.abs(out - ref))))
    print("KERNEL_OK")
</pallas_src>

<mosaic_0001>
module attributes {stable_mosaic.version = 11 : i64} {
  func.func @_okonv2d_kernel(%arg0: i32, %arg1: i32, %arg2: memref<1x1x4x10x18xf32, #tpu.memory_space<vmem>>, %arg3: memref<8x180xf32, #tpu.memory_space<vmem>>, %arg4: memref<8x1xf32, #tpu.memory_space<vmem>>, %arg5: memref<4xf32, #tpu.memory_space<smem>>, %arg6: memref<4xf32, #tpu.memory_space<smem>>, %arg7: memref<8x1xf32, #tpu.memory_space<vmem>>, %arg8: memref<8x1xf32, #tpu.memory_space<vmem>>, %arg9: memref<1x8x128xf32, #tpu.memory_space<vmem>>) attributes {dimension_semantics = [#tpu.dimension_semantics<parallel>, #tpu.dimension_semantics<parallel>], iteration_bounds = array<i64: 2, 2>, scalar_prefetch = 0 : i64, scratch_operands = 0 : i64, tpu.core_type = #tpu.core_type<tc>, window_params = [{transform_indices = @transform_0, window_bounds = array<i64: 1, 1, 4, 10, 18>}, {pipeline_mode = #tpu.pipeline_mode<synchronous>, transform_indices = @transform_1, window_bounds = array<i64: 8, 180>}, {pipeline_mode = #tpu.pipeline_mode<synchronous>, transform_indices = @transform_2, window_bounds = array<i64: 8, 1>}, {transform_indices = @transform_3, window_bounds = array<i64: 4>}, {transform_indices = @transform_4, window_bounds = array<i64: 4>}, {pipeline_mode = #tpu.pipeline_mode<synchronous>, transform_indices = @transform_5, window_bounds = array<i64: 8, 1>}, {pipeline_mode = #tpu.pipeline_mode<synchronous>, transform_indices = @transform_6, window_bounds = array<i64: 8, 1>}, {transform_indices = @transform_7, window_bounds = array<i64: 1, 8, 128>}]} {
    %c0 = arith.constant 0 : index
    %c0_0 = arith.constant 0 : index
    %c0_1 = arith.constant 0 : index
    %c0_2 = arith.constant 0 : index
    %c0_3 = arith.constant 0 : index
    %0 = vector.load %arg2[%c0, %c0_0, %c0_1, %c0_2, %c0_3] : memref<1x1x4x10x18xf32, #tpu.memory_space<vmem>>, vector<1x1x4x10x18xf32>
    %1 = vector.shape_cast %0 : vector<1x1x4x10x18xf32> to vector<4x10x18xf32>
    %c0_4 = arith.constant 0 : index
    %2 = memref.load %arg5[%c0_4] : memref<4xf32, #tpu.memory_space<smem>>
    %3 = vector.extract_strided_slice %1 {offsets = [0, 0, 0], sizes = [1, 10, 18], strides = [1, 1, 1]} : vector<4x10x18xf32> to vector<1x10x18xf32>
    %4 = vector.shape_cast %3 : vector<1x10x18xf32> to vector<10x18xf32>
    %5 = vector.broadcast %2 : f32 to vector<10x18xf32>
    %6 = arith.mulf %5, %4 : vector<10x18xf32>
    %c0_5 = arith.constant 0 : index
    %7 = memref.load %arg6[%c0_5] : memref<4xf32, #tpu.memory_space<smem>>
    %8 = vector.broadcast %7 : f32 to vector<10x18xf32>
    %9 = arith.addf %6, %8 : vector<10x18xf32>
    %10 = math.tanh %9 : vector<10x18xf32>
    %c1 = arith.constant 1 : index
    %11 = memref.load %arg5[%c1] : memref<4xf32, #tpu.memory_space<smem>>
    %12 = vector.extract_strided_slice %1 {offsets = [1, 0, 0], sizes = [1, 10, 18], strides = [1, 1, 1]} : vector<4x10x18xf32> to vector<1x10x18xf32>
    %13 = vector.shape_cast %12 : vector<1x10x18xf32> to vector<10x18xf32>
    %14 = vector.broadcast %11 : f32 to vector<10x18xf32>
    %15 = arith.mulf %14, %13 : vector<10x18xf32>
    %c1_6 = arith.constant 1 : index
    %16 = memref.load %arg6[%c1_6] : memref<4xf32, #tpu.memory_space<smem>>
    %17 = vector.broadcast %16 : f32 to vector<10x18xf32>
    %18 = arith.addf %15, %17 : vector<10x18xf32>
    %19 = math.tanh %18 : vector<10x18xf32>
    %c2 = arith.constant 2 : index
    %20 = memref.load %arg5[%c2] : memref<4xf32, #tpu.memory_space<smem>>
    %21 = vector.extract_strided_slice %1 {offsets = [2, 0, 0], sizes = [1, 10, 18], strides = [1, 1, 1]} : vector<4x10x18xf32> to vector<1x10x18xf32>
    %22 = vector.shape_cast %21 : vector<1x10x18xf32> to vector<10x18xf32>
    %23 = vector.broadcast %20 : f32 to vector<10x18xf32>
    %24 = arith.mulf %23, %22 : vector<10x18xf32>
    %c2_7 = arith.constant 2 : index
    %25 = memref.load %arg6[%c2_7] : memref<4xf32, #tpu.memory_space<smem>>
    %26 = vector.broadcast %25 : f32 to vector<10x18xf32>
    %27 = arith.addf %24, %26 : vector<10x18xf32>
    %28 = math.tanh %27 : vector<10x18xf32>
    %c3 = arith.constant 3 : index
    %29 = memref.load %arg5[%c3] : memref<4xf32, #tpu.memory_space<smem>>
    %30 = vector.extract_strided_slice %1 {offsets = [3, 0, 0], sizes = [1, 10, 18], strides = [1, 1, 1]} : vector<4x10x18xf32> to vector<1x10x18xf32>
    %31 = vector.shape_cast %30 : vector<1x10x18xf32> to vector<10x18xf32>
    %32 = vector.broadcast %29 : f32 to vector<10x18xf32>
    %33 = arith.mulf %32, %31 : vector<10x18xf32>
    %c3_8 = arith.constant 3 : index
    %34 = memref.load %arg6[%c3_8] : memref<4xf32, #tpu.memory_space<smem>>
    %35 = vector.broadcast %34 : f32 to vector<10x18xf32>
    %36 = arith.addf %33, %35 : vector<10x18xf32>
    %37 = math.tanh %36 : vector<10x18xf32>
    %38 = vector.shape_cast %10 : vector<10x18xf32> to vector<1x10x18xf32>
    %39 = vector.shape_cast %19 : vector<10x18xf32> to vector<1x10x18xf32>
    %40 = vector.shape_cast %28 : vector<10x18xf32> to vector<1x10x18xf32>
    %41 = vector.shape_cast %37 : vector<10x18xf32> to vector<1x10x18xf32>
    %42 = tpu.concatenate %38, %39, %40, %41 in 0 : vector<1x10x18xf32>, vector<1x10x18xf32>, vector<1x10x18xf32>, vector<1x10x18xf32> -> vector<4x10x18xf32>
    %cst = arith.constant 1.000000e+00 : f32
    %43 = vector.broadcast %cst : f32 to vector<4x10x18xf32>
    %cst_9 = arith.constant 3.000000e+00 : f32
    %44 = vector.broadcast %cst_9 : f32 to vector<4x10x18xf32>
    %45 = arith.mulf %44, %42 : vector<4x10x18xf32>
    %46 = arith.mulf %45, %42 : vector<4x10x18xf32>
    %cst_10 = arith.constant 1.000000e+00 : f32
    %47 = vector.broadcast %cst_10 : f32 to vector<4x10x18xf32>
    %48 = arith.mulf %47, %43 : vector<4x10x18xf32>
    %49 = arith.subf %46, %48 : vector<4x10x18xf32>
    %cst_11 = arith.constant 2.000000e+00 : f32
    %50 = vector.broadcast %cst_11 : f32 to vector<4x10x18xf32>
    %51 = arith.divf %49, %50 : vector<4x10x18xf32>
    %cst_12 = arith.constant 5.000000e+00 : f32
    %52 = vector.broadcast %cst_12 : f32 to vector<4x10x18xf32>
    %53 = arith.mulf %52, %42 : vector<4x10x18xf32>
    %54 = arith.mulf %53, %51 : vector<4x10x18xf32>
    %cst_13 = arith.constant 2.000000e+00 : f32
    %55 = vector.broadcast %cst_13 : f32 to vector<4x10x18xf32>
    %56 = arith.mulf %55, %42 : vector<4x10x18xf32>
    %57 = arith.subf %54, %56 : vector<4x10x18xf32>
    %cst_14 = arith.constant 3.000000e+00 : f32
    %58 = vector.broadcast %cst_14 : f32 to vector<4x10x18xf32>
    %59 = arith.divf %57, %58 : vector<4x10x18xf32>
    %cst_15 = arith.constant 7.000000e+00 : f32
    %60 = vector.broadcast %cst_15 : f32 to vector<4x10x18xf32>
    %61 = arith.mulf %60, %42 : vector<4x10x18xf32>
    %62 = arith.mulf %61, %59 : vector<4x10x18xf32>
    %cst_16 = arith.constant 3.000000e+00 : f32
    %63 = vector.broadcast %cst_16 : f32 to vector<4x10x18xf32>
    %64 = arith.mulf %63, %51 : vector<4x10x18xf32>
    %65 = arith.subf %62, %64 : vector<4x10x18xf32>
    %cst_17 = arith.constant 4.000000e+00 : f32
    %66 = vector.broadcast %cst_17 : f32 to vector<4x10x18xf32>
    %67 = arith.divf %65, %66 : vector<4x10x18xf32>
    %68 = tpu.concatenate %43, %42, %51, %59, %67 in 0 : vector<4x10x18xf32>, vector<4x10x18xf32>, vector<4x10x18xf32>, vector<4x10x18xf32>, vector<4x10x18xf32> -> vector<20x10x18xf32>
    %c8_i32 = arith.constant 8 : i32
    %69 = arith.muli %arg1, %c8_i32 : i32
    %70 = tpu.iota {dimensions = array<i32: 1>} : vector<1x10x18xi32>
    %71 = vector.broadcast %69 : i32 to vector<1x10x18xi32>
    %72 = arith.addi %70, %71 : vector<1x10x18xi32>
    %73 = tpu.iota {dimensions = array<i32: 2>} : vector<1x10x18xi32>
    %c1_i32 = arith.constant 1 : i32
    %74 = vector.broadcast %c1_i32 : i32 to vector<1x10x18xi32>
    %75 = arith.cmpi sge, %72, %74 : vector<1x10x18xi32>
    %c17_i32 = arith.constant 17 : i32
    %76 = vector.broadcast %c17_i32 : i32 to vector<1x10x18xi32>
    %77 = arith.cmpi slt, %72, %76 : vector<1x10x18xi32>
    %78 = arith.andi %75, %77 : vector<1x10x18xi1>
    %c1_i32_18 = arith.constant 1 : i32
    %79 = vector.broadcast %c1_i32_18 : i32 to vector<1x10x18xi32>
    %80 = arith.cmpi sge, %73, %79 : vector<1x10x18xi32>
    %81 = arith.andi %78, %80 : vector<1x10x18xi1>
    %c17_i32_19 = arith.constant 17 : i32
    %82 = vector.broadcast %c17_i32_19 : i32 to vector<1x10x18xi32>
    %83 = arith.cmpi slt, %73, %82 : vector<1x10x18xi32>
    %84 = arith.andi %81, %83 : vector<1x10x18xi1>
    %85 = arith.extui %84 : vector<1x10x18xi1> to vector<1x10x18xi32>
    %86 = arith.sitofp %85 : vector<1x10x18xi32> to vector<1x10x18xf32>
    %87 = vector.broadcast %86 : vector<1x10x18xf32> to vector<20x10x18xf32>
    %88 = arith.mulf %68, %87 : vector<20x10x18xf32>
    %89 = vector.extract_strided_slice %88 {offsets = [0, 0, 0], sizes = [20, 8, 16], strides = [1, 1, 1]} : vector<20x10x18xf32> to vector<20x8x16xf32>
    %90 = vector.shape_cast %89 : vector<20x8x16xf32> to vector<20x128xf32>
    %91 = vector.extract_strided_slice %88 {offsets = [0, 0, 1], sizes = [20, 8, 16], strides = [1, 1, 1]} : vector<20x10x18xf32> to vector<20x8x16xf32>
    %92 = vector.shape_cast %91 : vector<20x8x16xf32> to vector<20x128xf32>
    %93 = vector.extract_strided_slice %88 {offsets = [0, 0, 2], sizes = [20, 8, 16], strides = [1, 1, 1]} : vector<20x10x18xf32> to vector<20x8x16xf32>
    %94 = vector.shape_cast %93 : vector<20x8x16xf32> to vector<20x128xf32>
    %95 = vector.extract_strided_slice %88 {offsets = [0, 1, 0], sizes = [20, 8, 16], strides = [1, 1, 1]} : vector<20x10x18xf32> to vector<20x8x16xf32>
    %96 = vector.shape_cast %95 : vector<20x8x16xf32> to vector<20x128xf32>
    %97 = vector.extract_strided_slice %88 {offsets = [0, 1, 1], sizes = [20, 8, 16], strides = [1, 1, 1]} : vector<20x10x18xf32> to vector<20x8x16xf32>
    %98 = vector.shape_cast %97 : vector<20x8x16xf32> to vector<20x128xf32>
    %99 = vector.extract_strided_slice %88 {offsets = [0, 1, 2], sizes = [20, 8, 16], strides = [1, 1, 1]} : vector<20x10x18xf32> to vector<20x8x16xf32>
    %100 = vector.shape_cast %99 : vector<20x8x16xf32> to vector<20x128xf32>
    %101 = vector.extract_strided_slice %88 {offsets = [0, 2, 0], sizes = [20, 8, 16], strides = [1, 1, 1]} : vector<20x10x18xf32> to vector<20x8x16xf32>
    %102 = vector.shape_cast %101 : vector<20x8x16xf32> to vector<20x128xf32>
    %103 = vector.extract_strided_slice %88 {offsets = [0, 2, 1], sizes = [20, 8, 16], strides = [1, 1, 1]} : vector<20x10x18xf32> to vector<20x8x16xf32>
    %104 = vector.shape_cast %103 : vector<20x8x16xf32> to vector<20x128xf32>
    %105 = vector.extract_strided_slice %88 {offsets = [0, 2, 2], sizes = [20, 8, 16], strides = [1, 1, 1]} : vector<20x10x18xf32> to vector<20x8x16xf32>
    %106 = vector.shape_cast %105 : vector<20x8x16xf32> to vector<20x128xf32>
    %107 = tpu.concatenate %90, %92, %94, %96, %98, %100, %102, %104, %106 in 0 : vector<20x128xf32>, vector<20x128xf32>, vector<20x128xf32>, vector<20x128xf32>, vector<20x128xf32>, vector<20x128xf32>, vector<20x128xf32>, vector<20x128xf32>, vector<20x128xf32> -> vector<180x128xf32>
    %c0_20 = arith.constant 0 : index
    %c0_21 = arith.constant 0 : index
    %108 = vector.load %arg3[%c0_20, %c0_21] : memref<8x180xf32, #tpu.memory_space<vmem>>, vector<8x180xf32>
    %cst_22 = arith.constant dense<0.000000e+00> : vector<8x128xf32>
    %109 = tpu.matmul %108, %107, %cst_22 {dimension_numbers = #tpu.dot_dimension_numbers<[1], [0], [0], [1], [0, 0, 1, 1], [], []>} : vector<8x180xf32>, vector<180x128xf32>, vector<8x128xf32> -> vector<8x128xf32>
    %c0_23 = arith.constant 0 : index
    %c0_24 = arith.constant 0 : index
    %110 = vector.load %arg4[%c0_23, %c0_24] : memref<8x1xf32, #tpu.memory_space<vmem>>, vector<8x1xf32>
    %111 = vector.broadcast %110 : vector<8x1xf32> to vector<8x128xf32>
    %112 = arith.addf %109, %111 : vector<8x128xf32>
    %cst_25 = arith.constant dense<0.000000e+00> : vector<128xf32>
    %113 = vector.multi_reduction <add>, %112, %cst_25 [0] : vector<8x128xf32> to vector<128xf32>
    %114 = vector.shape_cast %113 : vector<128xf32> to vector<1x128xf32>
    %cst_26 = arith.constant 8.000000e+00 : f32
    %115 = vector.broadcast %cst_26 : f32 to vector<1x128xf32>
    %116 = arith.divf %114, %115 : vector<1x128xf32>
    %117 = vector.broadcast %116 : vector<1x128xf32> to vector<8x128xf32>
    %118 = arith.subf %112, %117 : vector<8x128xf32>
    %119 = arith.mulf %118, %118 : vector<8x128xf32>
    %cst_27 = arith.constant dense<0.000000e+00> : vector<128xf32>
    %120 = vector.multi_reduction <add>, %119, %cst_27 [0] : vector<8x128xf32> to vector<128xf32>
    %121 = vector.shape_cast %120 : vector<128xf32> to vector<1x128xf32>
    %cst_28 = arith.constant 8.000000e+00 : f32
    %122 = vector.broadcast %cst_28 : f32 to vector<1x128xf32>
    %123 = arith.divf %121, %122 : vector<1x128xf32>
    %124 = vector.broadcast %116 : vector<1x128xf32> to vector<8x128xf32>
    %125 = arith.subf %112, %124 : vector<8x128xf32>
    %cst_29 = arith.constant 9.99999974E-6 : f32
    %126 = vector.broadcast %cst_29 : f32 to vector<1x128xf32>
    %127 = arith.addf %123, %126 : vector<1x128xf32>
    %128 = math.rsqrt %127 : vector<1x128xf32>
    %129 = vector.broadcast %128 : vector<1x128xf32> to vector<8x128xf32>
    %130 = arith.mulf %125, %129 : vector<8x128xf32>
    %c0_30 = arith.constant 0 : index
    %c0_31 = arith.constant 0 : index
    %131 = vector.load %arg7[%c0_30, %c0_31] : memref<8x1xf32, #tpu.memory_space<vmem>>, vector<8x1xf32>
    %132 = vector.broadcast %131 : vector<8x1xf32> to vector<8x128xf32>
    %133 = arith.mulf %130, %132 : vector<8x128xf32>
    %c0_32 = arith.constant 0 : index
    %c0_33 = arith.constant 0 : index
    %134 = vector.load %arg8[%c0_32, %c0_33] : memref<8x1xf32, #tpu.memory_space<vmem>>, vector<8x1xf32>
    %135 = vector.broadcast %134 : vector<8x1xf32> to vector<8x128xf32>
    %136 = arith.addf %133, %135 : vector<8x128xf32>
    %c0_34 = arith.constant 0 : index
    %c0_35 = arith.constant 0 : index
    %c0_36 = arith.constant 0 : index
    %137 = vector.load %arg9[%c0_34, %c0_35, %c0_36] : memref<1x8x128xf32, #tpu.memory_space<vmem>>, vector<1x8x128xf32>
    %138 = vector.shape_cast %137 : vector<1x8x128xf32> to vector<8x128xf32>
    %139 = vector.shape_cast %136 : vector<8x128xf32> to vector<1x8x128xf32>
    tpu.vector_store %arg9[%c0_34, %c0_35, %c0_36], %139 {strides = array<i32>} : memref<1x8x128xf32, #tpu.memory_space<vmem>>, vector<1x8x128xf32>,
    return
  }
  func.func @transform_0(%arg0: i32, %arg1: i32) -> (i32, i32, i32, i32, i32) {
    %c0_i32 = arith.constant 0 : i32
    %c0_i32_0 = arith.constant 0 : i32
    %c0_i32_1 = arith.constant 0 : i32
    %c0_i32_2 = arith.constant 0 : i32
    return %arg0, %arg1, %c0_i32, %c0_i32_0, %c0_i32_1 : i32, i32, i32, i32, i32
  }
  func.func @transform_1(%arg0: i32, %arg1: i32) -> (i32, i32) {
    %c0_i32 = arith.constant 0 : i32
    %c0_i32_0 = arith.constant 0 : i32
    %c0_i32_1 = arith.constant 0 : i32
    return %c0_i32, %c0_i32_0 : i32, i32
  }
  func.func @transform_2(%arg0: i32, %arg1: i32) -> (i32, i32) {
    %c0_i32 = arith.constant 0 : i32
    %c0_i32_0 = arith.constant 0 : i32
    %c0_i32_1 = arith.constant 0 : i32
    return %c0_i32, %c0_i32_0 : i32, i32
  }
  func.func @transform_3(%arg0: i32, %arg1: i32) -> i32 {
    %c0_i32 = arith.constant 0 : i32
    %c0_i32_0 = arith.constant 0 : i32
    return %c0_i32 : i32
  }
  func.func @transform_4(%arg0: i32, %arg1: i32) -> i32 {
    %c0_i32 = arith.constant 0 : i32
    %c0_i32_0 = arith.constant 0 : i32
    return %c0_i32 : i32
  }
  func.func @transform_5(%arg0: i32, %arg1: i32) -> (i32, i32) {
    %c0_i32 = arith.constant 0 : i32
    %c0_i32_0 = arith.constant 0 : i32
    %c0_i32_1 = arith.constant 0 : i32
    return %c0_i32, %c0_i32_0 : i32, i32
  }
  func.func @transform_6(%arg0: i32, %arg1: i32) -> (i32, i32) {
    %c0_i32 = arith.constant 0 : i32
    %c0_i32_0 = arith.constant 0 : i32
    %c0_i32_1 = arith.constant 0 : i32
    return %c0_i32, %c0_i32_0 : i32, i32
  }
  func.func @transform_7(%arg0: i32, %arg1: i32) -> (i32, i32, i32) {
    %c0_i32 = arith.constant 0 : i32
    %c0_i32_0 = arith.constant 0 : i32
    return %arg0, %c0_i32, %arg1 : i32, i32, i32
  }
}

</mosaic_0001>

<bundles_post_ra>
// kernel: tpu_custom_call.1
= control target key start
LH: loop header
LB: loop body
LE: loop exit
PB: predicated region body
PF: predicated region fallthrough
CT: control target
= control target key end

     0   :  { %s9138_s0 = inlined_call_operand.vmem [shape: f32[2,2,4,10,18], index: 0, kind: input, shape index: {}]   ;;  %s9139_s1 = inlined_call_operand.vmem [shape: f32[8,180], index: 1, kind: input, shape index: {}]   ;;  %s9140_s2 = inlined_call_operand.vmem [shape: f32[8,1], index: 2, kind: input, shape index: {}]   ;;  %s9141_s3 = inlined_call_operand.vmem [shape: f32[4], index: 3, kind: input, shape index: {}]   ;;  %s9142_s4 = inlined_call_operand.vmem [shape: f32[4], index: 4, kind: input, shape index: {}]   ;;  %s9143_s5 = inlined_call_operand.vmem [shape: f32[8,1], index: 5, kind: input, shape index: {}]   ;;  %s9144_s6 = inlined_call_operand.vmem [shape: f32[8,1], index: 6, kind: input, shape index: {}]   ;;  %s9145_s7 = inlined_call_operand.hbm [shape: f32[2,8,256], index: 7, kind: output, shape index: {}]  }
   0x1   :  { %9324 = sst [smem:[#allocation99_spill]] %s9141_s3 }
   0x2   :  { %12 = vsyncpa [#allocation4], 0 }
   0x3   :  { %13 = vsyncpa [#allocation6], 0 }
   0x4   :  { %14 = vsyncpa [#allocation3], 0 }
   0x5   :  { %16 = vsyncpa [#allocation3 + $0x1], 0  ;;  %s6003_s24 = smov 0   ;;  %s6005_s25 = smov 0  }
   0x6   :  { %s6007_s26 = smov 0   ;;  %s6009_s27 = smov 0  }
   0x7   :  { %s6011_s28 = smov 0   ;;  %s6013_s29 = smov 0  }
   0x8   :  { %s6015_s30 = smov 0   ;;  %s6017_s8 = smov 0  }
   0x9 LB: > { %s5186_s9 = sadd.s32 4294967295, %s5944_s8   ;;  %s5187_s10 = sadd.s32 4294967294, %s5944_s8   ;;  %s5944_s8 = sphi %s6017_s8, %s22_s8   ;;  %s5940_s30 = sphi %s6015_s30, %s9711_s30   ;;  %s5936_s29 = sphi %s6013_s29, %s9710_s29   ;;  %s5932_s28 = sphi %s6011_s28, %s9709_s28   ;;  %s5928_s27 = sphi %s6009_s27, %s9708_s27   ;;  %s5924_s26 = sphi %s6007_s26, %s9707_s26   ;;  %s5920_s25 = sphi %s6005_s25, %s9706_s25   ;;  %s5916_s24 = sphi %s6003_s24, %s9705_s24  }
   0xa   : > { %s31_s11 = sadd.s32 1, %s5936_s29  ;;  %s34_s12 = sadd.s32 1, %s5940_s30 }
   0xb   : > { %p32_p0 = scmp.ge.s32.totalorder %s31_s11, 2  ;;  %s197_s13 = sadd.s32 1, %s5924_s26 }
   0xc   : > { %p207_p1 = scmp.ne.s32.totalorder %s5924_s26, %s5920_s25  ;;  %p208_p2 = scmp.eq.s32.totalorder %s5186_s9, 3 }
   0xd   : > { %s9713_s11 = smov (%p32_p0, %s31_s11), 0  ;;  %s9715_s12 = smov (!%p32_p0, %s34_s12), %s5940_s30 }
   0xe   : > { %s193_s14 = ssub.s32 %s5936_s29, %s9713_s11  ;;  %p6055_p3 = por %p208_p2, %p207_p1 }
   0xf   : > { %p36_p4 = scmp.ge.s32.totalorder %s9715_s12, 2  ;;  %p213_p5 = scmp.ne.s32.totalorder %s5920_s25, %s5916_s24 }
  0x10   : > { %s9325_s15 = scalar_select %p6055_p3, 1, 0 }
  0x11   : > { %p214_p6 = scmp.eq.s32.totalorder %s5187_s10, 3  ;;  %p5188_p7 = scmp.ge.s32.totalorder %s5944_s8, 1 }
  0x12   : > { %s9717_s12 = smov (%p36_p4, %s9715_s12), 0  ;;  %p221_p9 = scmp.lt.s32.totalorder %s5944_s8, 5 }
  0x13   : > { %9326 = sst [smem:[#allocation11_spill]] %s9717_s12  ;;  %p6064_p8 = por %p214_p6, %p213_p5 }
  0x14   : > { %s192_s17 = ssub.s32 %s5940_s30, %s9717_s12  ;;  %p6071_p10 = pnand %p5188_p7, %p221_p9 }
  0x15   : > { %s9327_s16 = scalar_select %p6064_p8, 1, 0 }
  0x16   : > { %s194_s18 = sor.u32 %s193_s14, %s192_s17  ;;  %p6075_p12 = scmp.eq.s32.totalorder %s5186_s9, 0 }
  0x17   : > { %s9328_s19 = scalar_select %p6071_p10, 1, 0 }
  0x18   : > { %p195_p11 = scmp.eq.s32.totalorder %s194_s18, 0  ;;  %p5266_p13 = pneg %p6071_p10 }
  0x19   : > { %s9329_s20 = scalar_select %p6075_p12, 1, 0 }
  0x1a   : > { %s9330_s3 = sld [smem:[#allocation99_spill]]  ;;  %p6089_p0 = pnand %p6075_p12, %p5266_p13 }
  0x1b   : > { %s6085_s10 = scalar_select %p195_p11, %s5924_s26, %s197_s13  }
  0x1c   : > { %s251_s18 = sshll.u32 %s9142_s4, 4  ;;  %p5814_p2 = pneg %p6089_p0  ;;  %s252_s18 = int_to_ptr.vmem [resolvable:$true] %s251_s18 }
  0x20   : > { %s240_s23 = sshll.u32 %s9330_s3, 4  ;;  %s241_s23 = int_to_ptr.vmem [resolvable:$true] %s240_s23 }
  0x21   : > { %s5812_s12 = scalar_lea.vmem %s241_s23, 16  ;;  %p5820_p6 = scmp.lt.s32.totalorder %s241_s23, %s241_s23 }
  0x22   : > { %p5813_p1 = scmp.ne.s32.totalorder %s241_s23, %s5812_s12  ;;  %p5821_p7 = scmp.lt.s32.totalorder %s5812_s12, %s5812_s12 }
  0x24   : > { %p5815_p4 = pnand %p5814_p2, %p5813_p1  ;;  %p5822_p9 = por %p5821_p7, %p5820_p6 }
  0x26   : > { %p5816_p5 = pneg %p5815_p4 }
  0x28   : > { %p5823_p11 = pnand %p5822_p9, %p5816_p5 }
  0x2a   : > { %5826 = shalt.err (!%p5823_p11)
}
  0x2b   : > { %s5946_s13 = smov [#allocation2]   ;;  %s5827_s21 = scalar_lea.vmem %s252_s18, 16 }
  0x2c   : > { %5269 = dma.vmem_to_smem (!%p6089_p0), %s241_s23, 16, %s5946_s13, [#allocation4]  }
  0x2d   : > { %p5828_p13 = scmp.ne.s32.totalorder %s252_s18, %s5827_s21  ;;  %p5835_p12 = scmp.lt.s32.totalorder %s252_s18, %s252_s18 }
  0x2e   : > { %p5836_p10 = scmp.lt.s32.totalorder %s5827_s21, %s5827_s21 }
  0x2f   : > { %p5830_p8 = pnand %p5828_p13, %p5814_p2 }
  0x30   : > { %p5837_p1 = por %p5836_p10, %p5835_p12 }
  0x31   : > { %p5831_p3 = pneg %p5830_p8 }
  0x33   : > { %p5838_p4 = pnand %p5837_p1, %p5831_p3 }
  0x35   : > { %5841 = shalt.err (!%p5838_p4)
}
  0x36   : > { %s5947_s22 = smov [#allocation5]   ;;  %p9332_p5 = scmp.ne.s32.totalorder %s9328_s19, 0 }
  0x37   : > { %5272 = dma.vmem_to_smem (!%p6089_p0), %s252_s18, 16, %s5947_s22, [#allocation6]  }
  0x38   : > { %282 = sbr.rel (%p9332_p5) target bundleno = 1006 (0x3ee), region = 48 }
  0x3f   : > { %p9333_p6 = scmp.ne.s32.totalorder %s9329_s20, 0 }
  0x41   : > { %5903 = dma.done.wait (%p9333_p6), [#allocation4], 16  }
  0x42   : > { %5905 = vsyncadd (%p9333_p6), [#allocation4], 4294967280 }
  0x43   : > { %5907 = dma.done.wait (%p9333_p6), [#allocation6], 16  }
  0x44   : > { %5909 = vsyncadd (%p9333_p6), [#allocation6], 4294967280 }
  0x45   : > { %292 = sfence }
  0x46   : > { %s5213_s12 = sshll.u32 %s5928_s27, 3  ;;  %v496_v0 = vlaneseq  ;;  %p323_p3 = scmp.lt.s32.totalorder %s5932_s28, 1  ;;  %v5948_v4 = vmov 1983009808   ;;  %v5949_v13 = vmov 1934713408  }
  0x47   : > { %v499_v1 = vstv %s5213_s12  ;;  %p325_p8 = scmp.lt.s32.totalorder %s5928_s27, 1  ;;  %s6117_s19 = sld [smem:[#allocation2 + $0x1]]  ;;  %v555_v5 = vunpack.c.l.s4 %v5948_v4  ;;  %v603_v14 = vunpack.c.l.s4 %v5949_v13  ;;  %v9151_v17 = vmov 0.0  }
  0x48   : > { %v6114_v2 = vshrl.u32 %v496_v0, 7  ;;  %v503_v3 = vand.u32 127, %v496_v0  ;;  %s324_s20 = scalar_select %p323_p3, %s5932_s28, 1  ;;  %vm1982_vm12 = vcmask 1046528   ;;  %vm960_vm13 = vcmask 130048  }
  0x49   : > { %s326_s23 = scalar_select %p325_p8, %s5928_s27, 1  ;;  %v556_v9 = vunpack.c.0.s8 %v555_v5  ;;  %v604_v38 = vunpack.c.0.s8 %v603_v14  ;;  %vm964_vm14 = vcmask 261120   ;;  %vm968_vm15 = vcmask 392192  }
  0x4a   : > { %v498_v6 = vadd.s32 8, %v6114_v2  ;;  %v500_v7 = vadd.s32 %v499_v1, %v6114_v2  ;;  %vm510_vm0 = vcmp.ge.s32.totalorder %v503_v3, 1  ;;  %s5197_s14 = sshll.u32 %s324_s20, 4  ;;  %s6123_s17 = sld [smem:[#allocation5 + $0x1]]  ;;  %vm513_vm7 = vcmp.lt.s32.totalorder %v503_v3, 17 }
  0x4b   : > { %s5196_s9 = sshll.u32 %s326_s23, 3  ;;  %s6125_s18 = sld [smem:[#allocation2]]  ;;  %v6154_v19 = vsub.s32 %v556_v9, %v6114_v2  ;;  %v6191_v52 = vsub.s32 %v604_v38, %v6114_v2 }
  0x4c   : > { %v501_v8 = vadd.s32 %v499_v1, %v498_v6  ;;  %vm504_vm1 = vcmp.ge.s32.totalorder %v500_v7, 1  ;;  %vm506_vm2 = vcmp.lt.s32.totalorder %v500_v7, 17  ;;  %s329_s13 = sadd.s32 %s5197_s14, %s5196_s9  ;;  %s6127_s21 = sld [smem:[#allocation5]] }
  0x4d   : > { %vm508_vm3 = vmand %vm504_vm1, %vm506_vm2  ;;  %s5198_s22 = sshll.u32 %s329_s13, 3  ;;  %v351_v10 = vstv %s6117_s19  ;;  %s6131_s12 = sld [smem:[#allocation2 + $0x3]]  ;;  %vm976_vm1 = vcmask 654336   ;;  %vm980_vm2 = vcmask 785408  }
  0x4e   : > { %vm505_vm4 = vcmp.ge.s32.totalorder %v501_v8, 1  ;;  %vm507_vm5 = vcmp.lt.s32.totalorder %v501_v8, 17  ;;  %vm511_vm6 = vmand %vm508_vm3, %vm510_vm0  ;;  %s6136_s3 = scalar_lea.vmem %s9138_s0, %s5198_s22  ;;  %s6138_s14 = sld [smem:[#allocation5 + $0x3]]  ;;  %vm984_vm3 = vcmask 916480  }
  0x4f   : > { %vm509_vm8 = vmand %vm505_vm4, %vm507_vm5  ;;  %v334_v11 = vld [vmem:[%s6136_s3 + $0x10] sm:$0xff]  ;;  %v332_v12 = vld [vmem:[%s6136_s3] sm:$0xff]  ;;  %s6143_s9 = sld [smem:[#allocation2 + $0x2]]  ;;  %s5954_s13 = smov 48   ;;  %vm3440_vm4 = vcmask 1045504   ;;  %vm4901_vm5 = vcmask 1043456  }
  0x50   : > { %vm512_vm9 = vmand %vm509_vm8, %vm510_vm0  ;;  %s6145_s19 = sld [smem:[#allocation5 + $0x2]]  ;;  %v352_v15 = vmul.f32 %v351_v10, %v334_v11  ;;  %v355_v16 = vstv %s6123_s17  ;;  %v338_v21 = vld [vmem:[%s6136_s3 + $0x30] sm:$0xff]  ;;  %v336_v33 = vld [vmem:[%s6136_s3 + $0x20] sm:$0xff]  ;;  %s5951_s17 = smov 127   ;;  %vm972_vm0 = vcmask 523264  }
  0x51   : > { %vm514_vm10 = vmand %vm511_vm6, %vm513_vm7  ;;  %v341_v20 = vstv %s6125_s18  ;;  %v333_v41 = vld [vmem:[%s6136_s3 + $0x8] sm:$0x3]  ;;  %v335_v42 = vld [vmem:[%s6136_s3 + $0x18] sm:$0x3]  ;;  %s5953_s18 = smov 32   ;;  %s5956_s22 = smov 80  }
  0x52   : > { %vm515_vm11 = vmand %vm512_vm9, %vm513_vm7  ;;  %v6151_v18 = vsel %vm514_vm10, 1.0, %v9151_v17  ;;  %v356_v24 = vadd.f32 %v355_v16, %v352_v15  ;;  %v342_v25 = vmul.f32 %v341_v20, %v332_v12  ;;  %v345_v27 = vstv %s6127_s21  ;;  %v337_v43 = vld [vmem:[%s6136_s3 + $0x28] sm:$0x3]  ;;  %v339_v46 = vld [vmem:[%s6136_s3 + $0x38] sm:$0x3]  ;;  %s5952_s3 = smov 16  }
  0x53   : > { %v6159_v22 = vsel %vm515_vm11, 1.0, %v9151_v17  ;;  %v1983_v23 = vrot.slane %v6151_v18, 1  ;;  %v371_v28 = vstv %s6131_s12  ;;  %v552_v29 = vcombine.low %v6151_v18, %v6151_v18  ;;  %s5955_s21 = smov 64   ;;  %s5957_s12 = smov 96  }
  0x54   : > { %v1984_v26 = vrot.slane %v6159_v22, 1  ;;  %5794 = vtanh.f32 %v356_v24  ;;  %v346_v30 = vadd.f32 %v345_v27, %v342_v25  ;;  %v372_v31 = vmul.f32 %v371_v28, %v338_v21  ;;  %s5958_s20 = smov 112   ;;  %s5959_s23 = smov 126  }
  0x55   : > { %v375_v32 = vstv %s6138_s14  ;;  %v361_v35 = vstv %s6143_s9  ;;  %v560_v44 = vrot.slane %v552_v29, %v6154_v19  ;;  %v553_v45 = vcombine.high %v6151_v18, %v6151_v18  ;;  %s5219_s14 = sshll.u32 %s5932_s28, 1  ;;  %p9702_p12 = scmp.ne.s32.totalorder %s9325_s15, 0 }
  0x56   : > { %v6170_v34 = vsel %vm1982_vm12, %v1983_v23, %v1984_v26  ;;  %5796 = vtanh.f32 %v346_v30  ;;  %v365_v37 = vstv %s6145_s19  ;;  %v376_v39 = vadd.f32 %v375_v32, %v372_v31  ;;  %s5079_s9 = sadd.s32 %s5928_s27, %s5219_s14 }
  0x57   : > { %v6175_v36 = vpack.i.bf16 %v6170_v34, %v6151_v18  ;;  %v362_v40 = vmul.f32 %v361_v35, %v336_v33  ;;  %v6188_v48 = vrot.slane %v553_v45, %v6154_v19  ;;  %v343_v49 = vmul.f32 %v341_v20, %v333_v41  ;;  %s5220_s19 = sshll.u32 %s5079_s9, 7 }
  0x58   : > { %5798 = vtanh.f32 %v376_v39  ;;  %v353_v50 = vmul.f32 %v351_v10, %v335_v42  ;;  %v363_v51 = vmul.f32 %v361_v35, %v337_v43  ;;  %v373_v53 = vmul.f32 %v371_v28, %v339_v46 }
  0x59   : > { %5363 = vrot.lane.b32.xlu0 %v6175_v36, %s5951_s17  ;;  %v366_v47 = vadd.f32 %v365_v37, %v362_v40  ;;  %v600_v54 = vcombine.low %v560_v44, %v560_v44  ;;  %v601_v55 = vcombine.high %v560_v44, %v560_v44  ;;  %v347_v56 = vadd.f32 %v345_v27, %v343_v49 }
  0x5a   : > { %v6193_v57 = vadd.f32 %v355_v16, %v353_v50  ;;  %v616_v58 = vcombine.low %v6188_v48, %v6188_v48  ;;  %v6197_v59 = vadd.f32 %v365_v37, %v363_v51  ;;  %v6199_v60 = vadd.f32 %v375_v32, %v373_v53 }
  0x5b   : > { %5800 = vtanh.f32 %v366_v47  ;;  %v6205_v1 = vrot.slane %v600_v54, %v6191_v52  ;;  %v6208_v2 = vrot.slane %v601_v55, %v6191_v52  ;;  %v617_v3 = vcombine.high %v6188_v48, %v6188_v48 }
  0x5c   : > { %v6218_v7 = vrot.slane %v616_v58, %v6191_v52  ;;  %5802 = vtanh.f32 %v347_v56  ;;  %vm4955_vm6 = vcmask 424960  }
  0x5d   : > { %5804 = vtanh.f32 %v6193_v57 }
  0x5e   : > { %v5795_v61 = vpop.eup %5794  ;;  %5806 = vtanh.f32 %v6197_v59 }
  0x5f   : > { %v6202_v62 = vmul.f32 %v5795_v61, %v6151_v18  ;;  %v382_v63 = vmul.f32 3.0, %v5795_v61  ;;  %v415_v8 = vmul.f32 5.0, %v5795_v61  ;;  %v431_v9 = vmul.f32 2.0, %v5795_v61 }
  0x60   : > { %v5797_v0 = vpop.eup %5796  ;;  %v456_v10 = vmul.f32 7.0, %v5795_v61  ;;  %5808 = vtanh.f32 %v6199_v60 }
  0x61   : > { %9334 = vst [vmem:[#allocation12_spill] sm:$0xff] %v6202_v62  ;;  %1009 = vrot.lane.b32.xlu0 %v6202_v62, %s5951_s17  ;;  %v6215_v4 = vmul.f32 %v5797_v0, %v6151_v18  ;;  %v390_v5 = vmul.f32 %v5795_v61, %v382_v63  ;;  %v380_v6 = vmul.f32 3.0, %v5797_v0  ;;  %v413_v14 = vmul.f32 5.0, %v5797_v0 }
  0x62   : > { %v5799_v11 = vpop.eup %5798  ;;  %v429_v15 = vmul.f32 2.0, %v5797_v0  ;;  %v454_v21 = vmul.f32 7.0, %v5797_v0 }
  0x63   : > { %9335 = vst [vmem:[#allocation13_spill] sm:$0xff] %v6215_v4  ;;  %1007 = vrot.lane.b32.xlu1 %v6215_v4, %s5951_s17  ;;  %v5207_v12 = vadd.f32 -1.0, %v390_v5  ;;  %v388_v13 = vmul.f32 %v5797_v0, %v380_v6  ;;  %v6223_v16 = vmul.f32 %v5799_v11, %v6151_v18  ;;  %v386_v20 = vmul.f32 3.0, %v5799_v11 }
  0x64   : > { %v419_v23 = vmul.f32 5.0, %v5799_v11  ;;  %v435_v27 = vmul.f32 2.0, %v5799_v11  ;;  %v460_v28 = vmul.f32 7.0, %v5799_v11 }
  0x65   : > { %9336 = vst [vmem:[#allocation14_spill] sm:$0xff] %v6223_v16  ;;  %v5801_v24 = vpop.eup %5800  ;;  %v407_v25 = vmul.f32 0.5, %v5207_v12  ;;  %v5205_v26 = vadd.f32 -1.0, %v388_v13  ;;  %1013 = vrot.lane.b32.xlu0 %v6223_v16, %s5951_s17  ;;  %v394_v30 = vmul.f32 %v5799_v11, %v386_v20  ;;  %v584_v51 = vcombine.low %v6202_v62, %v6223_v16 }
  0x66   : > { %v6228_v29 = vmul.f32 %v5801_v24, %v6151_v18  ;;  %v384_v31 = vmul.f32 3.0, %v5801_v24  ;;  %v417_v32 = vmul.f32 5.0, %v5801_v24  ;;  %v433_v41 = vmul.f32 2.0, %v5801_v24  ;;  %v6248_v58 = vpop.eup %5802 }
  0x67   : > { %v6231_v33 = vmul.f32 %v6151_v18, %v407_v25  ;;  %v405_v35 = vmul.f32 0.5, %v5205_v26  ;;  %v423_v37 = vmul.f32 %v415_v8, %v407_v25  ;;  %v472_v38 = vmul.f32 3.0, %v407_v25 }
  0x68   : > { %9337 = vst [vmem:[#allocation15_spill] sm:$0xff] %v6228_v29  ;;  %1011 = vrot.lane.b32.xlu1 %v6228_v29, %s5951_s17  ;;  %v5211_v39 = vadd.f32 -1.0, %v394_v30  ;;  %v392_v40 = vmul.f32 %v5801_v24, %v384_v31  ;;  %v458_v42 = vmul.f32 7.0, %v5801_v24  ;;  %v568_v50 = vcombine.low %v6215_v4, %v6228_v29 }
  0x69   : > { %9338 = vst [vmem:[#allocation16_spill] sm:$0xff] %v6231_v33  ;;  %v6236_v43 = vmul.f32 %v6151_v18, %v405_v35  ;;  %v439_v44 = vsub.f32 %v423_v37, %v431_v9  ;;  %v421_v45 = vmul.f32 %v413_v14, %v405_v35  ;;  %v470_v46 = vmul.f32 3.0, %v405_v35  ;;  %1017 = vrot.lane.b32.xlu0 %v6231_v33, %s5951_s17 }
  0x6a   : > { %v411_v47 = vmul.f32 0.5, %v5211_v39  ;;  %v5209_v49 = vadd.f32 -1.0, %v392_v40  ;;  %v569_v55 = vcombine.high %v6215_v4, %v6228_v29  ;;  %v585_v56 = vcombine.high %v6202_v62, %v6223_v16 }
  0x6b   : > { %9339 = vst [vmem:[#allocation17_spill] sm:$0xff] %v6236_v43  ;;  %v448_v53 = vmul.f32 0.33333334, %v439_v44  ;;  %v437_v54 = vsub.f32 %v421_v45, %v429_v15  ;;  %v576_v11 = vrot.slane %v568_v50, %v6154_v19  ;;  %v592_v15 = vrot.slane %v584_v51, %v6154_v19 }
  0x6c   : > { %1015 = vrot.lane.b32.xlu1 %v6236_v43, %s5951_s17  ;;  %v6253_v61 = vmul.f32 %v6151_v18, %v411_v47  ;;  %v409_v63 = vmul.f32 0.5, %v5209_v49  ;;  %v427_v0 = vmul.f32 %v419_v23, %v411_v47  ;;  %v476_v5 = vmul.f32 3.0, %v411_v47 }
  0x6d   : > { %v6256_v6 = vmul.f32 %v6151_v18, %v448_v53  ;;  %v464_v8 = vmul.f32 %v456_v10, %v448_v53  ;;  %v446_v9 = vmul.f32 0.33333334, %v437_v54  ;;  %v632_v30 = vcombine.low %v576_v11, %v592_v15 }
  0x6e   : > { %9340 = vst [vmem:[#allocation18_spill] sm:$0xff] %v6253_v61  ;;  %1021 = vrot.lane.b32.xlu0 %v6253_v61, %s5951_s17  ;;  %v6262_v12 = vmul.f32 %v6151_v18, %v409_v63  ;;  %v443_v13 = vsub.f32 %v427_v0, %v435_v27  ;;  %v425_v14 = vmul.f32 %v417_v32, %v409_v63 }
  0x6f   : > { %9341 = vst [vmem:[#allocation19_spill] sm:$0xff] %v6256_v6  ;;  %v480_v20 = vsub.f32 %v464_v8, %v472_v38  ;;  %v6266_v23 = vmul.f32 %v6151_v18, %v446_v9  ;;  %v462_v24 = vmul.f32 %v454_v21, %v446_v9  ;;  %v688_v10 = vcombine.low %v6231_v33, %v6253_v61 }
  0x70   : > { %9342 = vst [vmem:[#allocation20_spill] sm:$0xff] %v6262_v12  ;;  %1019 = vrot.lane.b32.xlu1 %v6262_v12, %s5951_s17  ;;  %v452_v25 = vmul.f32 0.33333334, %v443_v13  ;;  %v441_v26 = vsub.f32 %v425_v14, %v433_v41  ;;  %v672_v27 = vcombine.low %v6236_v43, %v6262_v12  ;;  %v633_v37 = vcombine.high %v576_v11, %v592_v15 }
  0x71   : > { %9343 = vst [vmem:[#allocation21_spill] sm:$0xff] %v6266_v23  ;;  %v489_v31 = vmul.f32 0.25, %v480_v20  ;;  %v478_v32 = vsub.f32 %v462_v24, %v470_v46  ;;  %v696_v35 = vrot.slane %v688_v10, %v6154_v19  ;;  %v6281_v40 = vrot.slane %v632_v30, %v6191_v52 }
  0x72   : > { %1025 = vrot.lane.b32.xlu0 %v6256_v6, %s5951_s17  ;;  %v468_v21 = vmul.f32 %v460_v28, %v452_v25  ;;  %v6278_v38 = vmul.f32 %v6151_v18, %v452_v25  ;;  %v450_v39 = vmul.f32 0.33333334, %v441_v26  ;;  %v680_v45 = vrot.slane %v672_v27, %v6154_v19 }
  0x73   : > { %v6284_v41 = vmul.f32 %v6151_v18, %v489_v31  ;;  %v487_v44 = vmul.f32 0.25, %v478_v32  ;;  %v647_v46 = vrot.slane %v633_v37, %v6191_v52  ;;  %v665_v53 = vcombine.high %v6205_v1, %v6281_v40 }
  0x74   : > { %9344 = vst [vmem:[#allocation22_spill] sm:$0xff] %v6278_v38  ;;  %1023 = vrot.lane.b32.xlu1 %v6266_v23, %s5951_s17  ;;  %v484_v47 = vsub.f32 %v468_v21, %v476_v5  ;;  %v466_v28 = vmul.f32 %v458_v42, %v450_v39  ;;  %v6291_v49 = vmul.f32 %v6151_v18, %v450_v39  ;;  %v474_v15 = vmul.f32 3.0, %v409_v63 }
  0x75   : > { %9345 = vst [vmem:[#allocation23_spill] sm:$0xff] %v6284_v41  ;;  %v6296_v51 = vmul.f32 %v6151_v18, %v487_v44  ;;  %v720_v54 = vcombine.low %v6256_v6, %v6278_v38  ;;  %v736_v0 = vcombine.low %v680_v45, %v696_v35  ;;  %v666_v5 = vcombine.low %v6208_v2, %v647_v46 }
  0x76   : > { %9346 = vst [vmem:[#allocation24_spill] sm:$0xff] %v6291_v49  ;;  %v493_v8 = vmul.f32 0.25, %v484_v47  ;;  %1029 = vrot.lane.b32.xlu0 %v6278_v38, %s5951_s17  ;;  %v704_v42 = vcombine.low %v6266_v23, %v6291_v49  ;;  %v737_v9 = vcombine.high %v680_v45, %v696_v35  ;;  %v667_v14 = vcombine.high %v6208_v2, %v647_v46 }
  0x77   : > { %v728_v11 = vrot.slane %v720_v54, %v6154_v19  ;;  %v6309_v13 = vrot.slane %v736_v0, %v6191_v52  ;;  %v583_v25 = vrot.slane %v569_v55, %v6154_v19  ;;  %v482_v26 = vsub.f32 %v466_v28, %v474_v15 }
  0x78   : > { %v6313_v20 = vmul.f32 %v6151_v18, %v493_v8  ;;  %1027 = vrot.lane.b32.xlu1 %v6291_v49, %s5951_s17  ;;  %v712_v24 = vrot.slane %v704_v42, %v6154_v19  ;;  %v751_v10 = vrot.slane %v737_v9, %v6191_v52  ;;  %v599_v30 = vrot.slane %v585_v56, %v6154_v19 }
  0x79   : > { %v673_v27 = vcombine.high %v6236_v43, %v6262_v12  ;;  %v689_v2 = vcombine.high %v6231_v33, %v6253_v61  ;;  %v705_v32 = vcombine.high %v6266_v23, %v6291_v49  ;;  %v721_v35 = vcombine.high %v6256_v6, %v6278_v38 }
  0x7a   : > { %9347 = vst [vmem:[#allocation25_spill] sm:$0xff] %v6313_v20  ;;  %v768_v63 = vcombine.low %v712_v24, %v728_v11  ;;  %v769_v31 = vcombine.high %v712_v24, %v728_v11  ;;  %v491_v37 = vmul.f32 0.25, %v482_v26  ;;  %v648_v21 = vcombine.low %v583_v25, %v599_v30 }
  0x7b   : > { %v687_v55 = vrot.slane %v673_v27, %v6154_v19  ;;  %v703_v56 = vrot.slane %v689_v2, %v6154_v19  ;;  %v719_v45 = vrot.slane %v705_v32, %v6154_v19  ;;  %v735_v46 = vrot.slane %v721_v35, %v6154_v19 }
  0x7c   : > { %1031 = vrot.lane.b32.xlu1 %v6296_v51, %s5951_s17  ;;  %v6334_v39 = vrot.slane %v768_v63, %v6191_v52  ;;  %v783_v44 = vrot.slane %v769_v31, %v6191_v52  ;;  %v6340_v47 = vmul.f32 %v6151_v18, %v491_v37  ;;  %v656_v28 = vrot.slane %v648_v21, %v6191_v52 }
  0x7d   : > { %v752_v54 = vcombine.low %v687_v55, %v703_v56  ;;  %v824_v0 = vcombine.low %v6284_v41, %v6313_v20  ;;  %v784_v24 = vcombine.low %v719_v45, %v735_v46  ;;  %v825_v57 = vcombine.high %v6284_v41, %v6313_v20 }
  0x7e   : > { %v801_v8 = vcombine.high %v6309_v13, %v6334_v39  ;;  %v802_v9 = vcombine.low %v751_v10, %v783_v44  ;;  %v803_v11 = vcombine.high %v751_v10, %v783_v44  ;;  %v808_v26 = vcombine.low %v6296_v51, %v6340_v47 }
  0x7f   : > { %v760_v15 = vrot.slane %v752_v54, %v6191_v52  ;;  %v668_v63 = vcombine.low %v6218_v7, %v656_v28  ;;  %v6355_v31 = vrot.slane %v824_v0, %v6154_v19  ;;  %v792_v35 = vrot.slane %v784_v24, %v6191_v52 }
  0x80   : > { %v5367_v27 = vpack.i.bf16 %v801_v8, %v665_v53  ;;  %v5372_v2 = vpack.i.bf16 %v802_v9, %v666_v5  ;;  %v5377_v32 = vpack.i.bf16 %v803_v11, %v667_v14  ;;  %v6359_v10 = vrot.slane %v808_v26, %v6154_v19 }
  0x81   : > { %v809_v37 = vcombine.high %v6296_v51, %v6340_v47  ;;  %v649_v53 = vcombine.high %v583_v25, %v599_v30  ;;  %v753_v5 = vcombine.high %v687_v55, %v703_v56  ;;  %v804_v14 = vcombine.low %v760_v15, %v792_v35  ;;  %v6385_v56 = vpop.eup %5804 }
  0x82   : > { %5368 = vrot.lane.b32.xlu0 %v5367_v27, %s5952_s3  ;;  %5373 = vrot.lane.b32.xlu1 %v5372_v2, %s5953_s18  ;;  %v841_v21 = vcombine.high %v6359_v10, %v6355_v31  ;;  %v631_v54 = vrot.slane %v617_v3, %v6191_v52  ;;  %v669_v0 = vcombine.high %v6218_v7, %v656_v28  ;;  %v381_v24 = vmul.f32 3.0, %v6248_v58 }
  0x83   : > { %v823_v44 = vrot.slane %v809_v37, %v6154_v19  ;;  %v839_v8 = vrot.slane %v825_v57, %v6154_v19  ;;  %v785_v9 = vcombine.high %v719_v45, %v735_v46  ;;  %v5382_v25 = vpack.i.bf16 %v804_v14, %v668_v63 }
  0x84   : > { %v805_v59 = vcombine.high %v760_v15, %v792_v35  ;;  %v663_v30 = vrot.slane %v649_v53, %v6191_v52  ;;  %v767_v55 = vrot.slane %v753_v5, %v6191_v52  ;;  %v855_v48 = vrot.slane %v841_v21, %v6191_v52  ;;  %v6390_v15 = vpop.eup %5806 }
  0x85   : > { %v856_v3 = vcombine.low %v823_v44, %v839_v8  ;;  %v799_v7 = vrot.slane %v785_v9, %v6191_v52  ;;  %v857_v11 = vcombine.high %v823_v44, %v839_v8  ;;  %v383_v26 = vmul.f32 3.0, %v6385_v56  ;;  %v6394_v63 = vpop.eup %5808 }
  0x86   : > { %5378 = vrot.lane.b32.xlu0 %v5377_v32, %s5954_s13  ;;  %1035 = vrot.lane.b32.xlu1 %v6340_v47, %s5951_s17  ;;  %v5387_v60 = vpack.i.bf16 %v805_v59, %v669_v0  ;;  %v670_v45 = vcombine.low %v631_v54, %v663_v30  ;;  %v671_v27 = vcombine.high %v631_v54, %v663_v30  ;;  %v385_v53 = vmul.f32 3.0, %v6390_v15 }
  0x87   : > { %v864_v46 = vrot.slane %v856_v3, %v6191_v52  ;;  %v806_v28 = vcombine.low %v767_v55, %v799_v7  ;;  %v807_v2 = vcombine.high %v767_v55, %v799_v7  ;;  %v871_v35 = vrot.slane %v857_v11, %v6191_v52 }
  0x88   : > { %v389_v37 = vmul.f32 %v6248_v58, %v381_v24  ;;  %v391_v57 = vmul.f32 %v6385_v56, %v383_v26  ;;  %v840_v5 = vcombine.low %v6359_v10, %v6355_v31  ;;  %v387_v21 = vmul.f32 3.0, %v6394_v63 }
  0x89   : > { %v5392_v32 = vpack.i.bf16 %v806_v28, %v670_v45  ;;  %v5397_v44 = vpack.i.bf16 %v807_v2, %v671_v27  ;;  %v873_v54 = vcombine.high %v855_v48, %v9151_v17  ;;  %v414_v8 = vmul.f32 5.0, %v6248_v58 }
  0x8a   : > { %5383 = vrot.lane.b32.xlu0 %v5382_v25, %s5955_s21  ;;  %895 = vrot.lane.b32.xlu1 %v855_v48, %s5953_s18  ;;  %v5206_v14 = vadd.f32 -1.0, %v389_v37  ;;  %v5208_v0 = vadd.f32 -1.0, %v391_v57  ;;  %v393_v9 = vmul.f32 %v6390_v15, %v385_v53  ;;  %v430_v31 = vmul.f32 2.0, %v6248_v58 }
  0x8b   : > { %v874_v10 = vcombine.high %v864_v46, %v9151_v17  ;;  %v6415_v59 = vrot.slane %v840_v5, %v6191_v52  ;;  %v395_v30 = vmul.f32 %v6394_v63, %v387_v21  ;;  %v416_v3 = vmul.f32 5.0, %v6385_v56 }
  0x8c   : > { %v6410_v25 = vmul.f32 0.5, %v5206_v14  ;;  %v6420_v55 = vmul.f32 0.5, %v5208_v0  ;;  %v432_v7 = vmul.f32 2.0, %v6385_v56  ;;  %v455_v11 = vmul.f32 7.0, %v6248_v58 }
  0x8d   : > { %9348 = vst [vmem:[#allocation26_spill] sm:$0xff] %v6415_v59  ;;  %v872_v28 = vcombine.high %v6415_v59, %v9151_v17  ;;  %v875_v24 = vcombine.high %v871_v35, %v9151_v17  ;;  %v5212_v26 = vadd.f32 -1.0, %v395_v30  ;;  %v418_v2 = vmul.f32 5.0, %v6390_v15 }
  0x8e   : > { %5388 = vrot.lane.b32.xlu0 %v5387_v60, %s5956_s22  ;;  %919 = vrot.lane.b32.xlu1 %v864_v46, %s5955_s21  ;;  %v422_v48 = vmul.f32 %v414_v8, %v6410_v25  ;;  %v5210_v60 = vadd.f32 -1.0, %v393_v9  ;;  %v424_v46 = vmul.f32 %v416_v3, %v6420_v55  ;;  %v457_v57 = vmul.f32 7.0, %v6385_v56 }
  0x8f   : > { %v434_v53 = vmul.f32 2.0, %v6390_v15  ;;  %v459_v8 = vmul.f32 7.0, %v6390_v15  ;;  %v461_v3 = vmul.f32 7.0, %v6394_v63  ;;  %v6604_v50 = vmul.f32 3.0, %v6410_v25 }
  0x90   : > { %v438_v45 = vsub.f32 %v422_v48, %v430_v31  ;;  %v440_v27 = vsub.f32 %v424_v46, %v432_v7  ;;  %v6491_v46 = vmul.f32 %v6385_v56, %v6159_v22 }
  0x92   : > { %5393 = vrot.lane.b32.xlu0 %v5392_v32, %s5957_s12  ;;  %943 = vrot.lane.b32.xlu1 %v871_v35, %s5957_s12  ;;  %v6434_v32 = vmul.f32 0.5, %v5210_v60  ;;  %v6436_v37 = vmul.f32 0.33333334, %v438_v45  ;;  %v6443_v14 = vmul.f32 0.33333334, %v440_v27  ;;  %v6448_v35 = vmul.f32 0.5, %v5212_v26 }
  0x93   : > { %v9153_v60 = vmov 0.0|0.0   ;;  %v6483_v45 = vmul.f32 %v6248_v58, %v6159_v22  ;;  %9353 = vst [vmem:[#allocation31_spill] sm:$0xff] %v6491_v46  ;;  %v1986_v58 = vrot.slane %v6215_v4, 1  ;;  %v1989_v26 = vrot.slane %v6202_v62, 1 }
  0x94   : > { %v6441_v5 = vmul.f32 %v455_v11, %v6436_v37  ;;  %v426_v21 = vmul.f32 %v418_v2, %v6434_v32  ;;  %9349 = vst [vmem:[#allocation27_spill] sm:$0xff] %v6448_v35  ;;  %5223 = vmatprep.subr.bf16.mxu0 %v9153_v60  ;;  %v6499_v11 = vmul.f32 %v6394_v63, %v6159_v22  ;;  %v1992_v27 = vrot.slane %v6228_v29, 1 }
  0x95   : > { %9352 = vst [vmem:[#allocation30_spill] sm:$0xff] %v6483_v45  ;;  %v1990_v56 = vrot.slane %v6491_v46, 1  ;;  %v2007_v60 = vrot.slane %v6253_v61, 1  ;;  %v6601_v42 = vmul.f32 %v6159_v22, %v6436_v37 }
  0x96   : > { %5398 = vrot.lane.b32.xlu0 %v5397_v44, %s5958_s20  ;;  %907 = vrot.lane.b32.xlu1 %v873_v54, %s5954_s13  ;;  %v420_v44 = vmul.f32 5.0, %v6394_v63  ;;  %v6452_v54 = vmul.f32 %v457_v57, %v6443_v14  ;;  %v442_v0 = vsub.f32 %v426_v21, %v434_v53  ;;  %9355 = vst [vmem:[#allocation33_spill] sm:$0xff] %v6499_v11  ;;  %v1996_v2 = vrot.slane %v6499_v11, 1 }
  0x97   : > { %v6521_v53 = vsel %vm1982_vm12, %v1989_v26, %v1990_v56  ;;  %v6568_v56 = vmul.f32 %v6159_v22, %v6410_v25  ;;  %9362 = vst [vmem:[#allocation40_spill] sm:$0xff] %v6601_v42  ;;  %v2010_v25 = vrot.slane %v6266_v23, 1 }
  0x98   : > { %9350 = vst [vmem:[#allocation28_spill] sm:$0xff] %v6452_v54  ;;  %v428_v9 = vmul.f32 %v420_v44, %v6448_v35  ;;  %v6460_v31 = vmul.f32 0.33333334, %v442_v0  ;;  %v2051_v0 = vcombine.low %v6170_v34, %v6170_v34 }
  0x99   : > { %9358 = vst [vmem:[#allocation36_spill] sm:$0xff] %v6568_v56 }
  0x9a   : > { %1033 = vrot.lane.b32.xlu0 %v6284_v41, %s5951_s17  ;;  %931 = vrot.lane.b32.xlu1 %v874_v10, %s5956_s22  ;;  %v436_v10 = vmul.f32 2.0, %v6394_v63  ;;  %v6464_v30 = vmul.f32 %v459_v8, %v6460_v31  ;;  %v1995_v63 = vrot.slane %v6223_v16, 1 }
  0x9c   : > { %v444_v48 = vsub.f32 %v428_v9, %v436_v10  ;;  %v6527_v44 = vsel %vm1982_vm12, %v1995_v63, %v1996_v2  ;;  %v6540_v10 = vrot.slane %v2051_v0, %v6154_v19  ;;  %v1998_v2 = vrot.slane %v6236_v43, 1 }
  0x9d   : > { %v2083_v9 = vcombine.low %v6521_v53, %v6527_v44  ;;  %v6583_v0 = vmul.f32 %v6159_v22, %v6434_v32  ;;  %v2004_v63 = vrot.slane %v6262_v12, 1 }
  0x9e   : > { %883 = vrot.lane.b32.xlu0 %v872_v28, %s5952_s3  ;;  %955 = vrot.lane.b32.xlu1 %v875_v24, %s5958_s20  ;;  %v6471_v7 = vmul.f32 0.33333334, %v444_v48  ;;  %v6495_v28 = vmul.f32 %v6390_v15, %v6159_v22  ;;  %v1987_v24 = vrot.slane %v6483_v45, 1 }
  0x9f   : > { %9360 = vst [vmem:[#allocation38_spill] sm:$0xff] %v6583_v0  ;;  %v2005_v17 = vrot.slane %v6583_v0, 1  ;;  %v6615_v0 = vmul.f32 %v6159_v22, %v6443_v14  ;;  %v2013_v14 = vrot.slane %v6256_v6, 1 }
  0xa0   : > { %9354 = vst [vmem:[#allocation32_spill] sm:$0xff] %v6495_v28  ;;  %v1993_v15 = vrot.slane %v6495_v28, 1  ;;  %v6514_v57 = vsel %vm1982_vm12, %v1986_v58, %v1987_v24  ;;  %v2099_v58 = vcombine.low %v6540_v10, %v6540_v10 }
  0xa1   : > { %9365 = vst [vmem:[#allocation43_spill] sm:$0xff] %v6615_v0  ;;  %v2014_v28 = vrot.slane %v6615_v0, 1 }
  0xa2   : > { %1037 = vrot.lane.b32.xlu0 %v6313_v20, %s5951_s17  ;;  %5403 = vrot.lane.b32.xlu1 %v6175_v36, %s5959_s23  ;;  %v6475_v36 = vmul.f32 %v461_v3, %v6471_v7  ;;  %v6524_v21 = vsel %vm1982_vm12, %v1992_v27, %v1993_v15  ;;  %v6546_v3 = vrot.slane %v2083_v9, %v6154_v19  ;;  %v2001_v9 = vrot.slane %v6231_v33, 1 }
  0xa3   : > { %v2067_v8 = vcombine.low %v6514_v57, %v6524_v21  ;;  %v6557_v26 = vrot.slane %v2099_v58, %v6191_v52  ;;  %v6572_v15 = vmul.f32 %v6159_v22, %v6420_v55 }
  0xa4   : > { %9351 = vst [vmem:[#allocation29_spill] sm:$0xff] %v6475_v36 }
  0xa5   : > { %v6543_v48 = vrot.slane %v2067_v8, %v6154_v19  ;;  %9356 = vst [vmem:[#allocation34_spill] sm:$0xff] %v6557_v26  ;;  %9359 = vst [vmem:[#allocation37_spill] sm:$0xff] %v6572_v15  ;;  %v1999_v8 = vrot.slane %v6568_v56, 1  ;;  %v2002_v58 = vrot.slane %v6572_v15, 1 }
  0xa6   : > { %1487 = vrot.lane.b32.xlu0 %v6215_v4, %s5959_s23  ;;  %1489 = vrot.lane.b32.xlu1 %v6202_v62, %s5959_s23 }
  0xa7   : > { %v2131_v24 = vcombine.low %v6543_v48, %v6546_v3  ;;  %v6607_v56 = vsel %vm1982_vm12, %v1998_v2, %v1999_v8  ;;  %v6627_v2 = vsel %vm1982_vm12, %v2004_v63, %v2005_v17  ;;  %v2011_v8 = vrot.slane %v6601_v42, 1 }
  0xa8   : > { %9363 = vst [vmem:[#allocation41_spill] sm:$0xff] %v6607_v56  ;;  %9366 = vst [vmem:[#allocation44_spill] sm:$0xff] %v6627_v2  ;;  %v6644_v17 = vmul.f32 %v6159_v22, %v6471_v7  ;;  %v6660_v7 = vsel %vm1982_vm12, %v2013_v14, %v2014_v28  ;;  %v2019_v42 = vrot.slane %v6278_v38, 1 }
  0xa9   : > { %v6560_v27 = vrot.slane %v2131_v24, %v6191_v52  ;;  %v6590_v24 = vmul.f32 %v6159_v22, %v6448_v35  ;;  %9370 = vst [vmem:[#allocation48_spill] sm:$0xff] %v6660_v7 }
  0xaa   : > { %1491 = vrot.lane.b32.xlu0 %v6228_v29, %s5959_s23  ;;  %1493 = vrot.lane.b32.xlu1 %v6223_v16, %s5959_s23  ;;  %9369 = vst [vmem:[#allocation47_spill] sm:$0xff] %v6644_v17  ;;  %v2020_v29 = vrot.slane %v6644_v17, 1 }
  0xab   : > { %9357 = vst [vmem:[#allocation35_spill] sm:$0xff] %v6560_v27  ;;  %9361 = vst [vmem:[#allocation39_spill] sm:$0xff] %v6590_v24 }
  0xae   : > { %1495 = vrot.lane.b32.xlu0 %v6236_v43, %s5959_s23  ;;  %1497 = vrot.lane.b32.xlu1 %v6231_v33, %s5959_s23  ;;  %v2008_v43 = vrot.slane %v6590_v24, 1 }
  0xb2   : > { %1499 = vrot.lane.b32.xlu0 %v6262_v12, %s5959_s23  ;;  %1501 = vrot.lane.b32.xlu1 %v6253_v61, %s5959_s23  ;;  %v6610_v12 = vsel %vm1982_vm12, %v2001_v9, %v2002_v58  ;;  %v6632_v9 = vmul.f32 3.0, %v6434_v32  ;;  %v6635_v58 = vsel %vm1982_vm12, %v2007_v60, %v2008_v43  ;;  %v6656_v32 = vsel %vm1982_vm12, %v2010_v25, %v2011_v8 }
  0xb3   : > { %9364 = vst [vmem:[#allocation42_spill] sm:$0xff] %v6610_v12  ;;  %9367 = vst [vmem:[#allocation45_spill] sm:$0xff] %v6635_v58  ;;  %v6679_v25 = vsel %vm1982_vm12, %v2019_v42, %v2020_v29 }
  0xb4   : > { %9371 = vst [vmem:[#allocation49_spill] sm:$0xff] %v6679_v25 }
  0xb6   : > { %1503 = vrot.lane.b32.xlu0 %v6266_v23, %s5959_s23  ;;  %1505 = vrot.lane.b32.xlu1 %v6256_v6, %s5959_s23  ;;  %v6640_v23 = vmul.f32 %v6159_v22, %v6460_v31  ;;  %v2016_v31 = vrot.slane %v6291_v49, 1 }
  0xb8   : > { %9368 = vst [vmem:[#allocation46_spill] sm:$0xff] %v6640_v23  ;;  %v2017_v63 = vrot.slane %v6640_v23, 1 }
  0xba   : > { %1507 = vrot.lane.b32.xlu0 %v6291_v49, %s5959_s23  ;;  %1509 = vrot.lane.b32.xlu1 %v6278_v38, %s5959_s23  ;;  %v6676_v28 = vsel %vm1982_vm12, %v2016_v31, %v2017_v63 }
  0xbe   : > { %1513 = vrot.lane.b32.xlu1 %v6284_v41, %s5959_s23  ;;  %1511 = vrot.lane.b32.xlu0 %v6296_v51, %s5959_s23 }
  0xc2   : > { %1517 = vrot.lane.b32.xlu1 %v6313_v20, %s5959_s23  ;;  %1515 = vrot.lane.b32.xlu0 %v6340_v47, %s5959_s23 }
  0xc6   : > { %2482 = vrot.lane.b32.xlu1 %v6514_v57, %s5951_s17  ;;  %2484 = vrot.lane.b32.xlu0 %v6521_v53, %s5951_s17 }
  0xca   : > { %2486 = vrot.lane.b32.xlu1 %v6524_v21, %s5951_s17  ;;  %2488 = vrot.lane.b32.xlu0 %v6527_v44, %s5951_s17 }
  0xcb   : > { %v6619_v37 = vpop.permute.xlu0 %5363 }
  0xcc   : > { %v6653_v43 = vunpack.i.l.bf16 %v6619_v37 }
  0xce   : > { %2490 = vrot.lane.b32.xlu1 %v6607_v56, %s5951_s17  ;;  %2492 = vrot.lane.b32.xlu0 %v6610_v12, %s5951_s17  ;;  %v1056_v4 = vcombine.low %v6653_v43, %v6653_v43 }
  0xd0   : > { %v6683_v23 = vrot.slane %v1056_v4, %v6154_v19 }
  0xd2   : > { %2494 = vrot.lane.b32.xlu1 %v6627_v2, %s5951_s17  ;;  %2496 = vrot.lane.b32.xlu0 %v6635_v58, %s5951_s17  ;;  %v1104_v42 = vcombine.low %v6683_v23, %v6683_v23 }
  0xd3   : > { %v6662_v60 = vpop.permute.xlu0 %1009 }
  0xd5   : > { %v6667_v45 = vpop.permute.xlu1 %1007 }
  0xd6   : > { %2498 = vrot.lane.b32.xlu1 %v6656_v32, %s5951_s17  ;;  %2500 = vrot.lane.b32.xlu0 %v6660_v7, %s5951_s17 }
  0xd7   : > { %v1014_v8 = vpop.permute.xlu0 %1013 }
  0xd8   : > { %v1088_v14 = vcombine.low %v6662_v60, %v1014_v8 }
  0xda   : > { %2502 = vrot.lane.b32.xlu1 %v6676_v28, %s5951_s17  ;;  %2504 = vrot.lane.b32.xlu0 %v6679_v25, %s5951_s17  ;;  %v1012_v49 = vpop.permute.xlu1 %1011  ;;  %v1096_v59 = vrot.slane %v1088_v14, %v6154_v19 }
  0xdb   : > { %v1072_v63 = vcombine.low %v6667_v45, %v1012_v49  ;;  %v1018_v31 = vpop.permute.xlu0 %1017 }
  0xdd   : > { %v1080_v29 = vrot.slane %v1072_v63, %v6154_v19  ;;  %v6706_v63 = vrot.slane %v1104_v42, %v6191_v52 }
  0xde   : > { %2962 = vrot.lane.b32.xlu1 %v6514_v57, %s5959_s23  ;;  %2964 = vrot.lane.b32.xlu0 %v6521_v53, %s5959_s23  ;;  %v1016_v4 = vpop.permute.xlu1 %1015 }
  0xdf   : > { %v1136_v17 = vcombine.low %v1080_v29, %v1096_v59  ;;  %9373 = vst [vmem:[#allocation51_spill] sm:$0xff] %v6706_v63 }
  0xe0   : > { %v1022_v38 = vpop.permute.xlu0 %1021 }
  0xe1   : > { %v6699_v0 = vrot.slane %v1136_v17, %v6191_v52  ;;  %v1192_v25 = vcombine.low %v1018_v31, %v1022_v38  ;;  %v1193_v35 = vcombine.high %v1018_v31, %v1022_v38 }
  0xe2   : > { %2966 = vrot.lane.b32.xlu1 %v6524_v21, %s5959_s23  ;;  %2968 = vrot.lane.b32.xlu0 %v6527_v44, %s5959_s23  ;;  %v1020_v14 = vpop.permute.xlu1 %1019 }
  0xe3   : > { %9372 = vst [vmem:[#allocation50_spill] sm:$0xff] %v6699_v0  ;;  %v1176_v24 = vcombine.low %v1016_v4, %v1020_v14  ;;  %v1200_v41 = vrot.slane %v1192_v25, %v6154_v19  ;;  %v1073_v25 = vcombine.high %v6667_v45, %v1012_v49  ;;  %v1177_v54 = vcombine.high %v1016_v4, %v1020_v14 }
  0xe4   : > { %v1026_v6 = vpop.permute.xlu0 %1025 }
  0xe5   : > { %v1184_v7 = vrot.slane %v1176_v24, %v6154_v19  ;;  %v1137_v24 = vcombine.high %v1080_v29, %v1096_v59 }
  0xe6   : > { %v1024_v61 = vpop.permute.xlu1 %1023  ;;  %2970 = vrot.lane.b32.xlu1 %v6607_v56, %s5959_s23  ;;  %2972 = vrot.lane.b32.xlu0 %v6610_v12, %s5959_s23  ;;  %v1089_v56 = vcombine.high %v6662_v60, %v1014_v8 }
  0xe7   : > { %v1240_v58 = vcombine.low %v1184_v7, %v1200_v41  ;;  %v1151_v45 = vrot.slane %v1137_v24, %v6191_v52 }
  0xe8   : > { %v1030_v17 = vpop.permute.xlu0 %1029 }
  0xe9   : > { %v1224_v42 = vcombine.low %v1026_v6, %v1030_v17  ;;  %v1225_v16 = vcombine.high %v1026_v6, %v1030_v17  ;;  %v6729_v60 = vrot.slane %v1240_v58, %v6191_v52  ;;  %v1103_v6 = vrot.slane %v1089_v56, %v6154_v19 }
  0xea   : > { %v1028_v15 = vpop.permute.xlu1 %1027  ;;  %2974 = vrot.lane.b32.xlu1 %v6627_v2, %s5959_s23  ;;  %v1241_v2 = vcombine.high %v1184_v7, %v1200_v41 }
  0xeb   : > { %v1232_v20 = vrot.slane %v1224_v42, %v6154_v19  ;;  %v1208_v33 = vcombine.low %v1024_v61, %v1028_v15  ;;  %v1209_v12 = vcombine.high %v1024_v61, %v1028_v15  ;;  %v1057_v42 = vcombine.high %v6653_v43, %v6653_v43 }
  0xec   : > { %v1239_v49 = vrot.slane %v1225_v16, %v6154_v19 }
  0xed   : > { %v1216_v11 = vrot.slane %v1208_v33, %v6154_v19  ;;  %v1105_v33 = vcombine.high %v6683_v23, %v6683_v23  ;;  %v1223_v38 = vrot.slane %v1209_v12, %v6154_v19  ;;  %v1169_v12 = vcombine.high %v6706_v63, %v6699_v0 }
  0xee   : > { %v6721_v36 = vpop.permute.xlu1 %1031  ;;  %v1071_v15 = vrot.slane %v1057_v42, %v6154_v19 }
  0xef   : > { %v1272_v46 = vcombine.low %v1216_v11, %v1232_v20  ;;  %v1273_v62 = vcombine.high %v1216_v11, %v1232_v20  ;;  %v1087_v20 = vrot.slane %v1073_v25, %v6154_v19  ;;  %v1191_v11 = vrot.slane %v1177_v54, %v6154_v19 }
  0xf0   : > { %v1288_v58 = vcombine.low %v1223_v38, %v1239_v49  ;;  %v1119_v7 = vrot.slane %v1105_v33, %v6191_v52  ;;  %v1120_v14 = vcombine.low %v1071_v15, %v1071_v15 }
  0xf1   : > { %v6732_v61 = vrot.slane %v1272_v46, %v6191_v52  ;;  %v1287_v41 = vrot.slane %v1273_v62, %v6191_v52  ;;  %v1207_v46 = vrot.slane %v1193_v35, %v6154_v19  ;;  %v1255_v62 = vrot.slane %v1241_v2, %v6191_v52 }
  0xf2   : > { %v1152_v31 = vcombine.low %v1087_v20, %v1103_v6  ;;  %v1170_v54 = vcombine.low %v1119_v7, %v1151_v45  ;;  %v1296_v2 = vrot.slane %v1288_v58, %v6191_v52  ;;  %v1171_v33 = vcombine.high %v1119_v7, %v1151_v45 }
  0xf3   : > { %9374 = vst [vmem:[#allocation52_spill] sm:$0xff] %v6732_v61  ;;  %v1305_v59 = vcombine.high %v6729_v60, %v6732_v61  ;;  %v1306_v8 = vcombine.low %v1255_v62, %v1287_v41  ;;  %v1256_v29 = vcombine.low %v1191_v11, %v1207_v46  ;;  %v1307_v25 = vcombine.high %v1255_v62, %v1287_v41 }
  0xf4   : > { %v5369_v56 = vpop.permute.xlu0 %5368  ;;  %v5374_v16 = vpop.permute.xlu1 %5373  ;;  %v1153_v63 = vcombine.high %v1087_v20, %v1103_v6  ;;  %v1257_v58 = vcombine.high %v1191_v11, %v1207_v46 }
  0xf5   : > { %v5407_v43 = vpack.i.bf16 %v1305_v59, %v1169_v12  ;;  %v5412_v17 = vpack.i.bf16 %v1306_v8, %v1170_v54  ;;  %v1160_v59 = vrot.slane %v1152_v31, %v6191_v52  ;;  %v1264_v12 = vrot.slane %v1256_v29, %v6191_v52 }
  0xf6   : > { %v5371_v23 = vunpack.i.h.bf16 %v5369_v56  ;;  %v5370_v0 = vunpack.i.l.bf16 %v5369_v56  ;;  %v1289_v8 = vcombine.high %v1223_v38, %v1239_v49  ;;  %v5417_v41 = vpack.i.bf16 %v1307_v25, %v1171_v33 }
  0xf7   : > { %5408 = vrot.lane.b32.xlu1 %v5407_v43, %s5952_s3  ;;  %v1128_v43 = vrot.slane %v1120_v14, %v6191_v52  ;;  %v1308_v62 = vcombine.low %v1264_v12, %v1296_v2  ;;  %v5376_v54 = vunpack.i.h.bf16 %v5374_v16  ;;  %v5375_v61 = vunpack.i.l.bf16 %v5374_v16 }
  0xf8   : > { %v5379_v4 = vpop.permute.xlu0 %5378  ;;  %v6751_v35 = vpop.permute.xlu1 %1035  ;;  %v1121_v31 = vcombine.high %v1071_v15, %v1071_v15  ;;  %v9375_v56 = vcombine.low %v6205_v1, %v6281_v40  ;;  %v9376_v49 = vcombine.low %v6309_v13, %v6334_v39  ;;  %v1309_v46 = vcombine.high %v1264_v12, %v1296_v2 }
  0xf9   : > { %v1172_v7 = vcombine.low %v1128_v43, %v1160_v59  ;;  %v1167_v11 = vrot.slane %v1153_v63, %v6191_v52  ;;  %v1303_v16 = vrot.slane %v1289_v8, %v6191_v52  ;;  %v5381_v29 = vunpack.i.h.bf16 %v5379_v4 }
  0xfa   : > { %v961_v6 = vsel %vm960_vm13, %v9375_v56, %v5370_v0  ;;  %v962_v38 = vsel %vm960_vm13, %v9376_v49, %v5371_v23  ;;  %v5380_v14 = vunpack.i.l.bf16 %v5379_v4  ;;  %v1173_v15 = vcombine.high %v1128_v43, %v1160_v59 }
  0xfb   : > { %5413 = vrot.lane.b32.xlu1 %v5412_v17, %s5953_s18  ;;  %v5422_v20 = vpack.i.bf16 %v1308_v62, %v1172_v7  ;;  %v1271_v25 = vrot.slane %v1257_v58, %v6191_v52  ;;  %v966_v1 = vsel %vm964_vm14, %v962_v38, %v5376_v54  ;;  %v965_v40 = vsel %vm964_vm14, %v961_v6, %v5375_v61 }
  0xfc   : > { %v5384_v24 = vpop.permute.xlu0 %5383  ;;  %v6755_v42 = vpop.permute.xlu1 %895  ;;  %v1135_v33 = vrot.slane %v1121_v31, %v6191_v52  ;;  %v5427_v12 = vpack.i.bf16 %v1309_v46, %v1173_v15  ;;  %v969_v8 = vsel %vm968_vm15, %v965_v40, %v5380_v14  ;;  %v970_v61 = vsel %vm968_vm15, %v966_v1, %v5381_v29 }
  0xfd   : > { %v5386_v0 = vunpack.i.h.bf16 %v5384_v24  ;;  %v5385_v13 = vunpack.i.l.bf16 %v5384_v24  ;;  %v1310_v43 = vcombine.low %v1271_v25, %v1303_v16 }
  0xfe   : > { %v1174_v54 = vcombine.low %v1135_v33, %v1167_v11  ;;  %v1175_v40 = vcombine.high %v1135_v33, %v1167_v11  ;;  %v2068_v11 = vcombine.high %v6514_v57, %v6524_v21  ;;  %v2084_v33 = vcombine.high %v6521_v53, %v6527_v44 }
  0xff   : > { %5418 = vrot.lane.b32.xlu1 %v5417_v41, %s5954_s13  ;;  %v973_v24 = vsel %vm972_vm0, %v969_v8, %v5385_v13  ;;  %v974_v41 = vsel %vm972_vm0, %v970_v61, %v5386_v0  ;;  %v9377_v13 = vmov 0.0|0.0  }
 0x100   : > { %v5389_v17 = vpop.permute.xlu0 %5388  ;;  %v6761_v45 = vpop.permute.xlu1 %919  ;;  %v5432_v38 = vpack.i.bf16 %v1310_v43, %v1174_v54  ;;  %v2082_v61 = vrot.slane %v2068_v11, %v6154_v19 }
 0x101   : > { %v5391_v2 = vunpack.i.h.bf16 %v5389_v17  ;;  %v5390_v63 = vunpack.i.l.bf16 %v5389_v17 }
 0x103   : > { %5423 = vrot.lane.b32.xlu1 %v5422_v20, %s5955_s21  ;;  %v977_v31 = vsel %vm976_vm1, %v973_v24, %v5390_v63  ;;  %v978_v56 = vsel %vm976_vm1, %v974_v41, %v5391_v2  ;;  %v1311_v20 = vcombine.high %v1271_v25, %v1303_v16  ;;  %v2052_v63 = vcombine.high %v6170_v34, %v6170_v34 }
 0x104   : > { %v5394_v39 = vpop.permute.xlu0 %5393  ;;  %v6777_v23 = vpop.permute.xlu1 %943  ;;  %v2098_v24 = vrot.slane %v2084_v33, %v6154_v19 }
 0x105   : > { %v5396_v4 = vunpack.i.h.bf16 %v5394_v39  ;;  %v5395_v59 = vunpack.i.l.bf16 %v5394_v39  ;;  %v5437_v0 = vpack.i.bf16 %v1311_v20, %v1175_v40  ;;  %v2066_v8 = vrot.slane %v2052_v63, %v6154_v19 }
 0x106   : > { %v2147_v53 = vcombine.low %v2082_v61, %v2098_v24 }
 0x107   : > { %5428 = vrot.lane.b32.xlu1 %v5427_v12, %s5956_s22  ;;  %v981_v6 = vsel %vm980_vm2, %v977_v31, %v5395_v59  ;;  %v982_v49 = vsel %vm980_vm2, %v978_v56, %v5396_v4  ;;  %v2115_v56 = vcombine.low %v2066_v8, %v2066_v8 }
 0x108   : > { %v5399_v62 = vpop.permute.xlu0 %5398  ;;  %v6785_v58 = vpop.permute.xlu1 %907  ;;  %v2155_v63 = vrot.slane %v2147_v53, %v6191_v52 }
 0x109   : > { %v5401_v17 = vunpack.i.h.bf16 %v5399_v62  ;;  %v5400_v7 = vunpack.i.l.bf16 %v5399_v62 }
 0x10b   : > { %v985_v46 = vsel %vm984_vm3, %v981_v6, %v5400_v7  ;;  %v986_v29 = vsel %vm984_vm3, %v982_v49, %v5401_v17  ;;  %5433 = vrot.lane.b32.xlu1 %v5432_v38, %s5957_s12 }
 0x10c   : > { %v6794_v14 = vpop.permute.xlu0 %1033  ;;  %v5224_v15 = vpack.c.bf16 %v986_v29, %v985_v46  ;;  %v6796_v1 = vpop.permute.xlu1 %931 }
 0x10e   : > { %5225 = vmatpush1.bf16.msra.mxu0 %v5224_v15 }
 0x10f   : > { %5226 = vmatprep.subr.bf16.mxu0 %v9377_v13  ;;  %5438 = vrot.lane.b32.xlu1 %v5437_v0, %s5958_s20  ;;  %v2123_v0 = vrot.slane %v2115_v56, %v6191_v52 }
 0x110   : > { %v6800_v39 = vpop.permute.xlu0 %883  ;;  %v6802_v2 = vpop.permute.xlu1 %955 }
 0x111   : > { %v2168_v56 = vcombine.high %v2123_v0, %v2155_v63 }
 0x114   : > { %v6805_v16 = vpop.permute.xlu0 %1037  ;;  %v6807_v25 = vpop.permute.xlu1 %5403 }
 0x115   : > { %v5405_v4 = vunpack.i.l.bf16 %v6807_v25 }
 0x117   : > { %v1536_v59 = vcombine.low %v5405_v4, %v5405_v4  ;;  %v1537_v41 = vcombine.high %v5405_v4, %v5405_v4 }
 0x118   : > { %v1488_v12 = vpop.permute.xlu0 %1487  ;;  %v1490_v43 = vpop.permute.xlu1 %1489 }
 0x119   : > { %v6820_v34 = vrot.slane %v1536_v59, %v6154_v19  ;;  %v1551_v44 = vrot.slane %v1537_v41, %v6154_v19  ;;  %v2116_v41 = vcombine.high %v2066_v8, %v2066_v8 }
 0x11b   : > { %v1584_v31 = vcombine.low %v6820_v34, %v6820_v34  ;;  %v1600_v4 = vcombine.low %v1551_v44, %v1551_v44 }
 0x11c   : > { %v1492_v62 = vpop.permute.xlu0 %1491  ;;  %v1494_v54 = vpop.permute.xlu1 %1493 }
 0x11d   : > { %v1552_v17 = vcombine.low %v1488_v12, %v1492_v62  ;;  %v1553_v57 = vcombine.high %v1488_v12, %v1492_v62  ;;  %v1568_v21 = vcombine.low %v1490_v43, %v1494_v54  ;;  %v1569_v7 = vcombine.high %v1490_v43, %v1494_v54 }
 0x11e   : > { %v6846_v59 = vrot.slane %v1584_v31, %v6191_v52  ;;  %v2148_v43 = vcombine.high %v2082_v61, %v2098_v24  ;;  %v1608_v31 = vrot.slane %v1600_v4, %v6191_v52  ;;  %v2130_v61 = vrot.slane %v2116_v41, %v6191_v52 }
 0x11f   : > { %v6826_v6 = vrot.slane %v1552_v17, %v6154_v19  ;;  %v1567_v49 = vrot.slane %v1553_v57, %v6154_v19  ;;  %v6830_v38 = vrot.slane %v1568_v21, %v6154_v19  ;;  %v1583_v20 = vrot.slane %v1569_v7, %v6154_v19 }
 0x120   : > { %v6833_v46 = vpop.permute.xlu0 %1495  ;;  %v6835_v29 = vpop.permute.xlu1 %1497  ;;  %9382 = vst [vmem:[#allocation57_spill] sm:$0xff] %v6846_v59  ;;  %v2167_v17 = vcombine.low %v2123_v0, %v2155_v63  ;;  %v2162_v8 = vrot.slane %v2148_v43, %v6191_v52  ;;  %v1601_v24 = vcombine.high %v1551_v44, %v1551_v44 }
 0x121   : > { %9378 = vst [vmem:[#allocation53_spill] sm:$0xff] %v6833_v46  ;;  %9379 = vst [vmem:[#allocation54_spill] sm:$0xff] %v6835_v29  ;;  %v1616_v15 = vcombine.low %v6826_v6, %v6830_v38  ;;  %v1632_v40 = vcombine.low %v1567_v49, %v1583_v20  ;;  %v1633_v57 = vcombine.high %v1567_v49, %v1583_v20 }
 0x122   : > { %v1615_v41 = vrot.slane %v1601_v24, %v6191_v52 }
 0x123   : > { %v6849_v12 = vrot.slane %v1616_v15, %v6191_v52  ;;  %v1640_v62 = vrot.slane %v1632_v40, %v6191_v52  ;;  %v1647_v20 = vrot.slane %v1633_v57, %v6191_v52  ;;  %v2169_v57 = vcombine.low %v2130_v61, %v2162_v8 }
 0x124   : > { %v6841_v11 = vpop.permute.xlu0 %1499  ;;  %v6843_v33 = vpop.permute.xlu1 %1501 }
 0x125   : > { %9380 = vst [vmem:[#allocation55_spill] sm:$0xff] %v6841_v11  ;;  %9381 = vst [vmem:[#allocation56_spill] sm:$0xff] %v6843_v33  ;;  %v1672_v21 = vcombine.low %v6835_v29, %v6843_v33  ;;  %v1656_v15 = vcombine.low %v6833_v46, %v6841_v11  ;;  %v1652_v40 = vcombine.low %v1608_v31, %v1640_v62 }
 0x126   : > { %9383 = vst [vmem:[#allocation58_spill] sm:$0xff] %v6849_v12  ;;  %v1653_v49 = vcombine.high %v1608_v31, %v1640_v62  ;;  %v2170_v62 = vcombine.high %v2130_v61, %v2162_v8  ;;  %v2132_v61 = vcombine.high %v6543_v48, %v6546_v3 }
 0x127   : > { %v1680_v54 = vrot.slane %v1672_v21, %v6154_v19  ;;  %v6871_v4 = vpack.i.bf16 %v2167_v17, %v1652_v40  ;;  %v1664_v43 = vrot.slane %v1656_v15, %v6154_v19  ;;  %v1617_v15 = vcombine.high %v6826_v6, %v6830_v38 }
 0x128   : > { %v6856_v7 = vpop.permute.xlu0 %1503  ;;  %v6858_v53 = vpop.permute.xlu1 %1505  ;;  %v6873_v0 = vpack.i.bf16 %v2168_v56, %v1653_v49  ;;  %v2100_v49 = vcombine.high %v6540_v10, %v6540_v10  ;;  %v1585_v10 = vcombine.high %v6820_v34, %v6820_v34 }
 0x129   : > { %9384 = vst [vmem:[#allocation59_spill] sm:$0xff] %v6871_v4  ;;  %v1720_v17 = vcombine.low %v1664_v43, %v1680_v54  ;;  %v1654_v4 = vcombine.low %v1615_v41, %v1647_v20  ;;  %v1721_v8 = vcombine.high %v1664_v43, %v1680_v54  ;;  %v1631_v34 = vrot.slane %v1617_v15, %v6191_v52 }
 0x12a   : > { %9385 = vst [vmem:[#allocation60_spill] sm:$0xff] %v6873_v0  ;;  %v1655_v0 = vcombine.high %v1615_v41, %v1647_v20  ;;  %v6911_v3 = vrot.slane %v2100_v49, %v6191_v52 }
 0x12b   : > { %v6907_v6 = vrot.slane %v1720_v17, %v6191_v52  ;;  %v1328_v17 = vcombine.low %v6794_v14, %v6805_v16 }
 0x12c   : > { %v6867_v29 = vpop.permute.xlu0 %1507  ;;  %v6869_v33 = vpop.permute.xlu1 %1509  ;;  %9390 = vst [vmem:[#allocation65_spill] sm:$0xff] %v6911_v3 }
 0x12d   : > { %v1688_v44 = vcombine.low %v6856_v7, %v6867_v29  ;;  %v1704_v63 = vcombine.low %v6858_v53, %v6869_v33  ;;  %9389 = vst [vmem:[#allocation64_spill] sm:$0xff] %v6907_v6 }
 0x12f   : > { %v1696_v21 = vrot.slane %v1688_v44, %v6154_v19  ;;  %v1712_v31 = vrot.slane %v1704_v63, %v6154_v19  ;;  %v6893_v44 = vpack.i.bf16 %v2170_v62, %v1655_v0  ;;  %v6895_v63 = vpack.i.bf16 %v2169_v57, %v1654_v4 }
 0x130   : > { %v6883_v40 = vpop.permute.xlu1 %1513  ;;  %v6885_v56 = vpop.permute.xlu0 %1511  ;;  %v6919_v4 = vrot.slane %v2132_v61, %v6191_v52  ;;  %v1649_v0 = vcombine.high %v6846_v59, %v6849_v12  ;;  %v1735_v62 = vrot.slane %v1721_v8, %v6191_v52  ;;  %v6929_v57 = vunpack.i.h.bf16 %v6619_v37 }
 0x131   : > { %v1752_v24 = vcombine.low %v1696_v21, %v1712_v31  ;;  %v1753_v46 = vcombine.high %v1696_v21, %v1712_v31  ;;  %9386 = vst [vmem:[#allocation61_spill] sm:$0xff] %v6893_v44  ;;  %9387 = vst [vmem:[#allocation62_spill] sm:$0xff] %v6895_v63  ;;  %v1599_v61 = vrot.slane %v1585_v10, %v6191_v52 }
 0x132   : > { %9391 = vst [vmem:[#allocation66_spill] sm:$0xff] %v6919_v4  ;;  %v1312_v37 = vcombine.low %v6721_v36, %v6751_v35  ;;  %v2531_v59 = vcombine.low %v6929_v57, %v6929_v57 }
 0x133   : > { %v6898_v11 = vrot.slane %v1752_v24, %v6191_v52  ;;  %v1767_v48 = vrot.slane %v1753_v46, %v6191_v52 }
 0x134   : > { %v6902_v20 = vpop.permute.xlu1 %1517  ;;  %v6904_v41 = vpop.permute.xlu0 %1515 }
 0x135   : > { %9388 = vst [vmem:[#allocation63_spill] sm:$0xff] %v6898_v11  ;;  %v1808_v38 = vcombine.low %v6883_v40, %v6902_v20  ;;  %v1792_v54 = vcombine.low %v6885_v56, %v6904_v41  ;;  %v1785_v46 = vcombine.high %v6907_v6, %v6898_v11  ;;  %v1786_v43 = vcombine.low %v1735_v62, %v1767_v48 }
 0x136   : > { %v1787_v63 = vcombine.high %v1735_v62, %v1767_v48  ;;  %v6974_v48 = vrot.slane %v2531_v59, %v6154_v19  ;;  %v9404_v59 = vsub.f32 %v6441_v5, %v6604_v50 }
 0x137   : > { %v1816_v21 = vrot.slane %v1808_v38, %v6154_v19  ;;  %v1800_v31 = vrot.slane %v1792_v54, %v6154_v19  ;;  %v5442_v24 = vpack.i.bf16 %v1785_v46, %v1649_v0  ;;  %v1650_v38 = vcombine.low %v1599_v61, %v1631_v34 }
 0x138   : > { %v6935_v49 = vpop.permute.xlu1 %2482  ;;  %v6937_v15 = vpop.permute.xlu0 %2484  ;;  %v2165_v54 = vcombine.low %v6911_v3, %v6919_v4  ;;  %v2164_v0 = vcombine.high %v6557_v26, %v6560_v27  ;;  %v1329_v46 = vcombine.high %v6794_v14, %v6805_v16  ;;  %v1320_v26 = vrot.slane %v1312_v37, %v6154_v19  ;;  %9399 = vst [vmem:[#allocation73_spill] sm:$0xff] %v6974_v48 }
 0x139   : > { %9392 = vst [vmem:[#allocation67_spill] sm:$0xff] %v6935_v49  ;;  %9393 = vst [vmem:[#allocation68_spill] sm:$0xff] %v6937_v15  ;;  %v1824_v12 = vcombine.low %v1800_v31, %v1816_v21  ;;  %v1825_v8 = vcombine.high %v1800_v31, %v1816_v21  ;;  %5443 = vrot.lane.b32.xlu0 %v5442_v24, %s5952_s3  ;;  %v1336_v21 = vrot.slane %v1328_v17, %v6154_v19  ;;  %v9398_v17 = vmov 0.0  }
 0x13a   : > { %v5447_v6 = vpack.i.bf16 %v1786_v43, %v1650_v38  ;;  %v1651_v16 = vcombine.high %v1599_v61, %v1631_v34  ;;  %v1343_v62 = vrot.slane %v1329_v46, %v6154_v19  ;;  %v2579_v46 = vcombine.low %v6974_v48, %v6974_v48 }
 0x13b   : > { %v6948_v11 = vrot.slane %v1825_v8, %v6191_v52  ;;  %v6951_v10 = vrot.slane %v1824_v12, %v6191_v52  ;;  %v1313_v8 = vcombine.high %v6721_v36, %v6751_v35  ;;  %v1345_v38 = vcombine.high %v1320_v26, %v1336_v21 }
 0x13c   : > { %v6958_v31 = vpop.permute.xlu1 %2486  ;;  %v6960_v24 = vpop.permute.xlu0 %2488  ;;  %v5452_v34 = vpack.i.bf16 %v1787_v63, %v1651_v16 }
 0x13d   : > { %9394 = vst [vmem:[#allocation69_spill] sm:$0xff] %v6948_v11  ;;  %9395 = vst [vmem:[#allocation70_spill] sm:$0xff] %v6951_v10  ;;  %v2547_v12 = vcombine.low %v6935_v49, %v6958_v31  ;;  %v2563_v27 = vcombine.low %v6937_v15, %v6960_v24  ;;  %5448 = vrot.lane.b32.xlu0 %v5447_v6, %s5953_s18  ;;  %v5457_v14 = vpack.i.bf16 %v2165_v54, %v6948_v11  ;;  %v9449_v49 = vld [vmem:[#allocation25_spill] sm:$0xff] }
 0x13e   : > { %9396 = vst [vmem:[#allocation71_spill] sm:$0xff] %v6958_v31  ;;  %9397 = vst [vmem:[#allocation72_spill] sm:$0xff] %v6960_v24  ;;  %v1856_v43 = vcombine.high %v6951_v10, %v9398_v17  ;;  %v488_v54 = vmul.f32 0.25, %v9404_v59  ;;  %v7021_v10 = vrot.slane %v2579_v46, %v6191_v52  ;;  %v2031_v31 = vrot.slane %v9449_v49, 1 }
 0x13f   : > { %v6977_v36 = vrot.slane %v2547_v12, %v6154_v19  ;;  %v6980_v35 = vrot.slane %v2563_v27, %v6154_v19  ;;  %5458 = vrot.lane.b32.xlu1 %v5457_v14, %s5953_s18  ;;  %v1327_v12 = vrot.slane %v1313_v8, %v6154_v19  ;;  %v9407_v8 = vsub.f32 %v6464_v30, %v6632_v9 }
 0x140   : > { %v6984_v6 = vpop.permute.xlu1 %2490  ;;  %v6986_v37 = vpop.permute.xlu0 %2492  ;;  %v5462_v61 = vpack.i.bf16 %v2164_v0, %v1856_v43  ;;  %v1359_v0 = vrot.slane %v1345_v38, %v6191_v52  ;;  %v7004_v5 = vmul.f32 %v6159_v22, %v488_v54  ;;  %9411 = vst [vmem:[#allocation83_spill] sm:$0xff] %v7021_v10  ;;  %v2022_v30 = vrot.slane %v6296_v51, 1  ;;  %v9454_v10 = vld [vmem:[#allocation22_spill] sm:$0xff] }
 0x141   : > { %9400 = vst [vmem:[#allocation74_spill] sm:$0xff] %v6977_v36  ;;  %9401 = vst [vmem:[#allocation75_spill] sm:$0xff] %v6980_v35  ;;  %v2611_v27 = vcombine.low %v6977_v36, %v6980_v35  ;;  %5453 = vrot.lane.b32.xlu0 %v5452_v34, %s5954_s13  ;;  %v1360_v50 = vcombine.low %v1327_v12, %v1343_v62  ;;  %v492_v16 = vmul.f32 0.25, %v9407_v8  ;;  %v2028_v8 = vrot.slane %v6340_v47, 1 }
 0x142   : > { %9402 = vst [vmem:[#allocation76_spill] sm:$0xff] %v6984_v6  ;;  %9403 = vst [vmem:[#allocation77_spill] sm:$0xff] %v6986_v37  ;;  %v1344_v34 = vcombine.low %v1320_v26, %v1336_v21  ;;  %v1361_v54 = vcombine.high %v1327_v12, %v1343_v62  ;;  %v2023_v9 = vrot.slane %v7004_v5, 1  ;;  %v7047_v26 = vunpack.i.h.bf16 %v6807_v25 }
 0x143   : > { %5463 = vrot.lane.b32.xlu1 %v5462_v61, %s5952_s3  ;;  %v7010_v43 = vrot.slane %v2611_v27, %v6191_v52  ;;  %v1368_v59 = vrot.slane %v1360_v50, %v6191_v52  ;;  %v7026_v27 = vmul.f32 %v6159_v22, %v492_v16 }
 0x144   : > { %v6998_v14 = vpop.permute.xlu1 %2494  ;;  %v7000_v63 = vpop.permute.xlu0 %2496  ;;  %v1375_v12 = vrot.slane %v1361_v54, %v6191_v52  ;;  %v7039_v46 = vrot.slane %v1344_v34, %v6191_v52  ;;  %v7042_v50 = vsel %vm1982_vm12, %v2022_v30, %v2023_v9  ;;  %9415 = vst [vmem:[#allocation87_spill] sm:$0xff] %v7047_v26  ;;  %v3011_v9 = vcombine.low %v7047_v26, %v7047_v26 }
 0x145   : > { %9405 = vst [vmem:[#allocation78_spill] sm:$0xff] %v6998_v14  ;;  %9406 = vst [vmem:[#allocation79_spill] sm:$0xff] %v7000_v63  ;;  %1399 = vrot.lane.b32.xlu0 %v1359_v0, %s5953_s18  ;;  %v2029_v16 = vrot.slane %v7026_v27, 1  ;;  %v2651_v25 = vcombine.low %v6984_v6, %v6998_v14  ;;  %v2667_v35 = vcombine.low %v6986_v37, %v7000_v63 }
 0x146   : > { %9408 = vst [vmem:[#allocation80_spill] sm:$0xff] %v7010_v43  ;;  %9414 = vst [vmem:[#allocation86_spill] sm:$0xff] %v7039_v46  ;;  %v1376_v34 = vcombine.high %v7039_v46, %v9398_v17  ;;  %v1377_v6 = vcombine.high %v1359_v0, %v9398_v17 }
 0x147   : > { %2978 = vrot.lane.b32.xlu1 %v6656_v32, %s5959_s23  ;;  %v7059_v30 = vsel %vm1982_vm12, %v2028_v8, %v2029_v16 }
 0x148   : > { %v7015_v61 = vpop.permute.xlu1 %2498  ;;  %v7017_v38 = vpop.permute.xlu0 %2500 }
 0x149   : > { %9409 = vst [vmem:[#allocation81_spill] sm:$0xff] %v7015_v61  ;;  %9410 = vst [vmem:[#allocation82_spill] sm:$0xff] %v7017_v38  ;;  %1423 = vrot.lane.b32.xlu0 %v1368_v59, %s5955_s21 }
 0x14b   : > { %2982 = vrot.lane.b32.xlu1 %v6676_v28, %s5959_s23 }
 0x14c   : > { %v7033_v21 = vpop.permute.xlu1 %2502  ;;  %v7035_v62 = vpop.permute.xlu0 %2504 }
 0x14d   : > { %9412 = vst [vmem:[#allocation84_spill] sm:$0xff] %v7033_v21  ;;  %9413 = vst [vmem:[#allocation85_spill] sm:$0xff] %v7035_v62  ;;  %1447 = vrot.lane.b32.xlu0 %v1375_v12, %s5957_s12  ;;  %v2683_v15 = vcombine.low %v7015_v61, %v7033_v21  ;;  %v2699_v46 = vcombine.low %v7017_v38, %v7035_v62  ;;  %v7084_v61 = vrot.slane %v3011_v9, %v6154_v19 }
 0x14e   : > { %v7087_v38 = vrot.slane %v2651_v25, %v6154_v19  ;;  %v7090_v62 = vrot.slane %v2667_v35, %v6154_v19  ;;  %v473_v21 = vmul.f32 3.0, %v6420_v55  ;;  %v1378_v35 = vcombine.high %v1368_v59, %v9398_v17 }
 0x14f   : > { %2506 = vrot.lane.b32.xlu1 %v7042_v50, %s5951_s17  ;;  %9420 = vst [vmem:[#allocation92_spill] sm:$0xff] %v7084_v61  ;;  %v7095_v0 = vrot.slane %v2683_v15, %v6154_v19  ;;  %v3441_v15 = vrot.slane %v6151_v18, 2  ;;  %v3059_v25 = vcombine.low %v7084_v61, %v7084_v61  ;;  %v1379_v18 = vcombine.high %v1375_v12, %v9398_v17 }
 0x150   : > { %v7052_v36 = vpop.permute.xlu1 %2962  ;;  %v7054_v54 = vpop.permute.xlu0 %2964  ;;  %9421 = vst [vmem:[#allocation93_spill] sm:$0xff] %v7087_v38  ;;  %9422 = vst [vmem:[#allocation94_spill] sm:$0xff] %v7090_v62 }
 0x151   : > { %9416 = vst [vmem:[#allocation88_spill] sm:$0xff] %v7052_v36  ;;  %9417 = vst [vmem:[#allocation89_spill] sm:$0xff] %v7054_v54  ;;  %1387 = vrot.lane.b32.xlu0 %v1376_v34, %s5952_s3 }
 0x152   : > { %9423 = vst [vmem:[#allocation95_spill] sm:$0xff] %v7095_v0 }
 0x153   : > { %2510 = vrot.lane.b32.xlu1 %v7059_v30, %s5951_s17 }
 0x154   : > { %v7074_v8 = vpop.permute.xlu1 %2966  ;;  %v7076_v16 = vpop.permute.xlu0 %2968 }
 0x155   : > { %9418 = vst [vmem:[#allocation90_spill] sm:$0xff] %v7074_v8  ;;  %9419 = vst [vmem:[#allocation91_spill] sm:$0xff] %v7076_v16  ;;  %v3027_v37 = vcombine.low %v7052_v36, %v7074_v8  ;;  %v3043_v34 = vcombine.low %v7054_v54, %v7076_v16  ;;  %1411 = vrot.lane.b32.xlu0 %v1377_v6, %s5954_s13  ;;  %v7098_v36 = vrot.slane %v2699_v46, %v6154_v19  ;;  %v9428_v16 = vld [vmem:[#allocation27_spill] sm:$0xff] }
 0x156   : > { %v3442_v6 = vrot.slane %v6159_v22, 2  ;;  %v9430_v8 = vld [vmem:[#allocation31_spill] sm:$0xff] }
 0x157   : > { %9424 = vst [vmem:[#allocation96_spill] sm:$0xff] %v7098_v36  ;;  %v7101_v54 = vrot.slane %v3027_v37, %v6154_v19  ;;  %v7104_v9 = vrot.slane %v3043_v34, %v6154_v19  ;;  %2986 = vrot.lane.b32.xlu1 %v7042_v50, %s5959_s23  ;;  %v9427_v37 = vld [vmem:[#allocation28_spill] sm:$0xff]  ;;  %v2715_v34 = vcombine.low %v7087_v38, %v7090_v62 }
 0x158   : > { %v481_v46 = vsub.f32 %v9427_v37, %v473_v21  ;;  %v2747_v59 = vcombine.low %v7095_v0, %v7098_v36  ;;  %v3448_v21 = vrot.slane %v9430_v8, 2  ;;  %v7131_v63 = vsel %vm3440_vm4, %v3441_v15, %v3442_v6  ;;  %v7134_v0 = vpop.permute.xlu1 %2970  ;;  %v9437_v15 = vld [vmem:[#allocation14_spill] sm:$0xff] }
 0x159   : > { %9425 = vst [vmem:[#allocation97_spill] sm:$0xff] %v7101_v54  ;;  %9426 = vst [vmem:[#allocation98_spill] sm:$0xff] %v7104_v9  ;;  %v3091_v55 = vcombine.low %v7101_v54, %v7104_v9  ;;  %1435 = vrot.lane.b32.xlu0 %v1378_v35, %s5956_s22  ;;  %v477_v54 = vmul.f32 3.0, %v9428_v16  ;;  %v9429_v35 = vld [vmem:[#allocation12_spill] sm:$0xff]  ;;  %v7137_v36 = vrot.slane %v2715_v34, %v6191_v52  ;;  %v3453_v6 = vrot.slane %v9437_v15, 2  ;;  %v9442_v34 = vld [vmem:[#allocation37_spill] sm:$0xff] }
 0x15a   : > { %v3447_v9 = vrot.slane %v9429_v35, 2  ;;  %9432 = vst [vmem:[#allocation27_spill] sm:$0xff] %v7134_v0  ;;  %v490_v16 = vmul.f32 0.25, %v481_v46  ;;  %v7140_v12 = vrot.slane %v2747_v59, %v6191_v52  ;;  %v9435_v35 = vld [vmem:[#allocation29_spill] sm:$0xff]  ;;  %v7144_v8 = vrot.slane %v3059_v25, %v6191_v52  ;;  %v9441_v15 = vld [vmem:[#allocation16_spill] sm:$0xff] }
 0x15b   : > { %2990 = vrot.lane.b32.xlu1 %v7059_v30, %s5959_s23  ;;  %v7128_v37 = vrot.slane %v3091_v55, %v6191_v52  ;;  %9433 = vst [vmem:[#allocation12_spill] sm:$0xff] %v7137_v36  ;;  %v485_v38 = vsub.f32 %v9435_v35, %v477_v54  ;;  %v9438_v46 = vld [vmem:[#allocation33_spill] sm:$0xff]  ;;  %v3460_v0 = vrot.slane %v9442_v34, 2  ;;  %v9443_v59 = vld [vmem:[#allocation48_spill] sm:$0xff] }
 0x15c   : > { %9434 = vst [vmem:[#allocation31_spill] sm:$0xff] %v7140_v12  ;;  %9436 = vst [vmem:[#allocation29_spill] sm:$0xff] %v7144_v8  ;;  %v7149_v55 = vsel %vm3440_vm4, %v3447_v9, %v3448_v21  ;;  %v9439_v54 = vld [vmem:[#allocation45_spill] sm:$0xff]  ;;  %v547_v25 = vmul.f32 %v6159_v22, %v490_v16  ;;  %v7162_v9 = vpop.permute.xlu1 %2974  ;;  %v9444_v8 = vld [vmem:[#allocation23_spill] sm:$0xff] }
 0x15d   : > { %9431 = vst [vmem:[#allocation28_spill] sm:$0xff] %v7128_v37  ;;  %1459 = vrot.lane.b32.xlu0 %v1379_v18, %s5958_s20  ;;  %v3454_v18 = vrot.slane %v9438_v46, 2  ;;  %v494_v35 = vmul.f32 0.25, %v485_v38  ;;  %9440 = vst [vmem:[#allocation14_spill] sm:$0xff] %v7162_v9  ;;  %v3459_v46 = vrot.slane %v9441_v15, 2  ;;  %v2025_v37 = vrot.slane %v9444_v8, 1 }
 0x15e   : > { %v2026_v62 = vrot.slane %v547_v25, 1  ;;  %v9447_v9 = vld [vmem:[#allocation39_spill] sm:$0xff]  ;;  %v9448_v34 = vld [vmem:[#allocation49_spill] sm:$0xff]  ;;  %v9459_v12 = vld [vmem:[#allocation30_spill] sm:$0xff] }
 0x15f   : > { %3938 = vrot.lane.b32.xlu1 %v7131_v63, %s5951_s17  ;;  %v7165_v21 = vsel %vm3440_vm4, %v3453_v6, %v3454_v18  ;;  %v551_v38 = vmul.f32 %v6159_v22, %v494_v35  ;;  %v7176_v16 = vsel %vm3440_vm4, %v3459_v46, %v3460_v0  ;;  %v9446_v6 = vld [vmem:[#allocation18_spill] sm:$0xff]  ;;  %v3466_v15 = vrot.slane %v9447_v9, 2  ;;  %v9451_v35 = vld [vmem:[#allocation19_spill] sm:$0xff] }
 0x160   : > { %9445 = vst [vmem:[#allocation33_spill] sm:$0xff] %v7176_v16  ;;  %v3465_v18 = vrot.slane %v9446_v6, 2  ;;  %v7183_v24 = vsel %vm1982_vm12, %v2025_v37, %v2026_v62  ;;  %v3471_v46 = vrot.slane %v9451_v35, 2  ;;  %v9452_v6 = vld [vmem:[#allocation43_spill] sm:$0xff]  ;;  %v3445_v26 = vrot.slane %v9459_v12, 2 }
 0x161   : > { %2976 = vrot.lane.b32.xlu0 %v9439_v54, %s5959_s23  ;;  %v2032_v22 = vrot.slane %v551_v38, 1  ;;  %v3472_v9 = vrot.slane %v9452_v6, 2 }
 0x162   : > { %v7189_v0 = vsel %vm3440_vm4, %v3465_v18, %v3466_v15  ;;  %v3477_v18 = vrot.slane %v9454_v10, 2  ;;  %v9455_v15 = vld [vmem:[#allocation47_spill] sm:$0xff] }
 0x163   : > { %3942 = vrot.lane.b32.xlu1 %v7149_v55, %s5951_s17  ;;  %9450 = vst [vmem:[#allocation45_spill] sm:$0xff] %v7189_v0  ;;  %v7196_v62 = vsel %vm1982_vm12, %v2031_v31, %v2032_v22  ;;  %v7201_v37 = vsel %vm3440_vm4, %v3471_v46, %v3472_v9  ;;  %v3478_v43 = vrot.slane %v9455_v15, 2  ;;  %v9456_v31 = vld [vmem:[#allocation26_spill] sm:$0xff]  ;;  %v3483_v46 = vrot.slane %v9444_v8, 2  ;;  %v9458_v15 = vld [vmem:[#allocation13_spill] sm:$0xff] }
 0x164   : > { %9453 = vst [vmem:[#allocation16_spill] sm:$0xff] %v7201_v37  ;;  %v963_v22 = vsel %vm960_vm13, %v9456_v31, %v6800_v39  ;;  %v3484_v9 = vrot.slane %v547_v25, 2  ;;  %v3444_v36 = vrot.slane %v9458_v15, 2  ;;  %v3490_v8 = vrot.slane %v551_v38, 2  ;;  %v9462_v15 = vld [vmem:[#allocation32_spill] sm:$0xff] }
 0x165   : > { %2980 = vrot.lane.b32.xlu0 %v9443_v59, %s5959_s23  ;;  %v7213_v6 = vsel %vm3440_vm4, %v3477_v18, %v3478_v43  ;;  %v967_v3 = vsel %vm964_vm14, %v963_v22, %v6755_v42  ;;  %v3489_v43 = vrot.slane %v9449_v49, 2  ;;  %v9461_v18 = vld [vmem:[#allocation15_spill] sm:$0xff]  ;;  %v3451_v12 = vrot.slane %v9462_v15, 2  ;;  %v9463_v49 = vld [vmem:[#allocation17_spill] sm:$0xff]  ;;  %v9464_v15 = vld [vmem:[#allocation36_spill] sm:$0xff] }
 0x166   : > { %9457 = vst [vmem:[#allocation37_spill] sm:$0xff] %v7213_v6  ;;  %v7225_v39 = vsel %vm3440_vm4, %v3483_v46, %v3484_v9  ;;  %v3450_v31 = vrot.slane %v9461_v18, 2  ;;  %v971_v42 = vsel %vm968_vm15, %v967_v3, %v6785_v58  ;;  %v7235_v11 = vsel %vm3440_vm4, %v3444_v36, %v3445_v26  ;;  %v9465_v26 = vld [vmem:[#allocation52_spill] sm:$0xff] }
 0x167   : > { %3946 = vrot.lane.b32.xlu1 %v7165_v21, %s5951_s17  ;;  %9460 = vst [vmem:[#allocation48_spill] sm:$0xff] %v7225_v39  ;;  %v3456_v38 = vrot.slane %v9463_v49, 2  ;;  %v7241_v18 = vsel %vm3440_vm4, %v3489_v43, %v3490_v8  ;;  %v3457_v48 = vrot.slane %v9464_v15, 2  ;;  %v975_v58 = vsel %vm972_vm0, %v971_v42, %v6761_v45  ;;  %v9467_v8 = vld [vmem:[#allocation51_spill] sm:$0xff]  ;;  %v9468_v49 = vld [vmem:[#allocation50_spill] sm:$0xff] }
 0x168   : > { %v9469_v15 = vcombine.low %v9467_v8, %v9468_v49  ;;  %v9474_v49 = vld [vmem:[#allocation40_spill] sm:$0xff] }
 0x169   : > { %2984 = vrot.lane.b32.xlu0 %v9448_v34, %s5959_s23  ;;  %v5409_v14 = vpop.permute.xlu1 %5408 }
 0x16a   : > { %v5411_v22 = vunpack.i.h.bf16 %v5409_v14  ;;  %v5410_v4 = vunpack.i.l.bf16 %v5409_v14 }
 0x16b   : > { %3950 = vrot.lane.b32.xlu1 %v7176_v16, %s5951_s17 }
 0x16d   : > { %2508 = vrot.lane.b32.xlu0 %v7183_v24, %s5951_s17  ;;  %v5414_v61 = vpop.permute.xlu1 %5413 }
 0x16e   : > { %v5416_v46 = vunpack.i.h.bf16 %v5414_v61  ;;  %v5415_v9 = vunpack.i.l.bf16 %v5414_v61  ;;  %v7249_v61 = vsel %vm3440_vm4, %v3450_v31, %v3451_v12 }
 0x16f   : > { %3954 = vrot.lane.b32.xlu1 %v7189_v0, %s5951_s17 }
 0x171   : > { %2512 = vrot.lane.b32.xlu0 %v7196_v62, %s5951_s17  ;;  %v5419_v35 = vpop.permute.xlu1 %5418 }
 0x173   : > { %3958 = vrot.lane.b32.xlu1 %v7201_v37, %s5951_s17  ;;  %v5420_v37 = vunpack.i.l.bf16 %v5419_v35 }
 0x175   : > { %2988 = vrot.lane.b32.xlu0 %v7183_v24, %s5959_s23  ;;  %v5424_v10 = vpop.permute.xlu1 %5423 }
 0x176   : > { %v5426_v3 = vunpack.i.h.bf16 %v5424_v10  ;;  %v5425_v36 = vunpack.i.l.bf16 %v5424_v10 }
 0x177   : > { %3962 = vrot.lane.b32.xlu1 %v7213_v6, %s5951_s17  ;;  %v5421_v6 = vunpack.i.h.bf16 %v5419_v35  ;;  %v9466_v35 = vcombine.low %v6729_v60, %v9465_v26  ;;  %v979_v60 = vsel %vm976_vm1, %v975_v58, %v6796_v1 }
 0x178   : > { %v983_v58 = vsel %vm980_vm2, %v979_v60, %v6777_v23  ;;  %v9475_v60 = vld [vmem:[#allocation24_spill] sm:$0xff] }
 0x179   : > { %2992 = vrot.lane.b32.xlu0 %v7196_v62, %s5959_s23  ;;  %v5429_v25 = vpop.permute.xlu1 %5428  ;;  %v1465_v43 = vsel %vm960_vm13, %v9466_v35, %v5411_v22  ;;  %v9470_v22 = vld [vmem:[#allocation20_spill] sm:$0xff]  ;;  %v987_v23 = vsel %vm984_vm3, %v983_v58, %v6802_v2  ;;  %v2219_v58 = vcombine.low %v9443_v59, %v9448_v34 }
 0x17a   : > { %v5431_v45 = vunpack.i.h.bf16 %v5429_v25  ;;  %v5430_v42 = vunpack.i.l.bf16 %v5429_v25  ;;  %v1468_v44 = vsel %vm964_vm14, %v1465_v43, %v5416_v46 }
 0x17b   : > { %3966 = vrot.lane.b32.xlu1 %v7225_v39, %s5951_s17  ;;  %v1464_v39 = vsel %vm960_vm13, %v9469_v15, %v5410_v4  ;;  %v1471_v12 = vsel %vm968_vm15, %v1468_v44, %v5421_v6  ;;  %v3462_v4 = vrot.slane %v9470_v22, 2  ;;  %v3469_v15 = vrot.slane %v9474_v49, 2 }
 0x17c   : > { %v1467_v10 = vsel %vm964_vm14, %v1464_v39, %v5415_v9  ;;  %v1474_v39 = vsel %vm972_vm0, %v1471_v12, %v5426_v3  ;;  %v7273_v9 = vsel %vm3440_vm4, %v3456_v38, %v3457_v48  ;;  %v9476_v12 = vld [vmem:[#allocation46_spill] sm:$0xff] }
 0x17d   : > { %3940 = vrot.lane.b32.xlu0 %v7235_v11, %s5951_s17  ;;  %v5434_v14 = vpop.permute.xlu1 %5433  ;;  %v1470_v31 = vsel %vm968_vm15, %v1467_v10, %v5420_v37  ;;  %v1477_v37 = vsel %vm976_vm1, %v1474_v39, %v5431_v45  ;;  %v3475_v22 = vrot.slane %v9476_v12, 2  ;;  %v3481_v39 = vrot.slane %v7004_v5, 2 }
 0x17e   : > { %v5436_v0 = vunpack.i.h.bf16 %v5434_v14  ;;  %v5435_v16 = vunpack.i.l.bf16 %v5434_v14  ;;  %v1473_v25 = vsel %vm972_vm0, %v1470_v31, %v5425_v36  ;;  %v9471_v14 = vld [vmem:[#allocation38_spill] sm:$0xff]  ;;  %v3474_v31 = vrot.slane %v9475_v60, 2 }
 0x17f   : > { %3970 = vrot.lane.b32.xlu1 %v7241_v18, %s5951_s17  ;;  %v3463_v26 = vrot.slane %v9471_v14, 2  ;;  %v1476_v1 = vsel %vm976_vm1, %v1473_v25, %v5430_v42  ;;  %v3480_v25 = vrot.slane %v6296_v51, 2  ;;  %v9478_v14 = vld [vmem:[#allocation41_spill] sm:$0xff]  ;;  %v3487_v51 = vrot.slane %v7026_v27, 2 }
 0x180   : > { %v1479_v3 = vsel %vm980_vm2, %v1476_v1, %v5435_v16  ;;  %v1480_v36 = vsel %vm980_vm2, %v1477_v37, %v5436_v0  ;;  %v9473_v0 = vld [vmem:[#allocation21_spill] sm:$0xff]  ;;  %v9479_v1 = vld [vmem:[#allocation42_spill] sm:$0xff]  ;;  %v2203_v5 = vcombine.low %v6656_v32, %v6676_v28  ;;  %v1705_v60 = vcombine.high %v6858_v53, %v6869_v33 }
 0x181   : > { %3944 = vrot.lane.b32.xlu0 %v7249_v61, %s5951_s17  ;;  %v5439_v46 = vpop.permute.xlu1 %5438  ;;  %v7294_v16 = vsel %vm3440_vm4, %v3462_v4, %v3463_v26  ;;  %v3468_v8 = vrot.slane %v9473_v0, 2  ;;  %v7317_v4 = vsel %vm3440_vm4, %v3474_v31, %v3475_v22  ;;  %v2187_v37 = vcombine.low %v9479_v1, %v9439_v54 }
 0x182   : > { %v5441_v44 = vunpack.i.h.bf16 %v5439_v46  ;;  %v5440_v6 = vunpack.i.l.bf16 %v5439_v46  ;;  %v9477_v46 = vld [vmem:[#allocation44_spill] sm:$0xff]  ;;  %v1689_v22 = vcombine.high %v6856_v7, %v6867_v29 }
 0x183   : > { %4420 = vrot.lane.b32.xlu1 %v7235_v11, %s5959_s23  ;;  %v7307_v2 = vsel %vm3440_vm4, %v3468_v8, %v3469_v15  ;;  %v2171_v26 = vcombine.low %v9478_v14, %v9477_v46  ;;  %v7350_v27 = vrot.slane %v2187_v37, %v6154_v19  ;;  %v1719_v37 = vrot.slane %v1705_v60, %v6154_v19  ;;  %v9488_v60 = vld [vmem:[#allocation60_spill] sm:$0xff] }
 0x184   : > { %v1482_v48 = vsel %vm984_vm3, %v1479_v3, %v5440_v6  ;;  %v7286_v38 = vsel %vm984_vm3, %v1480_v36, %v5441_v44  ;;  %v7330_v44 = vsel %vm3440_vm4, %v3480_v25, %v3481_v39  ;;  %v3486_v6 = vrot.slane %v6340_v47, 2  ;;  %v9485_v25 = vld [vmem:[#allocation55_spill] sm:$0xff]  ;;  %v9486_v39 = vld [vmem:[#allocation53_spill] sm:$0xff] }
 0x185   : > { %9472 = vst [vmem:[#allocation23_spill] sm:$0xff] %v7286_v38  ;;  %v4902_v35 = vrot.slane %v1482_v48, 4  ;;  %v9266_v43 = vrot.slane %v7286_v38, 4  ;;  %3948 = vrot.lane.b32.xlu0 %v7273_v9, %s5951_s17  ;;  %v2307_v3 = vcombine.low %v7042_v50, %v7059_v30  ;;  %v2323_v36 = vcombine.low %v7183_v24, %v7196_v62  ;;  %v9504_v38 = vld [vmem:[#allocation66_spill] sm:$0xff] }
 0x186   : > { %v7347_v47 = vrot.slane %v2171_v26, %v6154_v19  ;;  %v7353_v48 = vsel %vm3440_vm4, %v3486_v6, %v3487_v51  ;;  %v1657_v26 = vcombine.high %v9486_v39, %v9485_v25  ;;  %v9487_v6 = vld [vmem:[#allocation59_spill] sm:$0xff] }
 0x187   : > { %4424 = vrot.lane.b32.xlu1 %v7249_v61, %s5959_s23  ;;  %v4904_v45 = vsel %vm4901_vm5, %v4902_v35, %v9266_v43  ;;  %v4943_v42 = vsel %vm4901_vm5, %v987_v23, %v4902_v35  ;;  %v7356_v35 = vrot.slane %v2203_v5, %v6154_v19  ;;  %v7359_v23 = vrot.slane %v2219_v58, %v6154_v19 }
 0x188   : > { %v5227_v10 = vpack.c.bf16 %v4904_v45, %v4943_v42  ;;  %v7362_v0 = vrot.slane %v2307_v3, %v6154_v19  ;;  %v7365_v8 = vrot.slane %v2323_v36, %v6154_v19  ;;  %v2235_v49 = vcombine.low %v7347_v47, %v7350_v27  ;;  %v7419_v3 = vpop.permute.xlu0 %2972 }
 0x189   : > { %3952 = vrot.lane.b32.xlu0 %v7294_v16, %s5951_s17  ;;  %v2267_v15 = vcombine.low %v7356_v35, %v7359_v23  ;;  %v1809_v42 = vcombine.high %v6883_v40, %v6902_v20  ;;  %v9483_v20 = vld [vmem:[#allocation56_spill] sm:$0xff]  ;;  %v1703_v5 = vrot.slane %v1689_v22, %v6154_v19  ;;  %v2172_v36 = vcombine.high %v9478_v14, %v9477_v46 }
 0x18a   : > { %5228 = vmatpush1.bf16.msra.mxu0 %v5227_v10  ;;  %v2339_v45 = vcombine.low %v7362_v0, %v7365_v8  ;;  %v1793_v10 = vcombine.high %v6885_v56, %v6904_v41  ;;  %v7390_v31 = vrot.slane %v2235_v49, %v6191_v52  ;;  %v9484_v56 = vld [vmem:[#allocation54_spill] sm:$0xff]  ;;  %v2188_v49 = vcombine.high %v9479_v1, %v9439_v54  ;;  %v9489_v54 = vld [vmem:[#allocation33_spill] sm:$0xff] }
 0x18b   : > { %4428 = vrot.lane.b32.xlu1 %v7273_v9, %s5959_s23  ;;  %5229 = vmatprep.subr.bf16.mxu0 %v9377_v13  ;;  %v7393_v12 = vrot.slane %v2267_v15, %v6191_v52  ;;  %v1673_v41 = vcombine.high %v9484_v56, %v9483_v20  ;;  %v1823_v33 = vrot.slane %v1809_v42, %v6154_v19 }
 0x18c   : > { %9480 = vst [vmem:[#allocation18_spill] sm:$0xff] %v7390_v31  ;;  %v7396_v40 = vrot.slane %v2339_v45, %v6191_v52  ;;  %v1807_v53 = vrot.slane %v1793_v10, %v6154_v19  ;;  %v2204_v15 = vcombine.high %v6656_v32, %v6676_v28  ;;  %v2220_v45 = vcombine.high %v9443_v59, %v9448_v34 }
 0x18d   : > { %3956 = vrot.lane.b32.xlu0 %v7307_v2, %s5951_s17  ;;  %9481 = vst [vmem:[#allocation39_spill] sm:$0xff] %v7393_v12  ;;  %v2300_v51 = vcombine.high %v7390_v31, %v7393_v12  ;;  %v1687_v7 = vrot.slane %v1673_v41, %v6154_v19  ;;  %v1671_v42 = vrot.slane %v1657_v26, %v6154_v19  ;;  %v9531_v12 = vld [vmem:[#allocation85_spill] sm:$0xff] }
 0x18e   : > { %9482 = vst [vmem:[#allocation49_spill] sm:$0xff] %v7396_v40  ;;  %v2371_v29 = vcombine.high %v7396_v40, %v9398_v17  ;;  %v1840_v58 = vcombine.low %v1807_v53, %v1823_v33  ;;  %v1768_v10 = vcombine.low %v1703_v5, %v1719_v37  ;;  %v2532_v56 = vcombine.high %v6929_v57, %v6929_v57 }
 0x18f   : > { %4432 = vrot.lane.b32.xlu1 %v7294_v16, %s5959_s23  ;;  %v1736_v46 = vcombine.low %v1671_v42, %v1687_v7  ;;  %v7440_v32 = vrot.slane %v2172_v36, %v6154_v19  ;;  %v7443_v28 = vrot.slane %v2188_v49, %v6154_v19  ;;  %v7446_v59 = vrot.slane %v2204_v15, %v6154_v19  ;;  %v9494_v49 = vld [vmem:[#allocation73_spill] sm:$0xff] }
 0x190   : > { %v5487_v20 = vpack.i.bf16 %v2371_v29, %v2300_v51  ;;  %v7435_v14 = vrot.slane %v1840_v58, %v6191_v52  ;;  %v7449_v34 = vrot.slane %v2220_v45, %v6154_v19  ;;  %v1769_v57 = vcombine.high %v1703_v5, %v1719_v37  ;;  %v9491_v51 = vld [vmem:[#allocation45_spill] sm:$0xff] }
 0x191   : > { %3960 = vrot.lane.b32.xlu0 %v7317_v4, %s5951_s17  ;;  %v7452_v1 = vrot.slane %v1768_v10, %v6191_v52  ;;  %v2308_v41 = vcombine.high %v7042_v50, %v7059_v30  ;;  %v2324_v22 = vcombine.high %v7183_v24, %v7196_v62  ;;  %v2546_v39 = vrot.slane %v2532_v56, %v6154_v19  ;;  %v9492_v5 = vld [vmem:[#allocation61_spill] sm:$0xff]  ;;  %v9495_v10 = vld [vmem:[#allocation16_spill] sm:$0xff] }
 0x192   : > { %v1737_v26 = vcombine.high %v1671_v42, %v1687_v7  ;;  %v1841_v37 = vcombine.high %v1807_v53, %v1823_v33  ;;  %v1858_v50 = vcombine.high %v7435_v14, %v9398_v17  ;;  %v2252_v24 = vcombine.high %v7440_v32, %v7443_v28 }
 0x193   : > { %4436 = vrot.lane.b32.xlu1 %v7307_v2, %s5959_s23  ;;  %v2284_v30 = vcombine.high %v7446_v59, %v7449_v34  ;;  %v3509_v62 = vcombine.low %v7131_v63, %v7131_v63  ;;  %v3510_v29 = vcombine.high %v7131_v63, %v7131_v63  ;;  %v1783_v33 = vrot.slane %v1769_v57, %v6191_v52 }
 0x194   : > { %v7479_v53 = vrot.slane %v2308_v41, %v6154_v19  ;;  %v7482_v7 = vrot.slane %v2324_v22, %v6154_v19  ;;  %v2580_v15 = vcombine.high %v9494_v49, %v9494_v49  ;;  %v1751_v42 = vrot.slane %v1737_v26, %v6191_v52 }
 0x195   : > { %3964 = vrot.lane.b32.xlu0 %v7330_v44, %s5951_s17  ;;  %v1855_v56 = vrot.slane %v1841_v37, %v6191_v52  ;;  %v2596_v57 = vcombine.high %v2546_v39, %v2546_v39  ;;  %v7503_v41 = vrot.slane %v3509_v62, %v6154_v19  ;;  %v7506_v22 = vrot.slane %v3510_v29, %v6154_v19 }
 0x196   : > { %v7512_v49 = vrot.slane %v2252_v24, %v6191_v52  ;;  %v7515_v37 = vrot.slane %v2284_v30, %v6191_v52  ;;  %v7524_v29 = vrot.slane %v2580_v15, %v6191_v52  ;;  %v3541_v24 = vcombine.low %v7149_v55, %v7165_v21 }
 0x197   : > { %4440 = vrot.lane.b32.xlu1 %v7317_v4, %s5959_s23  ;;  %v3542_v30 = vcombine.high %v7149_v55, %v7165_v21  ;;  %v3645_v62 = vcombine.low %v9489_v54, %v9491_v51  ;;  %v3630_v40 = vcombine.high %v7273_v9, %v7294_v16 }
 0x199   : > { %3968 = vrot.lane.b32.xlu0 %v7353_v48, %s5951_s17 }
 0x19b   : > { %4444 = vrot.lane.b32.xlu1 %v7330_v44, %s5959_s23 }
 0x19d   : > { %4418 = vrot.lane.b32.xlu0 %v7131_v63, %s5959_s23  ;;  %v2595_v63 = vcombine.low %v2546_v39, %v2546_v39  ;;  %v2356_v39 = vcombine.high %v7479_v53, %v7482_v7 }
 0x19f   : > { %4448 = vrot.lane.b32.xlu1 %v7353_v48, %s5959_s23  ;;  %v7555_v15 = vrot.slane %v2356_v39, %v6191_v52 }
 0x1a1   : > { %4422 = vrot.lane.b32.xlu0 %v7149_v55, %s5959_s23 }
 0x1a3   : > { %5468 = vrot.lane.b32.xlu1 %v9487_v6, %s5955_s21  ;;  %v7463_v6 = vrot.slane %v1736_v46, %v6191_v52  ;;  %v7545_v46 = vrot.slane %v2596_v57, %v6191_v52  ;;  %v3646_v57 = vcombine.high %v9489_v54, %v9491_v51 }
 0x1a5   : > { %4426 = vrot.lane.b32.xlu0 %v7165_v21, %s5959_s23  ;;  %v1789_v36 = vcombine.high %v7463_v6, %v7452_v1 }
 0x1a7   : > { %5478 = vrot.lane.b32.xlu1 %v9488_v60, %s5956_s22 }
 0x1a9   : > { %4430 = vrot.lane.b32.xlu0 %v9489_v54, %s5959_s23 }
 0x1ab   : > { %5488 = vrot.lane.b32.xlu1 %v5487_v20, %s5952_s3  ;;  %v7459_v25 = vpop.permute.xlu0 %5443  ;;  %v5507_v20 = vpack.i.bf16 %v1789_v36, %v1858_v50  ;;  %v2268_v50 = vcombine.high %v7356_v35, %v7359_v23  ;;  %v7527_v36 = vrot.slane %v2595_v63, %v6191_v52  ;;  %v1859_v23 = vcombine.high %v1855_v56, %v9398_v17  ;;  %v9501_v63 = vld [vmem:[#allocation48_spill] sm:$0xff] }
 0x1ac   : > { %9490 = vst [vmem:[#allocation25_spill] sm:$0xff] %v7459_v25  ;;  %v3782_v13 = vcombine.high %v9501_v63, %v7241_v18  ;;  %v9532_v25 = vld [vmem:[#allocation82_spill] sm:$0xff] }
 0x1ad   : > { %4434 = vrot.lane.b32.xlu0 %v9491_v51, %s5959_s23  ;;  %v3781_v51 = vcombine.low %v9501_v63, %v7241_v18 }
 0x1af   : > { %5498 = vrot.lane.b32.xlu1 %v9492_v5, %s5958_s20  ;;  %v7486_v58 = vpop.permute.xlu0 %5448  ;;  %v1790_v5 = vcombine.low %v1751_v42, %v1783_v33 }
 0x1b0   : > { %9493 = vst [vmem:[#allocation19_spill] sm:$0xff] %v7486_v58  ;;  %v9530_v58 = vld [vmem:[#allocation81_spill] sm:$0xff] }
 0x1b1   : > { %4438 = vrot.lane.b32.xlu0 %v9495_v10, %s5959_s23  ;;  %v7497_v60 = vpop.permute.xlu1 %5458  ;;  %v5517_v35 = vpack.i.bf16 %v1790_v5, %v1855_v56  ;;  %v1791_v56 = vcombine.high %v1751_v42, %v1783_v33  ;;  %v2305_v5 = vcombine.low %v7512_v49, %v7515_v37  ;;  %v7566_v33 = vrot.slane %v3541_v24, %v6154_v19 }
 0x1b2   : > { %9496 = vst [vmem:[#allocation43_spill] sm:$0xff] %v7497_v60  ;;  %v7569_v42 = vrot.slane %v3542_v30, %v6154_v19  ;;  %v3526_v24 = vcombine.high %v7235_v11, %v7249_v61  ;;  %v3629_v30 = vcombine.low %v7273_v9, %v7294_v16  ;;  %v9507_v16 = vld [vmem:[#allocation87_spill] sm:$0xff]  ;;  %v7651_v60 = vrot.slane %v2268_v50, %v6191_v52 }
 0x1b3   : > { %5508 = vrot.lane.b32.xlu1 %v5507_v20, %s5956_s22  ;;  %v7509_v26 = vpop.permute.xlu0 %5453  ;;  %v9498_v20 = vld [vmem:[#allocation37_spill] sm:$0xff]  ;;  %v5527_v54 = vpack.i.bf16 %v1791_v56, %v1859_v23  ;;  %v5537_v56 = vpack.i.bf16 %v7555_v15, %v2305_v5 }
 0x1b4   : > { %9497 = vst [vmem:[#allocation22_spill] sm:$0xff] %v7509_v26  ;;  %v3677_v55 = vcombine.low %v9495_v10, %v9498_v20  ;;  %v3678_v39 = vcombine.high %v9495_v10, %v9498_v20  ;;  %v9502_v10 = vld [vmem:[#allocation69_spill] sm:$0xff] }
 0x1b5   : > { %4442 = vrot.lane.b32.xlu0 %v9498_v20, %s5959_s23  ;;  %v7535_v43 = vpop.permute.xlu1 %5463  ;;  %v1857_v20 = vcombine.high %v9502_v10, %v9398_v17 }
 0x1b6   : > { %9499 = vst [vmem:[#allocation47_spill] sm:$0xff] %v7535_v43  ;;  %v7602_v10 = vrot.slane %v3677_v55, %v6154_v19  ;;  %v7610_v5 = vrot.slane %v3678_v39, %v6154_v19  ;;  %v9510_v55 = vld [vmem:[#allocation12_spill] sm:$0xff]  ;;  %v7627_v39 = vrot.slane %v3526_v24, %v6154_v19 }
 0x1b7   : > { %5518 = vrot.lane.b32.xlu1 %v5517_v35, %s5957_s12  ;;  %v7550_v21 = vpop.permute.xlu0 %1399  ;;  %v3525_v35 = vcombine.low %v7235_v11, %v7249_v61  ;;  %v7596_v11 = vrot.slane %v3645_v62, %v6154_v19  ;;  %v7599_v61 = vrot.slane %v3646_v57, %v6154_v19  ;;  %v9509_v57 = vld [vmem:[#allocation31_spill] sm:$0xff]  ;;  %v9524_v24 = vld [vmem:[#allocation68_spill] sm:$0xff] }
 0x1b8   : > { %9500 = vst [vmem:[#allocation26_spill] sm:$0xff] %v7550_v21  ;;  %9508 = vst [vmem:[#allocation15_spill] sm:$0xff] %v7610_v5  ;;  %v7633_v21 = vrot.slane %v3630_v40, %v6154_v19 }
 0x1b9   : > { %4446 = vrot.lane.b32.xlu0 %v9501_v63, %s5959_s23  ;;  %v7575_v45 = vpop.permute.xlu1 %2978  ;;  %v9505_v63 = vld [vmem:[#allocation65_spill] sm:$0xff]  ;;  %9506 = vst [vmem:[#allocation30_spill] sm:$0xff] %v7599_v61  ;;  %v7605_v9 = vrot.slane %v3525_v35, %v6154_v19  ;;  %v7621_v35 = vrot.slane %v3781_v51, %v6154_v19 }
 0x1ba   : > { %v2166_v43 = vcombine.high %v9505_v63, %v9504_v38  ;;  %v3661_v38 = vcombine.low %v7307_v2, %v7317_v4  ;;  %v2780_v63 = vcombine.high %v9510_v55, %v9509_v57  ;;  %9512 = vst [vmem:[#allocation17_spill] sm:$0xff] %v7633_v21  ;;  %v9514_v55 = vld [vmem:[#allocation80_spill] sm:$0xff]  ;;  %v9528_v61 = vld [vmem:[#allocation77_spill] sm:$0xff] }
 0x1bb   : > { %5528 = vrot.lane.b32.xlu1 %v5527_v54, %s5958_s20  ;;  %v7590_v23 = vpop.permute.xlu0 %1423  ;;  %v3012_v54 = vcombine.high %v9507_v16, %v9507_v16  ;;  %v7630_v16 = vrot.slane %v3629_v30, %v6154_v19  ;;  %v9516_v30 = vcombine.high %v7347_v47, %v7350_v27 }
 0x1bc   : > { %9503 = vst [vmem:[#allocation13_spill] sm:$0xff] %v7590_v23  ;;  %v7624_v23 = vrot.slane %v3782_v13, %v6154_v19  ;;  %v5472_v51 = vpack.i.bf16 %v1857_v20, %v2166_v43  ;;  %v9515_v13 = vld [vmem:[#allocation83_spill] sm:$0xff]  ;;  %v7661_v20 = vrot.slane %v3661_v38, %v6154_v19 }
 0x1bd   : > { %4450 = vrot.lane.b32.xlu0 %v7241_v18, %s5959_s23  ;;  %v7616_v62 = vpop.permute.xlu1 %2982  ;;  %v3662_v18 = vcombine.high %v7307_v2, %v7317_v4  ;;  %v2644_v26 = vcombine.high %v9515_v13, %v9514_v55  ;;  %v7648_v40 = vrot.slane %v9516_v30, %v6191_v52  ;;  %v2340_v2 = vcombine.high %v7362_v0, %v7365_v8  ;;  %v9522_v4 = vld [vmem:[#allocation67_spill] sm:$0xff]  ;;  %v9523_v8 = vld [vmem:[#allocation72_spill] sm:$0xff] }
 0x1be   : > { %9511 = vst [vmem:[#allocation32_spill] sm:$0xff] %v7624_v23  ;;  %v7656_v43 = vrot.slane %v3012_v54, %v6154_v19  ;;  %v3766_v30 = vcombine.high %v7330_v44, %v7353_v48  ;;  %v1788_v0 = vcombine.low %v7463_v6, %v7452_v1  ;;  %v9521_v6 = vld [vmem:[#allocation71_spill] sm:$0xff] }
 0x1bf   : > { %5538 = vrot.lane.b32.xlu1 %v5537_v56, %s5957_s12  ;;  %v7638_v57 = vpop.permute.xlu0 %1447  ;;  %v5547_v27 = vpack.i.bf16 %v2780_v63, %v2644_v26  ;;  %v7679_v26 = vrot.slane %v3662_v18, %v6154_v19  ;;  %v3765_v63 = vcombine.low %v7330_v44, %v7353_v48  ;;  %v2301_v54 = vcombine.low %v7648_v40, %v7651_v60  ;;  %v9519_v18 = vld [vmem:[#allocation92_spill] sm:$0xff]  ;;  %v9520_v48 = vld [vmem:[#allocation62_spill] sm:$0xff]  ;;  %v9527_v44 = vld [vmem:[#allocation79_spill] sm:$0xff] }
 0x1c0   : > { %9513 = vst [vmem:[#allocation36_spill] sm:$0xff] %v7638_v57  ;;  %v2354_v38 = vrot.slane %v2340_v2, %v6191_v52  ;;  %v3060_v50 = vcombine.high %v9519_v18, %v9519_v18  ;;  %v3075_v56 = vcombine.low %v7656_v43, %v7656_v43  ;;  %v2548_v2 = vcombine.high %v9522_v4, %v9521_v6  ;;  %v9526_v57 = vld [vmem:[#allocation76_spill] sm:$0xff] }
 0x1c1   : > { %5473 = vrot.lane.b32.xlu0 %v5472_v51, %s5954_s13  ;;  %v7664_v47 = vpop.permute.xlu1 %2506  ;;  %9517 = vst [vmem:[#allocation52_spill] sm:$0xff] %v7679_v26  ;;  %v2564_v18 = vcombine.high %v9524_v24, %v9523_v8  ;;  %v5492_v13 = vpack.i.bf16 %v1788_v0, %v7435_v14  ;;  %v2668_v21 = vcombine.high %v9528_v61, %v9527_v44  ;;  %v9540_v44 = vld [vmem:[#allocation90_spill] sm:$0xff] }
 0x1c2   : > { %v2700_v4 = vcombine.high %v9532_v25, %v9531_v12  ;;  %v7723_v24 = vrot.slane %v3765_v63, %v6154_v19  ;;  %v7726_v8 = vrot.slane %v3766_v30, %v6154_v19  ;;  %v5502_v14 = vpack.i.bf16 %v2354_v38, %v2301_v54 }
 0x1c3   : > { %5548 = vrot.lane.b32.xlu1 %v5547_v27, %s5952_s3  ;;  %v7684_v51 = vpop.permute.xlu0 %1387  ;;  %v9525_v27 = vld [vmem:[#allocation78_spill] sm:$0xff]  ;;  %v9535_v12 = vcombine.low %v7440_v32, %v7443_v28  ;;  %v9536_v0 = vcombine.low %v7446_v59, %v7449_v34  ;;  %v2355_v54 = vcombine.low %v7479_v53, %v7482_v7  ;;  %v2682_v28 = vrot.slane %v2668_v21, %v6154_v19  ;;  %v9538_v53 = vld [vmem:[#allocation75_spill] sm:$0xff] }
 0x1c4   : > { %9518 = vst [vmem:[#allocation51_spill] sm:$0xff] %v7684_v51  ;;  %v2652_v51 = vcombine.high %v9526_v57, %v9525_v27  ;;  %9534 = vst [vmem:[#allocation20_spill] sm:$0xff] %v7726_v8  ;;  %v2302_v57 = vcombine.high %v7648_v40, %v7651_v60  ;;  %v2562_v60 = vrot.slane %v2548_v2, %v6154_v19  ;;  %v9539_v7 = vld [vmem:[#allocation74_spill] sm:$0xff]  ;;  %v9541_v2 = vld [vmem:[#allocation88_spill] sm:$0xff] }
 0x1c5   : > { %5483 = vrot.lane.b32.xlu0 %v9520_v48, %s5957_s12  ;;  %v7703_v1 = vpop.permute.xlu1 %2510  ;;  %v9529_v48 = vld [vmem:[#allocation84_spill] sm:$0xff]  ;;  %v2259_v25 = vrot.slane %v9535_v12, %v6191_v52  ;;  %v2291_v63 = vrot.slane %v9536_v0, %v6191_v52  ;;  %v2714_v34 = vrot.slane %v2700_v4, %v6154_v19  ;;  %v2612_v27 = vcombine.high %v9539_v7, %v9538_v53  ;;  %v9543_v12 = vld [vmem:[#allocation89_spill] sm:$0xff] }
 0x1c6   : > { %v2684_v31 = vcombine.high %v9530_v58, %v9529_v48  ;;  %v2372_v58 = vcombine.high %v2354_v38, %v9398_v17  ;;  %v2666_v32 = vrot.slane %v2652_v51, %v6154_v19  ;;  %v9542_v48 = vld [vmem:[#allocation91_spill] sm:$0xff]  ;;  %v2363_v53 = vrot.slane %v2355_v54, %v6191_v52 }
 0x1c7   : > { %v7720_v6 = vpop.permute.xlu0 %1411  ;;  %v3044_v0 = vcombine.high %v9543_v12, %v9542_v48  ;;  %v2303_v38 = vcombine.low %v2259_v25, %v2291_v63  ;;  %v9546_v48 = vld [vmem:[#allocation96_spill] sm:$0xff]  ;;  %v9547_v12 = vld [vmem:[#allocation95_spill] sm:$0xff]  ;;  %v7780_v54 = vrot.slane %v3060_v50, %v6191_v52 }
 0x1c8   : > { %9533 = vst [vmem:[#allocation50_spill] sm:$0xff] %v7720_v6  ;;  %v2698_v59 = vrot.slane %v2684_v31, %v6154_v19  ;;  %v5512_v4 = vpack.i.bf16 %v2372_v58, %v2302_v57  ;;  %v2731_v51 = vcombine.low %v2666_v32, %v2682_v28  ;;  %v2732_v6 = vcombine.high %v2666_v32, %v2682_v28 }
 0x1c9   : > { %5493 = vrot.lane.b32.xlu0 %v5492_v13, %s5955_s21  ;;  %v7731_v61 = vpop.permute.xlu1 %2986  ;;  %v2578_v13 = vrot.slane %v2564_v18, %v6154_v19  ;;  %v3028_v18 = vcombine.high %v9541_v2, %v9540_v44  ;;  %v9544_v44 = vld [vmem:[#allocation94_spill] sm:$0xff]  ;;  %v9545_v2 = vld [vmem:[#allocation93_spill] sm:$0xff]  ;;  %v3058_v58 = vrot.slane %v3044_v0, %v6154_v19  ;;  %v2373_v32 = vcombine.high %v2363_v53, %v9398_v17 }
 0x1ca   : > { %v2716_v55 = vcombine.high %v9545_v2, %v9544_v44  ;;  %v2763_v5 = vcombine.low %v2698_v59, %v2714_v34  ;;  %v2764_v21 = vcombine.high %v2698_v59, %v2714_v34  ;;  %v2304_v44 = vcombine.high %v2259_v25, %v2291_v63 }
 0x1cb   : > { %v7754_v30 = vpop.permute.xlu0 %1435  ;;  %v2627_v7 = vcombine.low %v2562_v60, %v2578_v13  ;;  %v2628_v40 = vcombine.high %v2562_v60, %v2578_v13  ;;  %v3042_v57 = vrot.slane %v3028_v18, %v6154_v19  ;;  %v5522_v13 = vpack.i.bf16 %v2363_v53, %v2303_v38  ;;  %v9549_v38 = vld [vmem:[#allocation98_spill] sm:$0xff] }
 0x1cc   : > { %9537 = vst [vmem:[#allocation38_spill] sm:$0xff] %v7754_v30  ;;  %v2748_v30 = vcombine.high %v9547_v12, %v9546_v48  ;;  %v7787_v28 = vrot.slane %v3075_v56, %v6191_v52  ;;  %v2739_v18 = vrot.slane %v2731_v51, %v6191_v52  ;;  %v7797_v0 = vrot.slane %v2732_v6, %v6191_v52 }
 0x1cd   : > { %5503 = vrot.lane.b32.xlu0 %v5502_v14, %s5953_s18  ;;  %v7767_v31 = vpop.permute.xlu1 %2990  ;;  %v2626_v14 = vrot.slane %v2612_v27, %v6191_v52  ;;  %v2635_v59 = vrot.slane %v2627_v7, %v6191_v52  ;;  %v7791_v34 = vrot.slane %v2628_v40, %v6191_v52  ;;  %v2730_v27 = vrot.slane %v2716_v55, %v6191_v52 }
 0x1ce   : > { %v2762_v50 = vrot.slane %v2748_v30, %v6191_v52  ;;  %v2771_v25 = vrot.slane %v2763_v5, %v6191_v52  ;;  %v7801_v63 = vrot.slane %v2764_v21, %v6191_v52  ;;  %v3107_v53 = vcombine.low %v3042_v57, %v3058_v58 }
 0x1cf   : > { %v7774_v23 = vpop.permute.xlu0 %1459  ;;  %v2645_v55 = vcombine.low %v7524_v29, %v2626_v14  ;;  %v9551_v30 = vcombine.high %v7656_v43, %v7656_v43  ;;  %v5532_v6 = vpack.i.bf16 %v2373_v32, %v2304_v44  ;;  %v2306_v21 = vcombine.high %v7512_v49, %v7515_v37 }
 0x1d0   : > { %9548 = vst [vmem:[#allocation21_spill] sm:$0xff] %v7774_v23  ;;  %v2374_v7 = vcombine.high %v7555_v15, %v9398_v17  ;;  %v2646_v2 = vcombine.high %v7524_v29, %v2626_v14  ;;  %v2781_v12 = vcombine.low %v2730_v27, %v2762_v50  ;;  %v2782_v43 = vcombine.high %v2730_v27, %v2762_v50  ;;  %v9553_v15 = vld [vmem:[#allocation14_spill] sm:$0xff]  ;;  %v9554_v14 = vld [vmem:[#allocation27_spill] sm:$0xff] }
 0x1d1   : > { %5513 = vrot.lane.b32.xlu0 %v5512_v4, %s5954_s13  ;;  %v7783_v60 = vpop.permute.xlu1 %3938  ;;  %v9550_v4 = vld [vmem:[#allocation97_spill] sm:$0xff]  ;;  %v7812_v51 = vrot.slane %v9551_v30, %v6191_v52  ;;  %v2783_v30 = vcombine.low %v2739_v18, %v2771_v25  ;;  %v2649_v44 = vcombine.low %v7545_v46, %v7791_v34  ;;  %v2785_v49 = vcombine.low %v7797_v0, %v7801_v63 }
 0x1d2   : > { %v3092_v40 = vcombine.high %v9550_v4, %v9549_v38  ;;  %v2647_v38 = vcombine.low %v7527_v36, %v2635_v59  ;;  %v3108_v4 = vcombine.high %v3042_v57, %v3058_v58  ;;  %v7835_v29 = vrot.slane %v3107_v53, %v6191_v52 }
 0x1d3   : > { %v7803_v56 = vpop.permute.xlu0 %2976  ;;  %v3131_v32 = vcombine.low %v9554_v14, %v9553_v15  ;;  %v2648_v57 = vcombine.high %v7527_v36, %v2635_v59  ;;  %v3132_v58 = vcombine.high %v9554_v14, %v9553_v15  ;;  %v5542_v50 = vpack.i.bf16 %v2374_v7, %v2306_v21  ;;  %v9556_v15 = vld [vmem:[#allocation28_spill] sm:$0xff]  ;;  %v9557_v14 = vld [vmem:[#allocation29_spill] sm:$0xff] }
 0x1d4   : > { %v3147_v48 = vcombine.low %v7419_v3, %v7803_v56  ;;  %v7832_v37 = vrot.slane %v3092_v40, %v6191_v52  ;;  %v2784_v23 = vcombine.high %v2739_v18, %v2771_v25  ;;  %v2650_v40 = vcombine.high %v7545_v46, %v7791_v34 }
 0x1d5   : > { %5523 = vrot.lane.b32.xlu0 %v5522_v13, %s5955_s21  ;;  %v7815_v5 = vpop.permute.xlu1 %3942  ;;  %v3163_v53 = vcombine.low %v7575_v45, %v7616_v62  ;;  %v5552_v26 = vpack.i.bf16 %v2781_v12, %v2645_v55  ;;  %v7851_v36 = vrot.slane %v3108_v4, %v6191_v52  ;;  %v7857_v18 = vpack.i.bf16 %v2785_v49, %v2649_v44 }
 0x1d6   : > { %9552 = vst [vmem:[#allocation40_spill] sm:$0xff] %v7815_v5  ;;  %v3155_v8 = vrot.slane %v3147_v48, %v6154_v19  ;;  %v5562_v5 = vpack.i.bf16 %v2782_v43, %v2646_v2  ;;  %v3139_v46 = vrot.slane %v3131_v32, %v6154_v19  ;;  %v7866_v21 = vrot.slane %v3132_v58, %v6154_v19 }
 0x1d7   : > { %v7825_v13 = vpop.permute.xlu0 %2980  ;;  %v7873_v48 = vpack.i.bf16 %v2784_v23, %v2648_v57  ;;  %v2786_v12 = vcombine.high %v7797_v0, %v7801_v63  ;;  %v3171_v43 = vrot.slane %v3163_v53, %v6154_v19  ;;  %v9560_v23 = vcombine.low %v7605_v9, %v7566_v33 }
 0x1d8   : > { %v9562_v0 = vcombine.low %v7630_v16, %v7596_v11  ;;  %v9564_v57 = vcombine.low %v7661_v20, %v7602_v10 }
 0x1d9   : > { %v7842_v27 = vpop.permute.xlu1 %3946  ;;  %5533 = vrot.lane.b32.xlu0 %v5532_v6, %s5956_s22  ;;  %v7855_v6 = vpack.i.bf16 %v2783_v30, %v2647_v38  ;;  %v3195_v38 = vcombine.low %v3139_v46, %v3155_v8  ;;  %v9558_v30 = vcombine.low %v7503_v41, %v7503_v41  ;;  %v7891_v32 = vrot.slane %v9560_v23, %v6191_v52 }
 0x1da   : > { %9555 = vst [vmem:[#allocation24_spill] sm:$0xff] %v7842_v27  ;;  %v3124_v27 = vcombine.high %v9557_v14, %v9556_v15  ;;  %v7897_v63 = vrot.slane %v9562_v0, %v6191_v52  ;;  %v7903_v58 = vrot.slane %v9564_v57, %v6191_v52  ;;  %v7941_v57 = vpack.i.bf16 %v2786_v12, %v2650_v40  ;;  %v9591_v14 = vld [vmem:[#allocation64_spill] sm:$0xff] }
 0x1db   : > { %v2985_v59 = vpop.permute.xlu0 %2984  ;;  %v7883_v44 = vrot.slane %v9558_v30, %v6191_v52  ;;  %9561 = vst [vmem:[#allocation44_spill] sm:$0xff] %v7891_v32 }
 0x1dc   : > { %v3179_v34 = vcombine.low %v7825_v13, %v2985_v59  ;;  %9563 = vst [vmem:[#allocation41_spill] sm:$0xff] %v7897_v63  ;;  %9565 = vst [vmem:[#allocation42_spill] sm:$0xff] %v7903_v58  ;;  %v3180_v40 = vcombine.high %v7825_v13, %v2985_v59  ;;  %v9577_v13 = vcombine.low %v7506_v22, %v7506_v22 }
 0x1dd   : > { %v7868_v7 = vpop.permute.xlu1 %3950  ;;  %5543 = vrot.lane.b32.xlu0 %v5542_v50, %s5958_s20  ;;  %9559 = vst [vmem:[#allocation46_spill] sm:$0xff] %v7883_v44  ;;  %v9566_v50 = vcombine.low %v7723_v24, %v7621_v35  ;;  %9574 = vst [vmem:[#allocation60_spill] sm:$0xff] %v7941_v57 }
 0x1de   : > { %v3187_v4 = vrot.slane %v3179_v34, %v6154_v19  ;;  %v3196_v34 = vcombine.high %v3139_v46, %v3155_v8  ;;  %v9570_v46 = vcombine.high %v7605_v9, %v7566_v33  ;;  %v3758_v33 = vcombine.high %v7897_v63, %v7903_v58  ;;  %v9595_v63 = vld [vmem:[#allocation58_spill] sm:$0xff] }
 0x1df   : > { %v7885_v49 = vpop.permute.xlu0 %2508  ;;  %v7909_v53 = vrot.slane %v9566_v50, %v6191_v52  ;;  %v9568_v50 = vcombine.high %v7503_v41, %v7503_v41  ;;  %v7978_v59 = vrot.slane %v9577_v13, %v6191_v52 }
 0x1e0   : > { %v3227_v30 = vcombine.low %v3171_v43, %v3187_v4  ;;  %v3228_v23 = vcombine.high %v3171_v43, %v3187_v4  ;;  %v7930_v43 = vrot.slane %v9570_v46, %v6191_v52  ;;  %v9576_v46 = vcombine.high %v7661_v20, %v7602_v10 }
 0x1e1   : > { %9567 = vst [vmem:[#allocation56_spill] sm:$0xff] %v7909_v53  ;;  %v7913_v0 = vpop.permute.xlu1 %3954  ;;  %5553 = vrot.lane.b32.xlu0 %v5552_v26, %s5953_s18  ;;  %v7924_v8 = vrot.slane %v9568_v50, %v6191_v52  ;;  %v7933_v26 = vrot.slane %v3195_v38, %v6191_v52  ;;  %v3829_v9 = vcombine.high %v7909_v53, %v9398_v17  ;;  %9578 = vst [vmem:[#allocation33_spill] sm:$0xff] %v7978_v59 }
 0x1e2   : > { %9571 = vst [vmem:[#allocation55_spill] sm:$0xff] %v7930_v43  ;;  %v7936_v4 = vrot.slane %v3227_v30, %v6191_v52  ;;  %v7939_v55 = vrot.slane %v3228_v23, %v6191_v52  ;;  %v9575_v38 = vcombine.high %v7630_v16, %v7596_v11  ;;  %v7956_v23 = vrot.slane %v3196_v34, %v6191_v52 }
 0x1e3   : > { %9569 = vst [vmem:[#allocation54_spill] sm:$0xff] %v7924_v8  ;;  %9572 = vst [vmem:[#allocation53_spill] sm:$0xff] %v7933_v26  ;;  %v7943_v41 = vpop.permute.xlu0 %2512  ;;  %v3740_v50 = vrot.slane %v9576_v46, %v6191_v52  ;;  %v3798_v16 = vcombine.high %v7723_v24, %v7621_v35  ;;  %v3164_v10 = vcombine.high %v7575_v45, %v7616_v62 }
 0x1e4   : > { %9573 = vst [vmem:[#allocation59_spill] sm:$0xff] %v7936_v4  ;;  %v3708_v30 = vrot.slane %v9575_v38, %v6191_v52  ;;  %v3260_v12 = vcombine.high %v7933_v26, %v7936_v4  ;;  %v2803_v2 = vcombine.low %v7885_v49, %v7943_v41  ;;  %v3148_v20 = vcombine.high %v7419_v3, %v7803_v56 }
 0x1e5   : > { %v7967_v25 = vpop.permute.xlu1 %3958  ;;  %5563 = vrot.lane.b32.xlu0 %v5562_v5, %s5954_s13  ;;  %v3261_v5 = vcombine.low %v7956_v23, %v7939_v55  ;;  %v2787_v38 = vcombine.low %v7664_v47, %v7703_v1  ;;  %v9579_v24 = vcombine.low %v7627_v39, %v7569_v42  ;;  %v9581_v45 = vcombine.high %v7506_v22, %v7506_v22 }
 0x1e6   : > { %v5557_v34 = vpack.i.bf16 %v3260_v12, %v3124_v27  ;;  %v9583_v62 = vcombine.high %v7627_v39, %v7569_v42  ;;  %v8009_v27 = vrot.slane %v3180_v40, %v6154_v19  ;;  %v8012_v12 = vpack.i.bf16 %v3758_v33, %v3829_v9 }
 0x1e7   : > { %v7988_v35 = vpop.permute.xlu0 %2988  ;;  %v7994_v46 = vrot.slane %v9579_v24, %v6191_v52  ;;  %v8000_v3 = vrot.slane %v9581_v45, %v6191_v52  ;;  %v3759_v13 = vcombine.low %v3708_v30, %v3740_v50  ;;  %v2811_v22 = vrot.slane %v2803_v2, %v6154_v19 }
 0x1e8   : > { %v8006_v56 = vrot.slane %v9583_v62, %v6191_v52  ;;  %5558 = vrot.lane.b32.xlu1 %v5557_v34, %s5952_s3  ;;  %9585 = vst [vmem:[#allocation16_spill] sm:$0xff] %v8012_v12  ;;  %v3812_v11 = vrot.slane %v3798_v16, %v6191_v52  ;;  %v3760_v42 = vcombine.high %v3708_v30, %v3740_v50  ;;  %v9587_v62 = vld [vmem:[#allocation25_spill] sm:$0xff] }
 0x1e9   : > { %9580 = vst [vmem:[#allocation45_spill] sm:$0xff] %v7994_v46  ;;  %9582 = vst [vmem:[#allocation61_spill] sm:$0xff] %v8000_v3  ;;  %v8017_v45 = vpop.permute.xlu1 %3962  ;;  %v8023_v40 = vrot.slane %v3164_v10, %v6154_v19  ;;  %v3267_v33 = vcombine.low %v7731_v61, %v7767_v31  ;;  %v8028_v9 = vrot.slane %v3148_v20, %v6154_v19  ;;  %v5446_v24 = vunpack.i.h.bf16 %v9587_v62  ;;  %v9592_v46 = vld [vmem:[#allocation63_spill] sm:$0xff] }
 0x1ea   : > { %9584 = vst [vmem:[#allocation73_spill] sm:$0xff] %v8006_v56  ;;  %v9586_v2 = vcombine.low %v7780_v54, %v7832_v37  ;;  %v5445_v50 = vunpack.i.l.bf16 %v9587_v62  ;;  %v2795_v30 = vrot.slane %v2787_v38, %v6154_v19  ;;  %v3830_v10 = vcombine.high %v3812_v11, %v9398_v17  ;;  %v9594_v38 = vld [vmem:[#allocation57_spill] sm:$0xff]  ;;  %v9598_v3 = vld [vmem:[#allocation19_spill] sm:$0xff] }
 0x1eb   : > { %v2993_v16 = vpop.permute.xlu0 %2992  ;;  %v3243_v39 = vcombine.low %v8023_v40, %v8009_v27  ;;  %v3211_v20 = vcombine.low %v7866_v21, %v8028_v9  ;;  %v9593_v59 = vcombine.low %v9591_v14, %v9592_v46  ;;  %v9596_v4 = vcombine.low %v9594_v38, %v9595_v63  ;;  %v9607_v38 = vld [vmem:[#allocation15_spill] sm:$0xff] }
 0x1ec   : > { %v5567_v34 = vpack.i.bf16 %v3261_v5, %v9586_v2  ;;  %v3283_v53 = vcombine.low %v7988_v35, %v2993_v16  ;;  %v2819_v2 = vcombine.low %v2795_v30, %v2811_v22  ;;  %v8057_v5 = vpack.i.bf16 %v3759_v13, %v3812_v11 }
 0x1ed   : > { %v8045_v62 = vpop.permute.xlu1 %3966  ;;  %v1945_v58 = vsel %vm960_vm13, %v9593_v59, %v5446_v24  ;;  %v1944_v12 = vsel %vm960_vm13, %v9596_v4, %v5445_v50  ;;  %v2820_v26 = vcombine.high %v2795_v30, %v2811_v22  ;;  %v5451_v43 = vunpack.i.h.bf16 %v9598_v3  ;;  %v9601_v22 = vld [vmem:[#allocation40_spill] sm:$0xff]  ;;  %v9603_v30 = vld [vmem:[#allocation17_spill] sm:$0xff] }
 0x1ee   : > { %5568 = vrot.lane.b32.xlu1 %v5567_v34, %s5953_s18  ;;  %v3275_v34 = vrot.slane %v3267_v33, %v6154_v19  ;;  %v3291_v15 = vrot.slane %v3283_v53, %v6154_v19  ;;  %9590 = vst [vmem:[#allocation37_spill] sm:$0xff] %v8057_v5  ;;  %v8069_v33 = vpack.i.bf16 %v3760_v42, %v3830_v10  ;;  %v9610_v5 = vld [vmem:[#allocation20_spill] sm:$0xff] }
 0x1ef   : > { %v8067_v56 = vpop.permute.xlu0 %3940  ;;  %v8073_v53 = vrot.slane %v3243_v39, %v6191_v52  ;;  %v3268_v14 = vcombine.high %v7731_v61, %v7767_v31  ;;  %v3989_v63 = vcombine.low %v7783_v60, %v7783_v60  ;;  %v8082_v4 = vrot.slane %v2819_v2, %v6191_v52 }
 0x1f0   : > { %9597 = vst [vmem:[#allocation48_spill] sm:$0xff] %v8069_v33  ;;  %v3299_v11 = vcombine.low %v3275_v34, %v3291_v15  ;;  %v3300_v13 = vcombine.high %v3275_v34, %v3291_v15  ;;  %v3284_v59 = vcombine.high %v7988_v35, %v2993_v16  ;;  %v8088_v24 = vrot.slane %v3211_v20, %v6191_v52  ;;  %v9600_v15 = vld [vmem:[#allocation24_spill] sm:$0xff]  ;;  %v9604_v16 = vld [vmem:[#allocation30_spill] sm:$0xff] }
 0x1f1   : > { %9599 = vst [vmem:[#allocation69_spill] sm:$0xff] %v8082_v4  ;;  %v8085_v46 = vpop.permute.xlu1 %3970  ;;  %v4021_v42 = vcombine.low %v9601_v22, %v9600_v15  ;;  %v5450_v31 = vunpack.i.l.bf16 %v9598_v3  ;;  %v2804_v39 = vcombine.high %v7885_v49, %v7943_v41  ;;  %v8104_v50 = vrot.slane %v2820_v26, %v6191_v52  ;;  %v9606_v41 = vld [vmem:[#allocation52_spill] sm:$0xff] }
 0x1f2   : > { %5578 = vrot.lane.b32.xlu1 %v7855_v6, %s5955_s21  ;;  %v8093_v6 = vrot.slane %v3299_v11, %v6191_v52  ;;  %v8096_v61 = vrot.slane %v3300_v13, %v6191_v52  ;;  %v9605_v10 = vcombine.low %v9603_v30, %v9604_v16  ;;  %v2788_v2 = vcombine.high %v7664_v47, %v7703_v1 }
 0x1f3   : > { %v8101_v35 = vpop.permute.xlu0 %3944  ;;  %v3263_v49 = vcombine.low %v8088_v24, %v8073_v53  ;;  %v9608_v26 = vcombine.low %v9606_v41, %v9607_v38  ;;  %v8125_v11 = vrot.slane %v3284_v59, %v6154_v19  ;;  %v2851_v1 = vcombine.high %v8082_v4, %v9398_v17 }
 0x1f4   : > { %9602 = vst [vmem:[#allocation66_spill] sm:$0xff] %v8093_v6  ;;  %v8110_v20 = vrot.slane %v9605_v10, %v6191_v52  ;;  %v4005_v3 = vcombine.low %v8067_v56, %v8101_v35  ;;  %v5587_v47 = vpack.i.bf16 %v8096_v61, %v8104_v50  ;;  %v3331_v10 = vcombine.high %v8093_v6, %v9398_v17 }
 0x1f5   : > { %v8122_v34 = vrot.slane %v9608_v26, %v6191_v52  ;;  %v8127_v13 = vpop.permute.xlu1 %4420  ;;  %v8136_v33 = vrot.slane %v3268_v14, %v6154_v19  ;;  %v8139_v26 = vrot.slane %v3989_v63, %v6154_v19  ;;  %v8142_v59 = vrot.slane %v4021_v42, %v6154_v19 }
 0x1f6   : > { %9609 = vst [vmem:[#allocation65_spill] sm:$0xff] %v8127_v13  ;;  %v9611_v13 = vld [vmem:[#allocation32_spill] sm:$0xff]  ;;  %v8149_v44 = vrot.slane %v2804_v39, %v6154_v19  ;;  %v8152_v4 = vrot.slane %v4005_v3, %v6154_v19  ;;  %5588 = vrot.lane.b32.xlu1 %v5587_v47, %s5953_s18  ;;  %v5572_v63 = vpack.i.bf16 %v3331_v10, %v2851_v1 }
 0x1f7   : > { %v9612_v8 = vcombine.low %v9610_v5, %v9611_v13  ;;  %v8155_v14 = vpop.permute.xlu0 %3948  ;;  %v3262_v42 = vcombine.high %v7956_v23, %v7939_v55  ;;  %v1947_v6 = vsel %vm964_vm14, %v1944_v12, %v5450_v31  ;;  %v9615_v39 = vcombine.high %v9606_v41, %v9607_v38  ;;  %v9622_v41 = vld [vmem:[#allocation51_spill] sm:$0xff] }
 0x1f8   : > { %9613 = vst [vmem:[#allocation87_spill] sm:$0xff] %v8155_v14  ;;  %v3814_v47 = vcombine.high %v9610_v5, %v9611_v13  ;;  %v8175_v1 = vrot.slane %v2788_v2, %v6154_v19  ;;  %v3244_v55 = vcombine.high %v8023_v40, %v8009_v27  ;;  %v3315_v23 = vcombine.low %v8136_v33, %v8125_v11  ;;  %v9618_v5 = vld [vmem:[#allocation43_spill] sm:$0xff] }
 0x1f9   : > { %v3821_v32 = vrot.slane %v9612_v8, %v6191_v52  ;;  %v9614_v8 = vcombine.high %v9603_v30, %v9604_v16  ;;  %v8170_v3 = vrot.slane %v9615_v39, %v6191_v52  ;;  %5573 = vrot.lane.b32.xlu0 %v5572_v63, %s5952_s3  ;;  %v8182_v12 = vpop.permute.xlu1 %4424  ;;  %v9617_v31 = vcombine.low %v7787_v28, %v7835_v29 }
 0x1fa   : > { %9616 = vst [vmem:[#allocation92_spill] sm:$0xff] %v8182_v12  ;;  %v1948_v16 = vsel %vm964_vm14, %v1945_v58, %v5451_v43  ;;  %v4037_v27 = vcombine.low %v8139_v26, %v8139_v26  ;;  %v3212_v40 = vcombine.high %v7866_v21, %v8028_v9  ;;  %v2835_v38 = vcombine.low %v8175_v1, %v8149_v44  ;;  %v9627_v12 = vld [vmem:[#allocation50_spill] sm:$0xff] }
 0x1fb   : > { %v8164_v57 = vrot.slane %v9614_v8, %v6191_v52  ;;  %v5597_v30 = vpack.i.bf16 %v3263_v49, %v9617_v31  ;;  %v4069_v13 = vcombine.low %v8152_v4, %v8142_v59  ;;  %v8199_v49 = vpop.permute.xlu0 %3952  ;;  %v9619_v58 = vcombine.high %v7780_v54, %v7832_v37  ;;  %v9621_v31 = vld [vmem:[#allocation22_spill] sm:$0xff] }
 0x1fc   : > { %v4125_v10 = vcombine.low %v7868_v7, %v7913_v0  ;;  %v4109_v21 = vcombine.low %v8155_v14, %v8199_v49  ;;  %v3762_v9 = vcombine.high %v8110_v20, %v8122_v34  ;;  %v3831_v63 = vcombine.high %v3821_v32, %v9398_v17 }
 0x1fd   : > { %5598 = vrot.lane.b32.xlu1 %v5597_v30, %s5955_s21  ;;  %v5582_v43 = vpack.i.bf16 %v3262_v42, %v9619_v58  ;;  %v8212_v8 = vrot.slane %v3244_v55, %v6191_v52  ;;  %v8215_v39 = vpop.permute.xlu1 %4428  ;;  %v8218_v54 = vrot.slane %v3315_v23, %v6191_v52  ;;  %v3761_v37 = vcombine.low %v8110_v20, %v8122_v34  ;;  %v9623_v55 = vld [vmem:[#allocation86_spill] sm:$0xff] }
 0x1fe   : > { %9620 = vst [vmem:[#allocation62_spill] sm:$0xff] %v8215_v39  ;;  %v5456_v30 = vunpack.i.h.bf16 %v9621_v31  ;;  %v5455_v58 = vunpack.i.l.bf16 %v9621_v31  ;;  %v1466_v2 = vsel %vm960_vm13, %v9623_v55, %v9622_v41  ;;  %v3226_v23 = vrot.slane %v3212_v40, %v6191_v52  ;;  %v9626_v42 = vld [vmem:[#allocation26_spill] sm:$0xff] }
 0x1ff   : > { %5583 = vrot.lane.b32.xlu0 %v5582_v43, %s5954_s13  ;;  %v8230_v43 = vrot.slane %v4037_v27, %v6191_v52  ;;  %v8234_v39 = vrot.slane %v4069_v13, %v6191_v52  ;;  %v8238_v20 = vpop.permute.xlu0 %3956  ;;  %v8241_v34 = vrot.slane %v2835_v38, %v6191_v52  ;;  %v3332_v31 = vcombine.high %v8096_v61, %v9398_v17 }
 0x200   : > { %v8246_v41 = vrot.slane %v4125_v10, %v6154_v19  ;;  %v4157_v27 = vcombine.low %v7967_v25, %v8017_v45  ;;  %v8251_v40 = vrot.slane %v4109_v21, %v6154_v19  ;;  %v8254_v13 = vrot.slane %v3814_v47, %v6191_v52 }
 0x201   : > { %9624 = vst [vmem:[#allocation71_spill] sm:$0xff] %v8234_v39  ;;  %5608 = vrot.lane.b32.xlu1 %v7857_v18, %s5957_s12  ;;  %v8258_v18 = vpop.permute.xlu1 %4432  ;;  %v5617_v61 = vpack.i.bf16 %v8218_v54, %v8241_v34  ;;  %v2852_v38 = vcombine.high %v8104_v50, %v9398_v17  ;;  %v3265_v10 = vcombine.low %v3226_v23, %v8212_v8 }
 0x202   : > { %9625 = vst [vmem:[#allocation67_spill] sm:$0xff] %v8258_v18  ;;  %v8265_v55 = vpack.i.bf16 %v3762_v9, %v3831_v63  ;;  %v8268_v21 = vsel %vm968_vm15, %v1947_v6, %v5455_v58  ;;  %v8271_v47 = vsel %vm968_vm15, %v1948_v16, %v5456_v30  ;;  %v8275_v18 = vpack.i.bf16 %v3761_v37, %v3821_v32  ;;  %v9628_v63 = vld [vmem:[#allocation47_spill] sm:$0xff] }
 0x203   : > { %5593 = vrot.lane.b32.xlu0 %v7873_v48, %s5956_s22  ;;  %v1469_v48 = vsel %vm964_vm14, %v1466_v2, %v9626_v42  ;;  %v8280_v50 = vpop.permute.xlu0 %3960  ;;  %v5602_v9 = vpack.i.bf16 %v3332_v31, %v2852_v38  ;;  %v3264_v6 = vcombine.high %v8088_v24, %v8073_v53  ;;  %v5466_v30 = vunpack.i.h.bf16 %v9628_v63 }
 0x204   : > { %v1472_v14 = vsel %vm968_vm15, %v1469_v48, %v9627_v12  ;;  %v8288_v2 = vrot.slane %v4157_v27, %v6154_v19  ;;  %v4173_v32 = vcombine.low %v8251_v40, %v8246_v41  ;;  %v4141_v12 = vcombine.low %v8238_v20, %v8280_v50 }
 0x205   : > { %5618 = vrot.lane.b32.xlu1 %v5617_v61, %s5955_s21  ;;  %v4038_v37 = vcombine.high %v8139_v26, %v8139_v26  ;;  %v4070_v53 = vcombine.high %v8152_v4, %v8142_v59  ;;  %v8299_v24 = vpop.permute.xlu1 %4436  ;;  %v9629_v42 = vcombine.low %v7812_v51, %v7851_v36  ;;  %v3266_v31 = vcombine.high %v3226_v23, %v8212_v8  ;;  %v9630_v61 = vld [vmem:[#allocation13_spill] sm:$0xff]  ;;  %v9631_v59 = vld [vmem:[#allocation38_spill] sm:$0xff] }
 0x206   : > { %v5465_v27 = vunpack.i.l.bf16 %v9628_v63  ;;  %v1475_v38 = vsel %vm972_vm0, %v1472_v14, %v9630_v61  ;;  %v3990_v26 = vcombine.high %v7783_v60, %v7783_v60  ;;  %v8311_v4 = vrot.slane %v4141_v12, %v6154_v19  ;;  %v9634_v12 = vld [vmem:[#allocation70_spill] sm:$0xff] }
 0x207   : > { %5603 = vrot.lane.b32.xlu0 %v5602_v9, %s5954_s13  ;;  %v5627_v58 = vpack.i.bf16 %v3265_v10, %v9629_v42  ;;  %v1478_v48 = vsel %vm976_vm1, %v1475_v38, %v9631_v59  ;;  %v4022_v9 = vcombine.high %v9601_v22, %v9600_v15  ;;  %v4006_v8 = vcombine.high %v8067_v56, %v8101_v35  ;;  %v8320_v23 = vpop.permute.xlu0 %3964  ;;  %v9636_v59 = vld [vmem:[#allocation21_spill] sm:$0xff] }
 0x208   : > { %v9632_v14 = vcombine.high %v7787_v28, %v7835_v29  ;;  %v8326_v10 = vrot.slane %v4173_v32, %v6191_v52  ;;  %v4205_v63 = vcombine.low %v8311_v4, %v8288_v2  ;;  %v3764_v15 = vcombine.high %v8164_v57, %v8170_v3 }
 0x209   : > { %5628 = vrot.lane.b32.xlu1 %v5627_v58, %s5957_s12  ;;  %v3832_v56 = vcombine.high %v8254_v13, %v9398_v17  ;;  %v8335_v22 = vrot.slane %v4038_v37, %v6191_v52  ;;  %v8338_v35 = vrot.slane %v4070_v53, %v6191_v52  ;;  %v8341_v28 = vpop.permute.xlu1 %4440  ;;  %v9633_v29 = vcombine.high %v7812_v51, %v7851_v36  ;;  %v9635_v58 = vld [vmem:[#allocation36_spill] sm:$0xff] }
 0x20a   : > { %v5612_v60 = vpack.i.bf16 %v3264_v6, %v9632_v14  ;;  %v4102_v32 = vcombine.high %v8230_v43, %v8234_v39  ;;  %v1946_v42 = vsel %vm960_vm13, %v9634_v12, %v5465_v27  ;;  %v1481_v37 = vsel %vm980_vm2, %v1478_v48, %v9635_v58  ;;  %v9642_v12 = vld [vmem:[#allocation35_spill] sm:$0xff] }
 0x20b   : > { %v5637_v6 = vpack.i.bf16 %v3266_v31, %v9633_v29  ;;  %v4004_v53 = vrot.slane %v3990_v26, %v6154_v19  ;;  %v8354_v61 = vrot.slane %v4205_v63, %v6191_v52  ;;  %v4036_v38 = vrot.slane %v4022_v9, %v6154_v19  ;;  %v8361_v31 = vpop.permute.xlu0 %3968 }
 0x20c   : > { %5613 = vrot.lane.b32.xlu0 %v5612_v60, %s5956_s22  ;;  %v3316_v51 = vcombine.high %v8136_v33, %v8125_v11  ;;  %v4020_v36 = vrot.slane %v4006_v8, %v6154_v19  ;;  %v3333_v27 = vcombine.high %v8218_v54, %v9398_v17  ;;  %v1484_v26 = vsel %vm984_vm3, %v1481_v37, %v9636_v59  ;;  %v9637_v8 = vld [vmem:[#allocation60_spill] sm:$0xff]  ;;  %v9638_v54 = vld [vmem:[#allocation46_spill] sm:$0xff] }
 0x20d   : > { %5638 = vrot.lane.b32.xlu1 %v5637_v6, %s5958_s20  ;;  %v2836_v48 = vcombine.high %v8175_v1, %v8149_v44  ;;  %v4261_v9 = vcombine.low %v8045_v62, %v8085_v46  ;;  %v4245_v11 = vcombine.low %v8320_v23, %v8361_v31  ;;  %v8377_v14 = vpop.permute.xlu1 %4444  ;;  %v9639_v60 = vld [vmem:[#allocation44_spill] sm:$0xff]  ;;  %v2853_v44 = vcombine.high %v8241_v34, %v9398_v17  ;;  %v9641_v6 = vld [vmem:[#allocation34_spill] sm:$0xff] }
 0x20e   : > { %v9640_v63 = vcombine.high %v9638_v54, %v9639_v60  ;;  %v4103_v1 = vcombine.low %v8335_v22, %v8338_v35  ;;  %v9643_v58 = vcombine.low %v9641_v6, %v9642_v12  ;;  %v4053_v59 = vcombine.low %v4004_v53, %v4004_v53 }
 0x20f   : > { %v8396_v16 = vpack.i.bf16 %v3764_v15, %v3832_v56  ;;  %v8399_v34 = vpop.permute.xlu0 %4418  ;;  %v3330_v39 = vrot.slane %v3316_v51, %v6191_v52  ;;  %v9645_v6 = vunpack.i.l.bf16 %v9618_v5  ;;  %v4905_v12 = vrot.slane %v1484_v26, 4 }
 0x210   : > { %5623 = vrot.lane.b32.xlu0 %v9637_v8, %s5958_s20  ;;  %v5647_v29 = vpack.i.bf16 %v4102_v32, %v9640_v63  ;;  %v2459_v37 = vsel %vm960_vm13, %v9643_v58, %v5466_v30  ;;  %v9644_v8 = vcombine.low %v8164_v57, %v8170_v3  ;;  %v4085_v32 = vcombine.low %v4020_v36, %v4036_v38 }
 0x211   : > { %v5632_v63 = vpack.i.bf16 %v3333_v27, %v2853_v44  ;;  %v8405_v30 = vsel %vm964_vm14, %v1946_v42, %v9645_v6  ;;  %v4054_v58 = vcombine.high %v4004_v53, %v4004_v53  ;;  %v8408_v57 = vrot.slane %v4261_v9, %v6154_v19  ;;  %v8417_v51 = vpop.permute.xlu1 %4448  ;;  %v9646_v42 = vld [vmem:[#allocation54_spill] sm:$0xff]  ;;  %v9647_v27 = vld [vmem:[#allocation55_spill] sm:$0xff] }
 0x212   : > { %v8394_v33 = vpack.i.bf16 %v9644_v8, %v8254_v13  ;;  %5648 = vrot.lane.b32.xlu1 %v5647_v29, %s5952_s3  ;;  %v2850_v3 = vrot.slane %v2836_v48, %v6191_v52  ;;  %v4086_v13 = vcombine.high %v4020_v36, %v4036_v38  ;;  %v8412_v15 = vrot.slane %v4245_v11, %v6154_v19  ;;  %v9650_v44 = vld [vmem:[#allocation87_spill] sm:$0xff] }
 0x213   : > { %v4469_v56 = vcombine.low %v8399_v34, %v8399_v34  ;;  %v9648_v26 = vcombine.low %v9646_v42, %v9647_v27  ;;  %v4061_v9 = vrot.slane %v4053_v59, %v6191_v52  ;;  %v4126_v48 = vcombine.high %v7868_v7, %v7913_v0 }
 0x214   : > { %5633 = vrot.lane.b32.xlu0 %v5632_v63, %s5956_s22  ;;  %v4158_v38 = vcombine.high %v7967_v25, %v8017_v45  ;;  %v9649_v36 = vunpack.i.h.bf16 %v9618_v5  ;;  %v4093_v29 = vrot.slane %v4085_v32, %v6191_v52  ;;  %v4110_v8 = vcombine.high %v9650_v44, %v8199_v49  ;;  %v9651_v25 = vld [vmem:[#allocation92_spill] sm:$0xff]  ;;  %v9652_v45 = vld [vmem:[#allocation65_spill] sm:$0xff]  ;;  %v9653_v32 = vld [vmem:[#allocation23_spill] sm:$0xff] }
 0x215   : > { %v5657_v53 = vpack.i.bf16 %v4103_v1, %v9648_v26  ;;  %v8436_v1 = vpop.permute.xlu0 %4422  ;;  %v5642_v59 = vpack.i.bf16 %v3330_v39, %v2850_v3  ;;  %v3334_v7 = vcombine.high %v3330_v39, %v9398_v17  ;;  %v8440_v0 = vrot.slane %v4054_v58, %v6191_v52  ;;  %v8460_v58 = vpop.permute.xlu1 %5468 }
 0x216   : > { %v8430_v11 = vsel %vm964_vm14, %v2459_v37, %v9649_v36  ;;  %v4485_v5 = vcombine.low %v9652_v45, %v9651_v25  ;;  %v8445_v37 = vrot.slane %v4469_v56, %v6154_v19  ;;  %v9654_v63 = vrot.slane %v9653_v32, 4  ;;  %v9655_v36 = vld [vmem:[#allocation16_spill] sm:$0xff] }
 0x217   : > { %5658 = vrot.lane.b32.xlu1 %v5657_v53, %s5953_s18  ;;  %v4262_v6 = vcombine.high %v8045_v62, %v8085_v46  ;;  %v8455_v26 = vrot.slane %v4086_v13, %v6191_v52  ;;  %v4277_v39 = vcombine.low %v8412_v15, %v8408_v57  ;;  %v2854_v56 = vcombine.high %v2850_v3, %v9398_v17 }
 0x218   : > { %v8450_v49 = vsel %vm4901_vm5, %v9654_v63, %v4905_v12  ;;  %5643 = vrot.lane.b32.xlu0 %v5642_v59, %s5957_s12  ;;  %v4140_v53 = vrot.slane %v4126_v48, %v6154_v19  ;;  %v8465_v12 = vrot.slane %v4158_v38, %v6154_v19  ;;  %v4486_v62 = vcombine.high %v9652_v45, %v9651_v25  ;;  %v9656_v63 = vld [vmem:[#allocation37_spill] sm:$0xff] }
 0x219   : > { %v4142_v46 = vcombine.high %v8238_v20, %v8280_v50  ;;  %v4124_v13 = vrot.slane %v4110_v8, %v6154_v19  ;;  %v8474_v44 = vpop.permute.xlu0 %4426  ;;  %v5652_v59 = vpack.i.bf16 %v3334_v7, %v2854_v56  ;;  %v4104_v3 = vcombine.high %v8335_v22, %v8338_v35  ;;  %v9659_v56 = vld [vmem:[#allocation45_spill] sm:$0xff] }
 0x21a   : > { %v4105_v48 = vcombine.low %v4061_v9, %v4093_v29  ;;  %v8479_v38 = vrot.slane %v4485_v5, %v6154_v19  ;;  %v4517_v25 = vcombine.low %v8445_v37, %v8445_v37  ;;  %v4501_v20 = vcombine.low %v8436_v1, %v8474_v44 }
 0x21b   : > { %5668 = vrot.lane.b32.xlu1 %v9655_v36, %s5952_s3  ;;  %v4106_v50 = vcombine.high %v4061_v9, %v4093_v29  ;;  %v8486_v8 = vrot.slane %v4262_v6, %v6154_v19  ;;  %v4246_v7 = vcombine.high %v8320_v23, %v8361_v31  ;;  %v8491_v45 = vrot.slane %v4277_v39, %v6191_v52  ;;  %v8505_v23 = vpop.permute.xlu1 %5478 }
 0x21c   : > { %5653 = vrot.lane.b32.xlu0 %v5652_v59, %s5958_s20  ;;  %v4108_v22 = vcombine.high %v8440_v0, %v8455_v26  ;;  %v8497_v35 = vrot.slane %v4486_v62, %v6154_v19  ;;  %v4174_v9 = vcombine.high %v8251_v40, %v8246_v41  ;;  %v4156_v29 = vrot.slane %v4142_v46, %v6154_v19  ;;  %v9658_v40 = vld [vmem:[#allocation33_spill] sm:$0xff] }
 0x21d   : > { %v8503_v5 = vrot.slane %v4501_v20, %v6154_v19  ;;  %v4189_v31 = vcombine.low %v4124_v13, %v4140_v53  ;;  %v4206_v32 = vcombine.high %v8311_v4, %v8288_v2  ;;  %v8511_v6 = vpop.permute.xlu0 %4430  ;;  %v9657_v39 = vcombine.high %v9646_v42, %v9647_v27  ;;  %v9662_v27 = vld [vmem:[#allocation61_spill] sm:$0xff] }
 0x21e   : > { %v9660_v62 = vcombine.low %v9658_v40, %v9659_v56  ;;  %v4190_v36 = vcombine.high %v4124_v13, %v4140_v53  ;;  %v8520_v59 = vrot.slane %v4517_v25, %v6191_v52  ;;  %v9661_v4 = vcombine.high %v9658_v40, %v9659_v56  ;;  %v9666_v40 = vld [vmem:[#allocation62_spill] sm:$0xff] }
 0x21f   : > { %5678 = vrot.lane.b32.xlu1 %v9656_v63, %s5953_s18  ;;  %v5662_v41 = vpack.i.bf16 %v4104_v3, %v9657_v39  ;;  %v4549_v2 = vcombine.low %v8479_v38, %v8503_v5  ;;  %v4260_v63 = vrot.slane %v4246_v7, %v6154_v19  ;;  %v4309_v42 = vcombine.high %v8491_v45, %v9398_v17  ;;  %v9663_v3 = vld [vmem:[#allocation73_spill] sm:$0xff]  ;;  %v9665_v39 = vld [vmem:[#allocation67_spill] sm:$0xff] }
 0x220   : > { %v5672_v46 = vpack.i.bf16 %v4105_v48, %v9660_v62  ;;  %v5682_v20 = vpack.i.bf16 %v4106_v50, %v9661_v4  ;;  %v9664_v53 = vcombine.high %v9662_v27, %v9663_v3  ;;  %v4107_v48 = vcombine.low %v8440_v0, %v8455_v26  ;;  %v9667_v0 = vld [vmem:[#allocation48_spill] sm:$0xff] }
 0x221   : > { %5663 = vrot.lane.b32.xlu0 %v5662_v41, %s5954_s13  ;;  %v8537_v25 = vrot.slane %v4174_v9, %v6191_v52  ;;  %v4589_v50 = vcombine.low %v9666_v40, %v9665_v39  ;;  %v4222_v7 = vcombine.high %v4156_v29, %v8465_v12  ;;  %v8543_v41 = vrot.slane %v4549_v2, %v6191_v52  ;;  %v8553_v26 = vpop.permute.xlu0 %4434 }
 0x222   : > { %v5707_v13 = vpack.i.bf16 %v4108_v22, %v9664_v53  ;;  %v4590_v56 = vcombine.high %v9666_v40, %v9665_v39  ;;  %v8548_v62 = vrot.slane %v4206_v32, %v6191_v52  ;;  %v4221_v22 = vcombine.low %v4156_v29, %v8465_v12  ;;  %v8565_v29 = vpop.permute.xlu1 %5488 }
 0x223   : > { %5688 = vrot.lane.b32.xlu1 %v9667_v0, %s5954_s13  ;;  %v4238_v9 = vcombine.high %v8326_v10, %v8354_v61  ;;  %v4621_v2 = vcombine.low %v8299_v24, %v8341_v28  ;;  %v4622_v4 = vcombine.high %v8299_v24, %v8341_v28  ;;  %v4470_v32 = vcombine.high %v8399_v34, %v8399_v34 }
 0x224   : > { %v8568_v53 = vrot.slane %v4189_v31, %v6191_v52  ;;  %v4278_v39 = vcombine.high %v8412_v15, %v8408_v57  ;;  %v4294_v40 = vcombine.high %v4260_v63, %v8486_v8  ;;  %v8575_v24 = vrot.slane %v4190_v36, %v6191_v52 }
 0x225   : > { %5673 = vrot.lane.b32.xlu0 %v5672_v46, %s5955_s21  ;;  %v5697_v0 = vpack.i.bf16 %v4309_v42, %v4238_v9  ;;  %v8578_v28 = vrot.slane %v4222_v7, %v6191_v52  ;;  %v4605_v34 = vcombine.low %v8511_v6, %v8553_v26  ;;  %v9668_v31 = vcombine.low %v9662_v27, %v9663_v3  ;;  %v4439_v42 = vpop.permute.xlu0 %4438 }
 0x226   : > { %v8586_v57 = vrot.slane %v4589_v50, %v6154_v19  ;;  %v8589_v15 = vrot.slane %v4590_v56, %v6154_v19  ;;  %v8592_v46 = vrot.slane %v4221_v22, %v6191_v52  ;;  %v4293_v36 = vcombine.low %v4260_v63, %v8486_v8 }
 0x227   : > { %v5692_v12 = vpack.i.bf16 %v4107_v48, %v9668_v31  ;;  %5698 = vrot.lane.b32.xlu1 %v5697_v0, %s5952_s3  ;;  %v8597_v7 = vrot.slane %v4621_v2, %v6154_v19  ;;  %v8600_v27 = vrot.slane %v4622_v4, %v6154_v19  ;;  %v4484_v3 = vrot.slane %v4470_v32, %v6154_v19  ;;  %v8619_v4 = vpop.permute.xlu1 %5498 }
 0x228   : > { %v4239_v48 = vcombine.low %v8537_v25, %v8548_v62  ;;  %v4292_v50 = vrot.slane %v4278_v39, %v6191_v52  ;;  %v4308_v56 = vrot.slane %v4294_v40, %v6191_v52  ;;  %v4502_v8 = vcombine.high %v8436_v1, %v8474_v44 }
 0x229   : > { %5683 = vrot.lane.b32.xlu0 %v5682_v20, %s5956_s22  ;;  %v4240_v63 = vcombine.high %v8537_v25, %v8548_v62  ;;  %v4725_v22 = vcombine.low %v8377_v14, %v8417_v51  ;;  %v4726_v9 = vcombine.high %v8377_v14, %v8417_v51  ;;  %v8617_v2 = vrot.slane %v4605_v34, %v6154_v19  ;;  %v4443_v44 = vpop.permute.xlu0 %4442 }
 0x22a   : > { %v4243_v32 = vcombine.low %v8575_v24, %v8578_v28  ;;  %v4301_v1 = vrot.slane %v4293_v36, %v6191_v52  ;;  %v4241_v20 = vcombine.low %v8568_v53, %v8592_v46  ;;  %v4242_v25 = vcombine.high %v8568_v53, %v8592_v46 }
 0x22b   : > { %5708 = vrot.lane.b32.xlu1 %v5707_v13, %s5958_s20  ;;  %v4244_v14 = vcombine.high %v8575_v24, %v8578_v28  ;;  %v4518_v51 = vcombine.high %v8445_v37, %v8445_v37  ;;  %v4533_v62 = vcombine.low %v4484_v3, %v4484_v3  ;;  %v4534_v39 = vcombine.high %v4484_v3, %v4484_v3 }
 0x22c   : > { %v4637_v40 = vcombine.low %v4439_v42, %v4443_v44  ;;  %v4516_v0 = vrot.slane %v4502_v8, %v6154_v19  ;;  %v5712_v13 = vpack.i.bf16 %v4292_v50, %v4239_v48  ;;  %v4310_v34 = vcombine.high %v4292_v50, %v9398_v17 }
 0x22d   : > { %5693 = vrot.lane.b32.xlu0 %v5692_v12, %s5957_s12  ;;  %v8636_v31 = vpack.i.bf16 %v4308_v56, %v4243_v32  ;;  %v8639_v53 = vrot.slane %v4725_v22, %v6154_v19  ;;  %v8642_v24 = vrot.slane %v4726_v9, %v6154_v19  ;;  %v4653_v37 = vcombine.low %v8586_v57, %v8617_v2  ;;  %v8653_v48 = vpop.permute.xlu0 %4446  ;;  %v8664_v9 = vpop.permute.xlu1 %5508 }
 0x22e   : > { %v4645_v28 = vrot.slane %v4637_v40, %v6154_v19  ;;  %v5471_v46 = vunpack.i.h.bf16 %v8460_v58  ;;  %v5470_v12 = vunpack.i.l.bf16 %v8460_v58  ;;  %v4606_v36 = vcombine.high %v8511_v6, %v8553_v26 }
 0x22f   : > { %v4638_v3 = vcombine.high %v4439_v42, %v4443_v44  ;;  %5718 = vrot.lane.b32.xlu1 %v8265_v55, %s5956_s22  ;;  %v8656_v50 = vrot.slane %v4518_v51, %v6191_v52  ;;  %v8659_v8 = vrot.slane %v4533_v62, %v6191_v52  ;;  %v8662_v22 = vrot.slane %v4534_v39, %v6191_v52 }
 0x230   : > { %v4685_v32 = vcombine.low %v8597_v7, %v4645_v28  ;;  %v4550_v6 = vcombine.high %v8479_v38, %v8503_v5  ;;  %v4565_v55 = vcombine.low %v8497_v35, %v4516_v0  ;;  %v4311_v26 = vcombine.high %v4301_v1, %v9398_v17 }
 0x231   : > { %5703 = vrot.lane.b32.xlu0 %v8275_v18, %s5955_s21  ;;  %v4312_v42 = vcombine.high %v4308_v56, %v9398_v17  ;;  %v4566_v44 = vcombine.high %v8497_v35, %v4516_v0  ;;  %v5480_v51 = vunpack.i.l.bf16 %v8505_v23  ;;  %v8677_v62 = vrot.slane %v4653_v37, %v6191_v52  ;;  %v8692_v35 = vpop.permute.xlu0 %4450 }
 0x232   : > { %v8680_v39 = vrot.slane %v4685_v32, %v6191_v52  ;;  %v1953_v38 = vsel %vm972_vm0, %v8268_v21, %v5470_v12  ;;  %v8685_v5 = vrot.slane %v4606_v36, %v6154_v19  ;;  %v8688_v18 = vrot.slane %v4638_v3, %v6154_v19 }
 0x233   : > { %9669 = vst [vmem:[#allocation72_spill] sm:$0xff] %v8677_v62  ;;  %5728 = vrot.lane.b32.xlu1 %v8394_v33, %s5957_s12  ;;  %v5722_v56 = vpack.i.bf16 %v4310_v34, %v4240_v63  ;;  %v5491_v40 = vunpack.i.h.bf16 %v8565_v29  ;;  %v4654_v0 = vcombine.high %v8586_v57, %v8617_v2  ;;  %v4686_v37 = vcombine.high %v8597_v7, %v4645_v28  ;;  %v8712_v7 = vpop.permute.xlu1 %5518 }
 0x234   : > { %9670 = vst [vmem:[#allocation68_spill] sm:$0xff] %v8680_v39  ;;  %v8701_v12 = vrot.slane %v4550_v6, %v6191_v52  ;;  %v8704_v36 = vrot.slane %v4565_v55, %v6191_v52  ;;  %v5481_v33 = vunpack.i.h.bf16 %v8505_v23  ;;  %v5732_v63 = vpack.i.bf16 %v4301_v1, %v4241_v20 }
 0x235   : > { %5713 = vrot.lane.b32.xlu0 %v5712_v13, %s5953_s18  ;;  %v8709_v34 = vrot.slane %v4566_v44, %v6191_v52  ;;  %v1956_v57 = vsel %vm976_vm1, %v1953_v38, %v5480_v51  ;;  %v5742_v2 = vpack.i.bf16 %v4311_v26, %v4242_v25  ;;  %v8714_v28 = vpack.i.bf16 %v4312_v42, %v4244_v14  ;;  %v5474_v1 = vpop.permute.xlu0 %5473  ;;  %v9671_v13 = vld [vmem:[#allocation49_spill] sm:$0xff] }
 0x236   : > { %v4669_v32 = vcombine.low %v8589_v15, %v8685_v5  ;;  %v4701_v23 = vcombine.low %v8600_v27, %v8688_v18  ;;  %v4582_v20 = vcombine.high %v8520_v59, %v8543_v41  ;;  %v8727_v25 = vsel %vm960_vm13, %v9671_v13, %v5491_v40 }
 0x237   : > { %5738 = vrot.lane.b32.xlu1 %v8396_v16, %s5958_s20  ;;  %v8730_v14 = vrot.slane %v4654_v0, %v6191_v52  ;;  %v8733_v6 = vrot.slane %v4686_v37, %v6191_v52  ;;  %v4741_v55 = vcombine.low %v8653_v48, %v8692_v35  ;;  %v5475_v26 = vunpack.i.l.bf16 %v5474_v1 }
 0x238   : > { %v4718_v16 = vcombine.high %v8677_v62, %v8680_v39  ;;  %v4584_v42 = vcombine.high %v8656_v50, %v8701_v12  ;;  %v4586_v44 = vcombine.high %v8659_v8, %v8704_v36  ;;  %v4670_v51 = vcombine.high %v8589_v15, %v8685_v5  ;;  %v5529_v5 = vpop.permute.xlu1 %5528 }
 0x239   : > { %5723 = vrot.lane.b32.xlu0 %v5722_v56, %s5954_s13  ;;  %v5501_v38 = vunpack.i.h.bf16 %v8619_v4  ;;  %v5500_v40 = vunpack.i.l.bf16 %v8619_v4  ;;  %v8751_v56 = vrot.slane %v4669_v32, %v6191_v52  ;;  %v5511_v37 = vunpack.i.h.bf16 %v8664_v9  ;;  %v5484_v15 = vpop.permute.xlu0 %5483 }
 0x23a   : > { %v8755_v13 = vrot.slane %v4701_v23, %v6191_v52  ;;  %v2465_v21 = vsel %vm968_vm15, %v8430_v11, %v5475_v26  ;;  %v8762_v4 = vrot.slane %v4741_v55, %v6154_v19  ;;  %v5486_v0 = vunpack.i.h.bf16 %v5484_v15 }
 0x23b   : > { %5748 = vrot.lane.b32.xlu1 %v8636_v31, %s5957_s12  ;;  %v2468_v32 = vsel %vm972_vm0, %v2465_v21, %v5471_v46  ;;  %v4720_v23 = vcombine.high %v8730_v14, %v8733_v6  ;;  %v5476_v3 = vunpack.i.h.bf16 %v5474_v1  ;;  %v5485_v39 = vunpack.i.l.bf16 %v5484_v15 }
 0x23c   : > { %v2471_v11 = vsel %vm976_vm1, %v2468_v32, %v5481_v33  ;;  %v5757_v31 = vpack.i.bf16 %v4718_v16, %v4582_v20  ;;  %v5510_v26 = vunpack.i.l.bf16 %v8664_v9  ;;  %v5521_v55 = vunpack.i.h.bf16 %v8712_v7 }
 0x23d   : > { %5733 = vrot.lane.b32.xlu0 %v5732_v63, %s5955_s21  ;;  %v5520_v62 = vunpack.i.l.bf16 %v8712_v7  ;;  %v2474_v58 = vsel %vm980_vm2, %v2471_v11, %v5486_v0  ;;  %v4702_v46 = vcombine.high %v8600_v27, %v8688_v18  ;;  %v5531_v21 = vunpack.i.h.bf16 %v5529_v5  ;;  %v5494_v33 = vpop.permute.xlu0 %5493  ;;  %v9674_v11 = vld [vmem:[#allocation18_spill] sm:$0xff] }
 0x23e   : > { %v1959_v1 = vsel %vm980_vm2, %v1956_v57, %v5485_v39  ;;  %v4722_v63 = vcombine.high %v8751_v56, %v8755_v13  ;;  %v4757_v9 = vcombine.low %v8639_v53, %v8762_v4  ;;  %v5496_v20 = vunpack.i.h.bf16 %v5494_v33 }
 0x23f   : > { %5758 = vrot.lane.b32.xlu1 %v5757_v31, %s5952_s3  ;;  %v5495_v16 = vunpack.i.l.bf16 %v5494_v33  ;;  %v1962_v7 = vsel %vm984_vm3, %v1959_v1, %v5500_v40  ;;  %v1952_v0 = vsel %vm968_vm15, %v8405_v30, %v5476_v3  ;;  %v8787_v27 = vsel %vm984_vm3, %v2474_v58, %v5501_v38  ;;  %v9675_v31 = vld [vmem:[#allocation39_spill] sm:$0xff] }
 0x240   : > { %v5767_v39 = vpack.i.bf16 %v4720_v23, %v4584_v42  ;;  %v5230_v18 = vpack.c.bf16 %v1962_v7, %v8450_v49  ;;  %v4742_v57 = vcombine.high %v8653_v48, %v8692_v35  ;;  %v1954_v15 = vsel %vm972_vm0, %v8271_v47, %v5496_v20 }
 0x241   : > { %5743 = vrot.lane.b32.xlu0 %v5742_v2, %s5956_s22  ;;  %v1955_v32 = vsel %vm972_vm0, %v1952_v0, %v5495_v16  ;;  %v4719_v40 = vcombine.low %v8730_v14, %v8733_v6  ;;  %v5530_v30 = vunpack.i.l.bf16 %v5529_v5  ;;  %v1957_v3 = vsel %vm976_vm1, %v1954_v15, %v5511_v37  ;;  %v5504_v49 = vpop.permute.xlu0 %5503  ;;  %v5539_v0 = vpop.permute.xlu1 %5538 }
 0x242   : > { %v1958_v38 = vsel %vm976_vm1, %v1955_v32, %v5510_v26  ;;  %5231 = vmatpush1.bf16.msra.mxu0 %v5230_v18  ;;  %v5777_v2 = vpack.i.bf16 %v4722_v63, %v4586_v44  ;;  %v8802_v48 = vrot.slane %v4757_v9, %v6191_v52  ;;  %v4913_v47 = vrot.slane %v8787_v27, 4 }
 0x243   : > { %5768 = vrot.lane.b32.xlu1 %v5767_v39, %s5954_s13  ;;  %v9672_v35 = vmov 0.0|0.0   ;;  %v1960_v42 = vsel %vm980_vm2, %v1957_v3, %v5521_v55  ;;  %v1961_v14 = vsel %vm980_vm2, %v1958_v38, %v5520_v62  ;;  %v5506_v6 = vunpack.i.h.bf16 %v5504_v49 }
 0x244   : > { %5232 = vmatprep.subr.bf16.mxu0 %v9672_v35  ;;  %v5505_v37 = vunpack.i.l.bf16 %v5504_v49  ;;  %v1963_v5 = vsel %vm984_vm3, %v1960_v42, %v5531_v21  ;;  %v1964_v44 = vsel %vm984_vm3, %v1961_v14, %v5530_v30  ;;  %v9673_v23 = vunpack.i.l.bf16 %v8565_v29 }
 0x245   : > { %5753 = vrot.lane.b32.xlu0 %v8714_v28, %s5958_s20  ;;  %v9676_v26 = vcombine.low %v9674_v11, %v9675_v31  ;;  %v4684_v55 = vrot.slane %v4670_v51, %v6191_v52  ;;  %v4944_v62 = vsel %vm4901_vm5, %v1964_v44, %v4913_v47  ;;  %v4585_v28 = vcombine.low %v8659_v8, %v8704_v36  ;;  %v5514_v1 = vpop.permute.xlu0 %5513 }
 0x246   : > { %v4716_v21 = vrot.slane %v4702_v46, %v6191_v52  ;;  %v9677_v29 = vcombine.low %v8656_v50, %v8701_v12  ;;  %v5233_v63 = vpack.c.bf16 %v4944_v62, %v1963_v5  ;;  %v4721_v51 = vcombine.low %v8751_v56, %v8755_v13 }
 0x247   : > { %v2460_v58 = vsel %vm960_vm13, %v9676_v26, %v9673_v23  ;;  %5778 = vrot.lane.b32.xlu1 %v5777_v2, %s5956_s22  ;;  %v4756_v9 = vrot.slane %v4742_v57, %v6154_v19  ;;  %v4758_v20 = vcombine.high %v8639_v53, %v8762_v4  ;;  %v5516_v16 = vunpack.i.h.bf16 %v5514_v1 }
 0x248   : > { %v5762_v33 = vpack.i.bf16 %v4719_v40, %v9677_v29  ;;  %v5515_v8 = vunpack.i.l.bf16 %v5514_v1  ;;  %v2464_v36 = vsel %vm964_vm14, %v8727_v25, %v5506_v6  ;;  %v2463_v46 = vsel %vm964_vm14, %v2460_v58, %v5505_v37  ;;  %5234 = vmatpush1.bf16.msra.mxu0 %v5233_v63  ;;  %v5549_v63 = vpop.permute.xlu1 %5548 }
 0x249   : > { %v4789_v50 = vcombine.high %v8802_v48, %v9398_v17  ;;  %5235 = vmatprep.subr.bf16.mxu0 %v9672_v35  ;;  %v5524_v19 = vpop.permute.xlu0 %5523  ;;  %v5772_v12 = vpack.i.bf16 %v4721_v51, %v4585_v28  ;;  %v4723_v53 = vcombine.low %v4684_v55, %v4716_v21  ;;  %v2467_v13 = vsel %vm968_vm15, %v2464_v36, %v5516_v16 }
 0x24a   : > { %5763 = vrot.lane.b32.xlu0 %v5762_v33, %s5953_s18  ;;  %v2466_v56 = vsel %vm968_vm15, %v2463_v46, %v5515_v8  ;;  %v5526_v25 = vunpack.i.h.bf16 %v5524_v19  ;;  %v5525_v4 = vunpack.i.l.bf16 %v5524_v19  ;;  %v4773_v7 = vcombine.low %v8642_v24, %v4756_v9 }
 0x24b   : > { %4800 = vrot.lane.b32.xlu1 %v4789_v50, %s5952_s3  ;;  %v4772_v39 = vrot.slane %v4758_v20, %v6191_v52  ;;  %v4587_v18 = vcombine.low %v8662_v22, %v8709_v34  ;;  %v5541_v57 = vunpack.i.h.bf16 %v5539_v0  ;;  %v5540_v15 = vunpack.i.l.bf16 %v5539_v0  ;;  %v5059_v20 = vld [vmem:[%s9144_s6] sm:$0xff] }
 0x24c   : > { %v2469_v32 = vsel %vm972_vm0, %v2466_v56, %v5525_v4  ;;  %v2470_v40 = vsel %vm972_vm0, %v2467_v13, %v5526_v25  ;;  %v4724_v38 = vcombine.high %v4684_v55, %v4716_v21  ;;  %v4774_v42 = vcombine.high %v8642_v24, %v4756_v9 }
 0x24d   : > { %v5534_v30 = vpop.permute.xlu0 %5533  ;;  %v5782_v3 = vpack.i.bf16 %v4723_v53, %v4587_v18  ;;  %v4781_v14 = vrot.slane %v4773_v7, %v6191_v52  ;;  %v4588_v6 = vcombine.high %v8662_v22, %v8709_v34  ;;  %v4948_v22 = vld [vmem:[%s9139_s1 + $0x8] sm:$0xff]  ;;  %v4790_v21 = vcombine.high %v4772_v39, %v9398_v17 }
 0x24e   : > { %5773 = vrot.lane.b32.xlu0 %v5772_v12, %s5955_s21  ;;  %v5536_v49 = vunpack.i.h.bf16 %v5534_v30  ;;  %v5535_v2 = vunpack.i.l.bf16 %v5534_v30  ;;  %v4788_v58 = vrot.slane %v4774_v42, %v6191_v52  ;;  %5217 = vmatprep.mubr.msk.f32.mxu0 %vm4955_vm6, %v4948_v22  ;;  %v5961_v1 = vmov 0   ;;  %v4949_v52 = vld [vmem:[%s9140_s2] sm:$0xff]  ;;  %v9688_v22 = vld [vmem:[#allocation59_spill] sm:$0xff] }
 0x24f   : > { %4812 = vrot.lane.b32.xlu1 %v4772_v39, %s5953_s18  ;;  %v5787_v31 = vpack.i.bf16 %v4724_v38, %v4588_v6  ;;  %5793 = vset.pattern.permute.xlu0 %v5961_v1  ;;  %v4791_v9 = vcombine.high %v4781_v14, %v9398_v17  ;;  %v5551_v25 = vunpack.i.h.bf16 %v5549_v63  ;;  %v5550_v4 = vunpack.i.l.bf16 %v5549_v63  ;;  %v9678_v38 = vld [vmem:[#allocation83_spill] sm:$0xff] }
 0x250   : > { %v2472_v37 = vsel %vm976_vm1, %v2469_v32, %v5535_v2  ;;  %v2473_v5 = vsel %vm976_vm1, %v2470_v40, %v5536_v49  ;;  %5792 = vset.pattern.permute.xlu1 %v5961_v1  ;;  %v4792_v27 = vcombine.high %v4788_v58, %v9398_v17  ;;  %v9679_v49 = vld [vmem:[#allocation80_spill] sm:$0xff]  ;;  %v9682_v6 = vld [vmem:[#allocation31_spill] sm:$0xff] }
 0x251   : > { %v5544_v44 = vpop.permute.xlu0 %5543  ;;  %v2475_v23 = vsel %vm980_vm2, %v2472_v37, %v5540_v15  ;;  %v2476_v11 = vsel %vm980_vm2, %v2473_v5, %v5541_v57  ;;  %v9680_v2 = vcombine.low %v9678_v38, %v9679_v49 }
 0x252   : > { %5783 = vrot.lane.b32.xlu0 %v5782_v3, %s5957_s12  ;;  %v5546_v24 = vunpack.i.h.bf16 %v5544_v44  ;;  %v5545_v26 = vunpack.i.l.bf16 %v5544_v44 }
 0x253   : > { %4836 = vrot.lane.b32.xlu1 %v4781_v14, %s5955_s21  ;;  %v2939_v42 = vsel %vm960_vm13, %v9680_v2, %v5550_v4  ;;  %v9681_v14 = vld [vmem:[#allocation12_spill] sm:$0xff]  ;;  %s9085_s21 = scalar_lea.hbm %s9145_s7, %s5220_s19 }
 0x254   : > { %v2478_v34 = vsel %vm984_vm3, %v2475_v23, %v5545_v26  ;;  %v2479_v55 = vsel %vm984_vm3, %v2476_v11, %v5546_v24  ;;  %v9683_v37 = vcombine.low %v9681_v14, %v9682_v6  ;;  %v9684_v11 = vld [vmem:[#allocation29_spill] sm:$0xff] }
 0x255   : > { %v4914_v62 = vrot.slane %v2478_v34, 4  ;;  %v4916_v28 = vrot.slane %v2479_v55, 4  ;;  %v5554_v36 = vpop.permute.xlu0 %5553 }
 0x256   : > { %5788 = vrot.lane.b32.xlu0 %v5787_v31, %s5958_s20  ;;  %v5556_v18 = vunpack.i.h.bf16 %v5554_v36  ;;  %v5555_v57 = vunpack.i.l.bf16 %v5554_v36  ;;  %v2940_v5 = vsel %vm960_vm13, %v9683_v37, %v5551_v25  ;;  %v9685_v31 = vld [vmem:[#allocation28_spill] sm:$0xff] }
 0x257   : > { %4860 = vrot.lane.b32.xlu1 %v4788_v58, %s5957_s12  ;;  %v4915_v29 = vsel %vm4901_vm5, %v4913_v47, %v4914_v62  ;;  %v4917_v33 = vsel %vm4901_vm5, %v4914_v62, %v4916_v28  ;;  %v5052_v47 = vld [vmem:[%s9143_s5] sm:$0xff]  ;;  %v9686_v24 = vcombine.low %v9684_v11, %v9685_v31  ;;  %v9687_v58 = vld [vmem:[#allocation53_spill] sm:$0xff] }
 0x258   : > { %v5236_v51 = vpack.c.bf16 %v4917_v33, %v4915_v29  ;;  %v9689_v34 = vcombine.low %v9687_v58, %v9688_v22  ;;  %v2943_v1 = vsel %vm964_vm14, %v2940_v5, %v5556_v18 }
 0x259   : > { %v5564_v50 = vpop.permute.xlu0 %5563 }
 0x25a   : > { %4824 = vrot.lane.b32.xlu0 %v4790_v21, %s5954_s13  ;;  %5237 = vmatpush1.bf16.msra.mxu0 %v5236_v51  ;;  %v5559_v16 = vpop.permute.xlu1 %5558  ;;  %v5566_v44 = vunpack.i.h.bf16 %v5564_v50  ;;  %v5565_v23 = vunpack.i.l.bf16 %v5564_v50 }
 0x25b   : > { %4952 = vperm.xlu1 %5792, %v4949_v52   ;;  %5238 = vmatprep.subr.bf16.mxu0 %v9672_v35  ;;  %v5561_v7 = vunpack.i.h.bf16 %v5559_v16  ;;  %v5560_v0 = vunpack.i.l.bf16 %v5559_v16  ;;  %v2942_v52 = vsel %vm964_vm14, %v2939_v42, %v5555_v57 }
 0x25d   : > { %v3419_v26 = vsel %vm960_vm13, %v9686_v24, %v5560_v0  ;;  %v3420_v55 = vsel %vm960_vm13, %v9689_v34, %v5561_v7 }
 0x25e   : > { %4848 = vrot.lane.b32.xlu0 %v4791_v9, %s5956_s22  ;;  %s5962_s22 = smov [#allocation7]  }
 0x25f   : > { %5062 = vperm.xlu1 %5792, %v5059_v20   ;;  %s5846_s12 = sshll.u32 %s5962_s22, 4  ;;  %s5847_s12 = int_to_ptr.vmem [resolvable:$false] %s5846_s12 }
 0x260   : > { %v5569_v8 = vpop.permute.xlu1 %5568 }
 0x261   : > { %v5571_v15 = vunpack.i.h.bf16 %v5569_v8  ;;  %v5570_v32 = vunpack.i.l.bf16 %v5569_v8 }
 0x262   : > { %4872 = vrot.lane.b32.xlu0 %v4792_v27, %s5958_s20  ;;  %v2945_v27 = vsel %vm968_vm15, %v2942_v52, %v5565_v23  ;;  %s320_s20 = sand.u32 1, %s5920_s25  }
 0x263   : > { %v3422_v29 = vsel %vm964_vm14, %v3419_v26, %v5570_v32  ;;  %v3423_v33 = vsel %vm964_vm14, %v3420_v55, %v5571_v15  ;;  %s5195_s23 = sshll.u32 %s320_s20, 3  ;;  %s5068_s27 = scalar_lea.sflag [#allocation3], %s320_s20 }
 0x264   : > { %v5579_v46 = vpop.permute.xlu1 %5578  ;;  %s322_s17 = scalar_lea.vmem [#allocation7], %s5195_s23  ;;  %s5848_s23 = scalar_lea.vmem %s5847_s12, 256 }
 0x265   : > { %v5581_v62 = vunpack.i.h.bf16 %v5579_v46  ;;  %v5580_v28 = vunpack.i.l.bf16 %v5579_v46  ;;  %s5083_s3 = sshll.u32 %s322_s17, 4  ;;  %s9087_s3 = int_to_ptr.vmem [resolvable:$true] %s5083_s3 }
 0x266   : > { %5055 = vperm.xlu0 %5793, %v5052_v47   ;;  %v2946_v47 = vsel %vm968_vm15, %v2943_v1, %v5566_v44  ;;  %v9690_v1 = vld [vmem:[#allocation69_spill] sm:$0xff]  ;;  %s5842_s28 = scalar_lea.vmem %s9087_s3, 128  ;;  %p5849_p7 = scmp.lt.s32.totalorder %s9087_s3, %s5847_s12 }
 0x267   : > { %v2948_v46 = vsel %vm972_vm0, %v2945_v27, %v5580_v28  ;;  %v2949_v50 = vsel %vm972_vm0, %v2946_v47, %v5581_v62  ;;  %p5843_p10 = scmp.ne.s32.totalorder %s9087_s3, %s5842_s28  ;;  %p5850_p9 = scmp.lt.s32.totalorder %s5848_s23, %s5842_s28 }
 0x268   : > { %v8890_v19 = vpop.permute.xlu1 %5588 }
 0x269   : > { %p5844_p0 = pnand %p5843_p10, %p9702_p12  ;;  %p5851_p11 = por %p5850_p9, %p5849_p7 }
 0x26b   : > { %v8892_v12 = vpop.permute.xlu0 %5573  ;;  %p5845_p2 = pneg %p5844_p0 }
 0x26d   : > { %p5852_p13 = pnand %p5851_p11, %p5845_p2 }
 0x26f   : > { %v5599_v53 = vpop.permute.xlu1 %5598 }
 0x270   : > { %v5601_v8 = vunpack.i.h.bf16 %v5599_v53  ;;  %v5600_v36 = vunpack.i.l.bf16 %v5599_v53 }
 0x271   : > { %v5584_v56 = vpop.permute.xlu0 %5583 }
 0x272   : > { %v5586_v40 = vunpack.i.h.bf16 %v5584_v56  ;;  %v5585_v30 = vunpack.i.l.bf16 %v5584_v56  ;;  %v5575_v56 = vunpack.i.l.bf16 %v8892_v12 }
 0x273   : > { %v8894_v13 = vpop.permute.xlu1 %5608 }
 0x274   : > { %v3426_v63 = vsel %vm968_vm15, %v3423_v33, %v5586_v40  ;;  %v3425_v51 = vsel %vm968_vm15, %v3422_v29, %v5585_v30  ;;  %v5611_v2 = vunpack.i.h.bf16 %v8894_v13  ;;  %v5610_v42 = vunpack.i.l.bf16 %v8894_v13 }
 0x275   : > { %v5594_v39 = vpop.permute.xlu0 %5593  ;;  %v3428_v0 = vsel %vm972_vm0, %v3425_v51, %v5600_v36  ;;  %v2941_v52 = vsel %vm960_vm13, %v9690_v1, %v5575_v56  ;;  %v5590_v33 = vunpack.i.l.bf16 %v8890_v19  ;;  %v5576_v36 = vunpack.i.h.bf16 %v8892_v12 }
 0x276   : > { %v5596_v9 = vunpack.i.h.bf16 %v5594_v39  ;;  %v5595_v20 = vunpack.i.l.bf16 %v5594_v39  ;;  %v3429_v39 = vsel %vm972_vm0, %v3426_v63, %v5601_v8 }
 0x277   : > { %v8896_v3 = vpop.permute.xlu1 %5618  ;;  %v2944_v51 = vsel %vm964_vm14, %v2941_v52, %v5590_v33 }
 0x278   : > { %v2951_v18 = vsel %vm976_vm1, %v2948_v46, %v5595_v20  ;;  %v2952_v57 = vsel %vm976_vm1, %v2949_v50, %v5596_v9  ;;  %v5620_v27 = vunpack.i.l.bf16 %v8896_v3 }
 0x279   : > { %v8914_v21 = vpop.permute.xlu0 %5603  ;;  %v2954_v58 = vsel %vm980_vm2, %v2951_v18, %v5610_v42  ;;  %v2955_v13 = vsel %vm980_vm2, %v2952_v57, %v5611_v2  ;;  %v5621_v2 = vunpack.i.h.bf16 %v8896_v3  ;;  %v9692_v3 = vld [vmem:[#allocation42_spill] sm:$0xff] }
 0x27a   : > { %v5605_v29 = vunpack.i.l.bf16 %v8914_v21  ;;  %v5606_v18 = vunpack.i.h.bf16 %v8914_v21  ;;  %v3621_v21 = vcombine.low %v9638_v54, %v9639_v60 }
 0x27b   : > { %v5629_v16 = vpop.permute.xlu1 %5628 }
 0x27c   : > { %v5631_v15 = vunpack.i.h.bf16 %v5629_v16  ;;  %v5630_v32 = vunpack.i.l.bf16 %v5629_v16  ;;  %v2947_v20 = vsel %vm968_vm15, %v2944_v51, %v5605_v29 }
 0x27d   : > { %v2950_v46 = vsel %vm972_vm0, %v2947_v20, %v5620_v27 }
 0x27e   : > { %v5614_v25 = vpop.permute.xlu0 %5613 }
 0x27f   : > { %v5616_v4 = vunpack.i.h.bf16 %v5614_v25  ;;  %v5615_v7 = vunpack.i.l.bf16 %v5614_v25  ;;  %v5639_v53 = vpop.permute.xlu1 %5638 }
 0x280   : > { %v5641_v38 = vunpack.i.h.bf16 %v5639_v53  ;;  %v5640_v49 = vunpack.i.l.bf16 %v5639_v53 }
 0x281   : > { %v3431_v40 = vsel %vm976_vm1, %v3428_v0, %v5615_v7  ;;  %v3432_v30 = vsel %vm976_vm1, %v3429_v39, %v5616_v4  ;;  %v9691_v0 = vld [vmem:[#allocation66_spill] sm:$0xff] }
 0x282   : > { %v3434_v14 = vsel %vm980_vm2, %v3431_v40, %v5630_v32  ;;  %v3435_v6 = vsel %vm980_vm2, %v3432_v30, %v5631_v15  ;;  %v5624_v37 = vpop.permute.xlu0 %5623  ;;  %v3421_v39 = vsel %vm960_vm13, %v9691_v0, %v5576_v36  ;;  %v5591_v15 = vunpack.i.h.bf16 %v8890_v19 }
 0x283   : > { %v3437_v5 = vsel %vm984_vm3, %v3434_v14, %v5640_v49  ;;  %v8939_v44 = vsel %vm984_vm3, %v3435_v6, %v5641_v38  ;;  %v5626_v23 = vunpack.i.h.bf16 %v5624_v37  ;;  %v5625_v11 = vunpack.i.l.bf16 %v5624_v37 }
 0x284   : > { %v4924_v31 = vrot.slane %v3437_v5, 4  ;;  %v4925_v24 = vrot.slane %v8939_v44, 4  ;;  %v5649_v26 = vpop.permute.xlu1 %5648  ;;  %v3424_v53 = vsel %vm964_vm14, %v3421_v39, %v5591_v15 }
 0x285   : > { %v2957_v22 = vsel %vm984_vm3, %v2954_v58, %v5625_v11  ;;  %v2958_v34 = vsel %vm984_vm3, %v2955_v13, %v5626_v23  ;;  %v3427_v38 = vsel %vm968_vm15, %v3424_v53, %v5606_v18  ;;  %v5650_v42 = vunpack.i.l.bf16 %v5649_v26  ;;  %v9693_v13 = vld [vmem:[#allocation41_spill] sm:$0xff] }
 0x286   : > { %v5634_v55 = vpop.permute.xlu0 %5633  ;;  %v5239_v62 = vpack.c.bf16 %v2958_v34, %v2957_v22  ;;  %v4926_v28 = vsel %vm4901_vm5, %v4924_v31, %v4925_v24  ;;  %v5651_v6 = vunpack.i.h.bf16 %v5649_v26  ;;  %v3430_v5 = vsel %vm972_vm0, %v3427_v38, %v5621_v2 }
 0x287   : > { %v5635_v16 = vunpack.i.l.bf16 %v5634_v55  ;;  %v5636_v49 = vunpack.i.h.bf16 %v5634_v55  ;;  %v3757_v22 = vcombine.low %v9693_v13, %v9692_v3  ;;  %v3917_v60 = vsel %vm960_vm13, %v3621_v21, %v5650_v42 }
 0x288   : > { %5240 = vmatpush1.bf16.msra.mxu0 %v5239_v62 }
 0x289   : > { %v5659_v63 = vpop.permute.xlu1 %5658  ;;  %5241 = vmatprep.subr.bf16.mxu0 %v9672_v35  ;;  %v2953_v56 = vsel %vm976_vm1, %v2950_v46, %v5635_v16  ;;  %v3433_v58 = vsel %vm976_vm1, %v3430_v5, %v5636_v49  ;;  %v9696_v46 = vld [vmem:[#allocation56_spill] sm:$0xff] }
 0x28a   : > { %v5644_v9 = vpop.permute.xlu0 %5643  ;;  %v5661_v23 = vunpack.i.h.bf16 %v5659_v63  ;;  %v5660_v11 = vunpack.i.l.bf16 %v5659_v63 }
 0x28b   : > { %v5645_v47 = vunpack.i.l.bf16 %v5644_v9  ;;  %v5646_v14 = vunpack.i.h.bf16 %v5644_v9 }
 0x28c   : > { %v3920_v51 = vsel %vm964_vm14, %v3917_v60, %v5660_v11 }
 0x28d   : > { %v5669_v8 = vpop.permute.xlu1 %5668  ;;  %v2956_v4 = vsel %vm980_vm2, %v2953_v56, %v5645_v47  ;;  %v3436_v34 = vsel %vm980_vm2, %v3433_v58, %v5646_v14 }
 0x28e   : > { %v5654_v50 = vpop.permute.xlu0 %5653  ;;  %v5671_v54 = vunpack.i.h.bf16 %v5669_v8  ;;  %v5670_v26 = vunpack.i.l.bf16 %v5669_v8 }
 0x28f   : > { %v5655_v25 = vunpack.i.l.bf16 %v5654_v50  ;;  %v5656_v37 = vunpack.i.h.bf16 %v5654_v50 }
 0x290   : > { %v3918_v27 = vsel %vm960_vm13, %v3757_v22, %v5671_v54 }
 0x291   : > { %v5679_v7 = vpop.permute.xlu1 %5678  ;;  %v2959_v57 = vsel %vm984_vm3, %v2956_v4, %v5655_v25  ;;  %v3439_v29 = vsel %vm984_vm3, %v3436_v34, %v5656_v37 }
 0x292   : > { %v4945_v12 = vsel %vm4901_vm5, %v2959_v57, %v4924_v31  ;;  %v5681_v47 = vunpack.i.h.bf16 %v5679_v7  ;;  %v5680_v8 = vunpack.i.l.bf16 %v5679_v7  ;;  %v4927_v50 = vrot.slane %v3439_v29, 4 }
 0x293   : > { %v5664_v32 = vpop.permute.xlu0 %5663  ;;  %v5242_v30 = vpack.c.bf16 %v4926_v28, %v4945_v12  ;;  %v9694_v28 = vld [vmem:[#allocation71_spill] sm:$0xff] }
 0x294   : > { %v5665_v55 = vunpack.i.l.bf16 %v5664_v32  ;;  %v9695_v1 = vcombine.low %v8230_v43, %v9694_v28  ;;  %v5666_v33 = vunpack.i.h.bf16 %v5664_v32  ;;  %v3919_v43 = vsel %vm960_vm13, %v9696_v46, %v5670_v26 }
 0x295   : > { %v8968_v40 = vpop.permute.xlu1 %5688  ;;  %5243 = vmatpush1.bf16.msra.mxu0 %v5242_v30  ;;  %v3921_v30 = vsel %vm964_vm14, %v3918_v27, %v5681_v47  ;;  %v3922_v38 = vsel %vm964_vm14, %v3919_v43, %v5680_v8 }
 0x296   : > { %5244 = vmatprep.subr.bf16.mxu0 %v9672_v35  ;;  %v4397_v52 = vsel %vm960_vm13, %v9695_v1, %v5651_v6  ;;  %v3923_v56 = vsel %vm968_vm15, %v3920_v51, %v5665_v55  ;;  %v5691_v39 = vunpack.i.h.bf16 %v8968_v40  ;;  %v5690_v15 = vunpack.i.l.bf16 %v8968_v40 }
 0x297   : > { %v5674_v19 = vpop.permute.xlu0 %5673  ;;  %v4400_v9 = vsel %vm964_vm14, %v4397_v52, %v5661_v23  ;;  %v4928_v40 = vsel %vm4901_vm5, %v4925_v24, %v4927_v50 }
 0x298   : > { %v5675_v63 = vunpack.i.l.bf16 %v5674_v19  ;;  %v5676_v36 = vunpack.i.h.bf16 %v5674_v19  ;;  %v4403_v0 = vsel %vm968_vm15, %v4400_v9, %v5666_v33  ;;  %v3924_v11 = vsel %vm968_vm15, %v3921_v30, %v5691_v39 }
 0x299   : > { %v8976_v31 = vpop.permute.xlu1 %5698  ;;  %v3925_v58 = vsel %vm968_vm15, %v3922_v38, %v5690_v15 }
 0x29a   : > { %v3926_v18 = vsel %vm972_vm0, %v3923_v56, %v5675_v63  ;;  %v4406_v49 = vsel %vm972_vm0, %v4403_v0, %v5676_v36  ;;  %v5701_v47 = vunpack.i.h.bf16 %v8976_v31  ;;  %v5700_v8 = vunpack.i.l.bf16 %v8976_v31 }
 0x29b   : > { %v5684_v62 = vpop.permute.xlu0 %5683 }
 0x29c   : > { %v5685_v20 = vunpack.i.l.bf16 %v5684_v62  ;;  %v5686_v25 = vunpack.i.h.bf16 %v5684_v62 }
 0x29d   : > { %v5709_v16 = vpop.permute.xlu1 %5708 }
 0x29e   : > { %v3929_v7 = vsel %vm976_vm1, %v3926_v18, %v5685_v20  ;;  %v5710_v32 = vunpack.i.l.bf16 %v5709_v16  ;;  %v4409_v21 = vsel %vm976_vm1, %v4406_v49, %v5686_v25  ;;  %v5711_v22 = vunpack.i.h.bf16 %v5709_v16 }
 0x29f   : > { %v5694_v4 = vpop.permute.xlu0 %5693  ;;  %v4399_v18 = vsel %vm960_vm13, %v8491_v45, %v5701_v47 }
 0x2a0   : > { %v5695_v57 = vunpack.i.l.bf16 %v5694_v4  ;;  %v5696_v12 = vunpack.i.h.bf16 %v5694_v4 }
 0x2a1   : > { %v5719_v53 = vpop.permute.xlu1 %5718 }
 0x2a2   : > { %v3932_v2 = vsel %vm980_vm2, %v3929_v7, %v5695_v57  ;;  %v5721_v42 = vunpack.i.h.bf16 %v5719_v53  ;;  %v5720_v6 = vunpack.i.l.bf16 %v5719_v53  ;;  %v4412_v3 = vsel %vm980_vm2, %v4409_v21, %v5696_v12 }
 0x2a3   : > { %v5704_v14 = vpop.permute.xlu0 %5703  ;;  %v3935_v19 = vsel %vm984_vm3, %v3932_v2, %v5710_v32  ;;  %v4415_v26 = vsel %vm984_vm3, %v4412_v3, %v5711_v22  ;;  %v9697_v57 = vcombine.low %v8326_v10, %v8354_v61 }
 0x2a4   : > { %v5706_v37 = vunpack.i.h.bf16 %v5704_v14  ;;  %v5705_v5 = vunpack.i.l.bf16 %v5704_v14  ;;  %v5245_v23 = vpack.c.bf16 %v3935_v19, %v4928_v40  ;;  %v4935_v29 = vrot.slane %v4415_v26, 4 }
 0x2a5   : > { %v5729_v13 = vpop.permute.xlu1 %5728  ;;  %v4398_v15 = vsel %vm960_vm13, %v9697_v57, %v5700_v8 }
 0x2a6   : > { %v3927_v54 = vsel %vm972_vm0, %v3924_v11, %v5706_v37  ;;  %v3928_v60 = vsel %vm972_vm0, %v3925_v58, %v5705_v5  ;;  %5246 = vmatpush1.bf16.msra.mxu0 %v5245_v23  ;;  %v5731_v44 = vunpack.i.h.bf16 %v5729_v13  ;;  %v5730_v34 = vunpack.i.l.bf16 %v5729_v13 }
 0x2a7   : > { %v5714_v24 = vpop.permute.xlu0 %5713  ;;  %5247 = vmatprep.subr.bf16.mxu0 %v9672_v35  ;;  %v3930_v55 = vsel %vm976_vm1, %v3927_v54, %v5721_v42  ;;  %v3931_v62 = vsel %vm976_vm1, %v3928_v60, %v5720_v6 }
 0x2a8   : > { %v3933_v33 = vsel %vm980_vm2, %v3930_v55, %v5731_v44  ;;  %v3934_v63 = vsel %vm980_vm2, %v3931_v62, %v5730_v34  ;;  %v5716_v36 = vunpack.i.h.bf16 %v5714_v24  ;;  %v5715_v46 = vunpack.i.l.bf16 %v5714_v24 }
 0x2a9   : > { %v5739_v28 = vpop.permute.xlu1 %5738  ;;  %v9698_v62 = vcombine.low %v8520_v59, %v8543_v41 }
 0x2aa   : > { %v5741_v1 = vunpack.i.h.bf16 %v5739_v28  ;;  %v5740_v52 = vunpack.i.l.bf16 %v5739_v28  ;;  %v4402_v31 = vsel %vm964_vm14, %v4399_v18, %v5716_v36  ;;  %v4401_v7 = vsel %vm964_vm14, %v4398_v15, %v5715_v46 }
 0x2ab   : > { %v5724_v51 = vpop.permute.xlu0 %5723 }
 0x2ac   : > { %v3937_v9 = vsel %vm984_vm3, %v3934_v63, %v5740_v52  ;;  %v3936_v20 = vsel %vm984_vm3, %v3933_v33, %v5741_v1  ;;  %v5726_v56 = vunpack.i.h.bf16 %v5724_v51  ;;  %v5725_v25 = vunpack.i.l.bf16 %v5724_v51  ;;  %v9699_v1 = vld [vmem:[#allocation72_spill] sm:$0xff] }
 0x2ad   : > { %v5749_v16 = vpop.permute.xlu1 %5748  ;;  %v4946_v27 = vsel %vm4901_vm5, %v3937_v9, %v4935_v29  ;;  %v9700_v52 = vld [vmem:[#allocation68_spill] sm:$0xff] }
 0x2ae   : > { %v5248_v50 = vpack.c.bf16 %v4946_v27, %v3936_v20  ;;  %v4404_v12 = vsel %vm968_vm15, %v4401_v7, %v5725_v25  ;;  %v4405_v53 = vsel %vm968_vm15, %v4402_v31, %v5726_v56  ;;  %v5751_v21 = vunpack.i.h.bf16 %v5749_v16 }
 0x2af   : > { %v5734_v43 = vpop.permute.xlu0 %5733  ;;  %v5750_v42 = vunpack.i.l.bf16 %v5749_v16  ;;  %v9701_v33 = vcombine.low %v9699_v1, %v9700_v52 }
 0x2b0   : > { %v5736_v4 = vunpack.i.h.bf16 %v5734_v43  ;;  %v5735_v0 = vunpack.i.l.bf16 %v5734_v43  ;;  %5249 = vmatpush1.bf16.msra.mxu0 %v5248_v50 }
 0x2b1   : > { %v5759_v39 = vpop.permute.xlu1 %5758  ;;  %5250 = vmatprep.subr.bf16.mxu0 %v9672_v35 }
 0x2b2   : > { %v4407_v45 = vsel %vm972_vm0, %v4404_v12, %v5735_v0  ;;  %v4408_v49 = vsel %vm972_vm0, %v4405_v53, %v5736_v4  ;;  %v5761_v22 = vunpack.i.h.bf16 %v5759_v39  ;;  %v5760_v54 = vunpack.i.l.bf16 %v5759_v39 }
 0x2b3   : > { %v5744_v32 = vpop.permute.xlu0 %5743 }
 0x2b4   : > { %v5746_v30 = vunpack.i.h.bf16 %v5744_v32  ;;  %v5745_v38 = vunpack.i.l.bf16 %v5744_v32  ;;  %v4877_v28 = vsel %vm960_vm13, %v9698_v62, %v5760_v54  ;;  %v4878_v63 = vsel %vm960_vm13, %v9701_v33, %v5761_v22 }
 0x2b5   : > { %v5769_v10 = vpop.permute.xlu1 %5768 }
 0x2b6   : > { %v4410_v61 = vsel %vm976_vm1, %v4407_v45, %v5745_v38  ;;  %v4411_v2 = vsel %vm976_vm1, %v4408_v49, %v5746_v30  ;;  %v5771_v27 = vunpack.i.h.bf16 %v5769_v10  ;;  %v5770_v47 = vunpack.i.l.bf16 %v5769_v10 }
 0x2b7   : > { %v5754_v14 = vpop.permute.xlu0 %5753  ;;  %v4413_v6 = vsel %vm980_vm2, %v4410_v61, %v5750_v42  ;;  %v4414_v37 = vsel %vm980_vm2, %v4411_v2, %v5751_v21 }
 0x2b8   : > { %v5756_v19 = vunpack.i.h.bf16 %v5754_v14  ;;  %v5755_v40 = vunpack.i.l.bf16 %v5754_v14  ;;  %v4947_v14 = vld [vmem:[%s9139_s1] sm:$0xff] }
 0x2b9   : > { %v5779_v11 = vpop.permute.xlu1 %5778 }
 0x2ba   : > { %v4416_v5 = vsel %vm984_vm3, %v4413_v6, %v5755_v40  ;;  %v4417_v23 = vsel %vm984_vm3, %v4414_v37, %v5756_v19  ;;  %v5781_v56 = vunpack.i.h.bf16 %v5779_v11  ;;  %v5780_v25 = vunpack.i.l.bf16 %v5779_v11 }
 0x2bb   : > { %v4936_v58 = vrot.slane %v4416_v5, 4  ;;  %v4938_v3 = vrot.slane %v4417_v23, 4 }
 0x2bc   : > { %v5764_v13 = vpop.permute.xlu0 %5763 }
 0x2bd   : > { %v5766_v60 = vunpack.i.h.bf16 %v5764_v13  ;;  %v5765_v44 = vunpack.i.l.bf16 %v5764_v13  ;;  %v4937_v34 = vsel %vm4901_vm5, %v4935_v29, %v4936_v58  ;;  %v4939_v24 = vsel %vm4901_vm5, %v4936_v58, %v4938_v3  ;;  %v4801_v51 = vpop.permute.xlu1 %4800 }
 0x2be   : > { %v5251_v26 = vpack.c.bf16 %v4939_v24, %v4937_v34  ;;  %v4879_v7 = vsel %vm960_vm13, %v8802_v48, %v4801_v51 }
 0x2bf   : > { %v4881_v9 = vsel %vm964_vm14, %v4878_v63, %v5766_v60  ;;  %v4880_v29 = vsel %vm964_vm14, %v4877_v28, %v5765_v44 }
 0x2c0   : > { %v5774_v55 = vpop.permute.xlu0 %5773  ;;  %5252 = vmatpush1.bf16.msra.mxu0 %v5251_v26  ;;  %v4883_v41 = vsel %vm968_vm15, %v4880_v29, %v5770_v47  ;;  %v4884_v8 = vsel %vm968_vm15, %v4881_v9, %v5771_v27 }
 0x2c1   : > { %v5776_v20 = vunpack.i.h.bf16 %v5774_v55  ;;  %v5775_v16 = vunpack.i.l.bf16 %v5774_v55  ;;  %5253 = vmatprep.subr.bf16.mxu0 %v9672_v35  ;;  %v4813_v4 = vpop.permute.xlu1 %4812 }
 0x2c2   : > { %v4882_v53 = vsel %vm964_vm14, %v4879_v7, %v4813_v4 }
 0x2c3   : > { %v4886_v36 = vsel %vm972_vm0, %v4883_v41, %v5775_v16  ;;  %v4887_v46 = vsel %vm972_vm0, %v4884_v8, %v5776_v20 }
 0x2c4   : > { %v5784_v59 = vpop.permute.xlu0 %5783  ;;  %v4889_v39 = vsel %vm976_vm1, %v4886_v36, %v5780_v25  ;;  %v4890_v35 = vsel %vm976_vm1, %v4887_v46, %v5781_v56 }
 0x2c5   : > { %v5786_v43 = vunpack.i.h.bf16 %v5784_v59  ;;  %v5785_v50 = vunpack.i.l.bf16 %v5784_v59  ;;  %v4837_v45 = vpop.permute.xlu1 %4836 }
 0x2c7   : > { %v4892_v15 = vsel %vm980_vm2, %v4889_v39, %v5785_v50  ;;  %v4893_v31 = vsel %vm980_vm2, %v4890_v35, %v5786_v43 }
 0x2c8   : > { %v5789_v0 = vpop.permute.xlu0 %5788 }
 0x2c9   : > { %v5791_v18 = vunpack.i.h.bf16 %v5789_v0  ;;  %v5790_v57 = vunpack.i.l.bf16 %v5789_v0  ;;  %v4861_v48 = vpop.permute.xlu1 %4860 }
 0x2cb   : > { %v4895_v32 = vsel %vm984_vm3, %v4892_v15, %v5790_v57  ;;  %v4896_v12 = vsel %vm984_vm3, %v4893_v31, %v5791_v18 }
 0x2cc   : > { %v4825_v30 = vpop.permute.xlu0 %4824  ;;  %v5254_v38 = vpack.c.bf16 %v4896_v12, %v4895_v32 }
 0x2cd   : > { %v4885_v49 = vsel %vm968_vm15, %v4882_v53, %v4825_v30 }
 0x2ce   : > { %5255 = vmatpush1.bf16.msra.mxu0 %v5254_v38  ;;  %v4888_v10 = vsel %vm972_vm0, %v4885_v49, %v4837_v45 }
 0x2cf   : > { %5006 = vmatprep.subr.mxu0 %v9398_v17 }
 0x2d0   : > { %v4849_v61 = vpop.permute.xlu0 %4848 }
 0x2d1   : > { %v4891_v2 = vsel %vm976_vm1, %v4888_v10, %v4849_v61 }
 0x2d2   : > { %v4894_v21 = vsel %vm980_vm2, %v4891_v2, %v4861_v48 }
 0x2d4   : > { %v4873_v42 = vpop.permute.xlu0 %4872 }
 0x2d5   : > { %v4897_v19 = vsel %vm984_vm3, %v4894_v21, %v4873_v42 }
 0x2d6   : > { %5216 = vmatpush1.msk.msra.mxu0 %vm4901_vm5, %v4897_v19 }
 0x2d7   : > { %5027 = vmatmul.mubr.f32.vlgmr.msra.gmra.mrb[0].mxu0 %v4947_v14 }
 0x2da   : > { %v4953_v40 = vpop.permute.xlu1 %4952 }
 0x2de   : > { %v5063_v9 = vpop.permute.xlu1 %5062 }
 0x2e5   : > { %v5056_v33 = vpop.permute.xlu0 %5055 }
 0x3aa   : > { %v5028_v17 = vpop.f32.mrb[0].mxu0 }
 0x3ab   : > { %v5029_v6 = vadd.f32 %v5028_v17, %v4953_v40  ;;  %v5030_v37 = vpop.f32.mrb[1].mxu0 }
 0x3ad   : > { %v5032_v5 = vrot.slane %v5029_v6, 4 }
 0x3af   : > { %v5033_v23 = vadd.f32 %v5032_v5, %v5029_v6 }
 0x3b1   : > { %v5034_v11 = vrot.slane %v5033_v23, 2 }
 0x3b3   : > { %v5035_v58 = vadd.f32 %v5034_v11, %v5033_v23 }
 0x3b5   : > { %v5036_v3 = vrot.slane %v5035_v58, 1 }
 0x3b7   : > { %v5037_v13 = vadd.f32 %v5036_v3, %v5035_v58 }
 0x3b9   : > { %v5039_v22 = vmul.f32 0.125, %v5037_v13 }
 0x3bb   : > { %v5040_v54 = vsub.f32 %v5029_v6, %v5039_v22 }
 0x3bd   : > { %v5041_v60 = vmul.f32 %v5040_v54, %v5040_v54 }
 0x3bf   : > { %v5042_v44 = vrot.slane %v5041_v60, 4 }
 0x3c1   : > { %v5043_v34 = vadd.f32 %v5042_v44, %v5041_v60 }
 0x3c3   : > { %v5044_v24 = vrot.slane %v5043_v34, 2 }
 0x3c5   : > { %v5045_v26 = vadd.f32 %v5044_v24, %v5043_v34 }
 0x3c7   : > { %v5046_v55 = vrot.slane %v5045_v26, 1 }
 0x3c9   : > { %v5047_v62 = vadd.f32 %v5046_v55, %v5045_v26 }
 0x3cb   : > { %v5048_v28 = vmul.f32 0.125, %v5047_v62 }
 0x3cd   : > { %v5049_v1 = vadd.f32 1e-05, %v5048_v28 }
 0x3cf   : > { %5810 = vrsqrt.f32 %v5049_v1 }
 0x3d9   : > { %v5811_v52 = vpop.eup %5810 }
 0x3da   : > { %v5051_v63 = vmul.f32 %v5811_v52, %v5040_v54 }
 0x3dc   : > { %v5058_v51 = vmul.f32 %v5056_v33, %v5051_v63 }
 0x3de   : > { %v5065_v29 = vadd.f32 %v5063_v9, %v5058_v51 }
 0x3e0   : > { %5066 = vst [vmem:[%s322_s17] sm:$0xff] %v5065_v29 }
 0x3e1   : > { %5855 = shalt.err (!%p5852_p13)
}
 0x3e2   : > { %s5856_s20 = scalar_lea.hbm %s9085_s21, 128  ;;  %s5860_s19 = scalar_lea.hbm %s9145_s7, 512 }
 0x3e3   : > { %p5857_p1 = scmp.ne.s32.totalorder %s9085_s21, %s5856_s20  ;;  %p5861_p6 = scmp.lt.u32.totalorder %s9085_s21, %s9145_s7 }
 0x3e4   : > { %p5862_p3 = scmp.lt.u32.totalorder %s5860_s19, %s5856_s20  ;;  %p5864_p10 = scmp.lt.u32.totalorder %s5856_s20, %s9085_s21 }
 0x3e5   : > { %p5858_p4 = pnand %p5857_p1, %p9702_p12 }
 0x3e6   : > { %p5863_p8 = por %p5862_p3, %p5861_p6 }
 0x3e7   : > { %p5859_p5 = pneg %p5858_p4 }
 0x3e8   : > { %p5865_p0 = por %p5864_p10, %p5863_p8 }
 0x3ea   : > { %p5866_p2 = pnand %p5865_p0, %p5859_p5 }
 0x3ec   : > { %5869 = shalt.err (!%p5866_p2)
}
 0x3ed   : > { %5264 = dma.vmem_to_hbm [thread:$0]  (%p9702_p12), %s9087_s3, 128, %s9085_s21, %s5068_s27  }
 0x3ee PF: > { %p5281_p7 = scmp.ge.s32.totalorder %s5944_s8, 2  ;;  %s5095_s13 = sand.u32 1, %s5916_s24  }
 0x3ef   : > { %p9703_p9 = scmp.ne.s32.totalorder %s9327_s16, 0  ;;  %s5096_s28 = scalar_lea.sflag [#allocation3], %s5095_s13 }
 0x3f1   : > { %p5274_p11 = pnand %p5281_p7, %p9703_p9 }
 0x3f3   : > { %5911 = dma.done.wait (!%p5274_p11), %s5096_s28, 128  }
 0x3f4   : > { %5913 = vsyncadd (!%p5274_p11), %s5096_s28, 4294967168  ;;  %s22_s8 = sadd.s32 1, %s5944_s8   ;;  %s9704_s15 = sld [smem:[#allocation11_spill]] }
 0x3f5   : > { %p19_p13 = scmp.ge.s32.totalorder %s22_s8, 6   ;;  %s9705_s24 = smov %s5920_s25 }
 0x3f6   : > { %s9706_s25 = smov %s5924_s26  ;;  %s9707_s26 = smov %s6085_s10 }
 0x3f7   : > { %s9708_s27 = smov %s5936_s29  ;;  %s9709_s28 = smov %s5940_s30 }
 0x3f8   : > { %s9710_s29 = smov %s9713_s11  ;;  %21 = sbr.rel (!%p19_p13) target bundleno = 9 (0x9), region = 92 }
 0x3fa   : > { %s9711_s30 = smov %s9704_s15 }
 0x3ff   :  { %5101 = vsyncpa [#allocation3], 1 }
 0x400   :  { %5103 = vsyncpa [#allocation3 + $0x1], 1 }
 0x401   :  { %5104 = vsyncpa [#allocation4], 1 }
 0x402   :  { %5106 = vsyncpa [#allocation4 + $0x1], 1 }
 0x403   :  { %5107 = vsyncpa [#allocation6], 1 }

</bundles_post_ra>
